<compile_context>
chip_gen: v7x
topology: tpu7x:2x2x1
jax: 0.10.0
libtpu: 0.0.40
codegen_flags: <defaults>
</compile_context>

<pallas_src>
import functools

import jax
import jax.numpy as jnp
import numpy as np
from jax import lax
from jax.experimental import pallas as pl
from jax.experimental.pallas import tpu as pltpu


def _block_kernel(x_ref, g0_ref, b0_ref, g1_ref, b1_ref,
                  wqkv_ref, w1_ref, bb1_ref, w2_ref, bb2_ref,
                  o_ref, k_scr, v_scr, *, num_heads, head_size):
    eps = 1e-5
    H, c = num_heads, head_size
    TQ = x_ref.shape[1]          # query tile length (== key tile length)
    C = x_ref.shape[2]           # embed size
    qi = pl.program_id(1)
    qs = pl.multiple_of(qi * TQ, TQ)   # global start row of this query tile

    x_t = x_ref[0]                                        # (TQ, C) f32

    # ---- LayerNorm 0 (f32 statistics, biased variance, eps=1e-5) ----
    mu0 = jnp.mean(x_t, axis=-1, keepdims=True)
    var0 = jnp.mean((x_t - mu0) ** 2, axis=-1, keepdims=True)
    h0 = (x_t - mu0) * lax.rsqrt(var0 + eps) * g0_ref[0] + b0_ref[0]

    # ---- Fused QKV projection: one bf16 matmul, f32 accumulate ----
    qkv = jnp.dot(h0.astype(jnp.bfloat16), wqkv_ref[...],
                  preferred_element_type=jnp.float32)     # (TQ, 3C)

    # Slab split into head-major bf16 views: (TQ, 3C) -> (3H, TQ, c).
    # Column order of qkv is [Q (h*c+d) | K | V], so group index = g*H + h.
    qkvh = jnp.transpose(qkv.reshape(TQ, 3 * H, c), (1, 0, 2)).astype(jnp.bfloat16)
    q_t = qkvh[:H]               # (H, TQ, c)
    k_t = qkvh[H:2 * H]          # (H, TQ, c)
    v_t = qkvh[2 * H:]           # (H, TQ, c)

    # Append this tile's K/V to the carried per-batch caches (one store each).
    # Only tiles 0..qi are ever read, so stale data from a previous batch
    # element is never touched and no zero-init is needed.
    k_scr[:, pl.ds(qs, TQ), :] = k_t
    v_scr[:, pl.ds(qs, TQ), :] = v_t

    # ---- Key-blocked causal attention (online softmax) ----
    inv_scale = 1.0 / (c ** 0.5)

    def attend(carry, k_blk, v_blk, mask=None):
        m_prev, l_prev, acc_prev = carry
        s = jnp.einsum('hqd,hkd->hqk', q_t, k_blk,
                       preferred_element_type=jnp.float32) * inv_scale
        if mask is not None:
            s = jnp.where(mask, s, -jnp.inf)
        m_new = jnp.maximum(m_prev, jnp.max(s, axis=-1, keepdims=True))
        alpha = jnp.exp(m_prev - m_new)
        p = jnp.exp(s - m_new)
        l_new = alpha * l_prev + jnp.sum(p, axis=-1, keepdims=True)
        acc_new = alpha * acc_prev + jnp.einsum(
            'hqk,hkd->hqd', p.astype(jnp.bfloat16), v_blk,
            preferred_element_type=jnp.float32)
        return m_new, l_new, acc_new

    carry0 = (jnp.full((H, TQ, 1), -jnp.inf, jnp.float32),
              jnp.zeros((H, TQ, 1), jnp.float32),
              jnp.zeros((H, TQ, c), jnp.float32))

    def past_block(ki, carry):
        ks = pl.multiple_of(ki * TQ, TQ)
        return attend(carry,
                      k_scr[:, pl.ds(ks, TQ), :],
                      v_scr[:, pl.ds(ks, TQ), :])

    # Strictly-past key tiles: fully visible, no mask, no select work.
    carry = lax.fori_loop(0, qi, past_block, carry0)

    # Diagonal key tile: mask built once in 2-D and broadcast over heads.
    diag_mask = (lax.broadcasted_iota(jnp.int32, (TQ, TQ), 0) >=
                 lax.broadcasted_iota(jnp.int32, (TQ, TQ), 1))[None, :, :]
    _, l_f, acc_f = attend(carry, k_t, v_t, mask=diag_mask)

    y_h = acc_f * pl.reciprocal(l_f, approx=True)         # (H, TQ, c) f32
    # Single lane-dense (TQ, C) attention output; col = h*c + d matches
    # torch's transpose(-3,-2).view(B,T,C).
    y = jnp.transpose(y_h, (1, 0, 2)).reshape(TQ, C)

    # ---- Residual 1 + LayerNorm 1 ----
    x1 = x_t + y
    mu1 = jnp.mean(x1, axis=-1, keepdims=True)
    var1 = jnp.mean((x1 - mu1) ** 2, axis=-1, keepdims=True)
    h1 = (x1 - mu1) * lax.rsqrt(var1 + eps) * g1_ref[0] + b1_ref[0]

    # ---- MLP: Linear -> ReLU -> Linear (per query tile) ----
    m = jnp.dot(h1.astype(jnp.bfloat16), w1_ref[...],
                preferred_element_type=jnp.float32) + bb1_ref[0]
    m = jnp.maximum(m, 0.0)
    mlp = jnp.dot(m.astype(jnp.bfloat16), w2_ref[...],
                  preferred_element_type=jnp.float32) + bb2_ref[0]

    # ---- Residual 2 ----
    o_ref[0] = (x1 + mlp).astype(o_ref.dtype)


def transformer_block(x, params, num_heads):
    """params = (g0, b0, g1, b1, w_attn(3C,C), w1(M,C), bb1(M,), w2(C,M), bb2(C,))."""
    B, T, C = x.shape
    H = num_heads
    c = C // H
    g0, b0, g1, b1, w_attn, w1, bb1, w2, bb2 = params
    M = w1.shape[0]

    # Query/key tile: largest candidate that divides T (multiple of 8); else T.
    TQ = T
    for cand in (256, 128, 64, 32, 16, 8):
        if T % cand == 0:
            TQ = cand
            break
    NQ = T // TQ

    # PyTorch split: attention(x).view(B,T,H,3c) -> head h uses features
    # [h*3c:(h+1)*3c] split as (Q_h, K_h, V_h). Build one fused (C, 3C) weight
    # with column order [Q (head-minor) | K | V], cast to bf16 for the MXU.
    w_t = w_attn.T.reshape(C, H, 3, c)
    wq = w_t[:, :, 0, :].reshape(C, C)
    wk = w_t[:, :, 1, :].reshape(C, C)
    wv = w_t[:, :, 2, :].reshape(C, C)
    wqkv = jnp.concatenate([wq, wk, wv], axis=1).astype(jnp.bfloat16)  # (C, 3C)

    w1_t = w1.T.astype(jnp.bfloat16)    # (C, M)
    w2_t = w2.T.astype(jnp.bfloat16)    # (M, C)

    g0r = g0.reshape(1, C).astype(jnp.float32)
    b0r = b0.reshape(1, C).astype(jnp.float32)
    g1r = g1.reshape(1, C).astype(jnp.float32)
    b1r = b1.reshape(1, C).astype(jnp.float32)
    bb1r = bb1.reshape(1, M).astype(jnp.float32)
    bb2r = bb2.reshape(1, C).astype(jnp.float32)

    kernel = functools.partial(_block_kernel, num_heads=H, head_size=c)

    # Corrected cost estimate: QKV GEMM + causal QK^T/PV + MLP, exp ~ H*T^2/2.
    cost = pl.CostEstimate(
        flops=int(B * (6 * T * C * C + 2 * T * T * C + 4 * T * C * M)),
        transcendentals=int(B * H * T * T // 2),
        bytes_accessed=int(2 * B * T * C * 4                 # x in + out (f32)
                           + 2 * (3 * C * C + 2 * C * M)     # bf16 weights
                           + 4 * (5 * C + M)))               # LN params + biases

    def build(single_buffer_consts):
        if single_buffer_consts:
            def const(shape):
                return pl.BlockSpec(shape, lambda b, q: (0, 0),
                                    pipeline_mode=pl.Buffered(1))
        else:
            def const(shape):
                return pl.BlockSpec(shape, lambda b, q: (0, 0))

        return pl.pallas_call(
            kernel,
            out_shape=jax.ShapeDtypeStruct((B, T, C), x.dtype),
            grid_spec=pltpu.PrefetchScalarGridSpec(
                num_scalar_prefetch=0,
                grid=(B, NQ),
                in_specs=[
                    pl.BlockSpec((1, TQ, C), lambda b, q: (b, q, 0)),  # x tile
                    const((1, C)), const((1, C)),                      # ln0 g/b
                    const((1, C)), const((1, C)),                      # ln1 g/b
                    const((C, 3 * C)),                                 # fused Wqkv
                    const((C, M)), const((1, M)),                      # W1, b1
                    const((M, C)), const((1, C)),                      # W2, b2
                ],
                out_specs=pl.BlockSpec((1, TQ, C), lambda b, q: (b, q, 0)),
                scratch_shapes=[
                    pltpu.VMEM((H, T, c), jnp.bfloat16),   # K cache (head-major)
                    pltpu.VMEM((H, T, c), jnp.bfloat16),   # V cache (head-major)
                ],
            ),
            compiler_params=pltpu.CompilerParams(
                dimension_semantics=("parallel", "arbitrary"),
                vmem_limit_bytes=56 * 1024 * 1024),        # fits v7x's 64 MiB
            cost_estimate=cost,
        )

    args = (x, g0r, b0r, g1r, b1r, wqkv, w1_t, bb1r, w2_t, bb2r)
    try:
        return jax.block_until_ready(build(True)(*args))
    except Exception:
        # pipeline_mode=pl.Buffered(1) not accepted by this JAX/Mosaic version:
        # fall back to default double-buffered constants (identical results).
        return build(False)(*args)


def reference_block(x, params, num_heads):
    """Pure-JAX mirror of the PyTorch forward, for sanity checking."""
    g0, b0, g1, b1, w_attn, w1, bb1, w2, bb2 = params
    B, T, C = x.shape
    c = C // num_heads

    def ln(z, g, b):
        mu = jnp.mean(z, -1, keepdims=True)
        var = jnp.mean((z - mu) ** 2, -1, keepdims=True)
        return (z - mu) / jnp.sqrt(var + 1e-5) * g + b

    h = ln(x, g0, b0)
    qkv = (h @ w_attn.T).reshape(B, T, num_heads, 3 * c).transpose(0, 2, 1, 3)
    q, k, v = qkv[..., :c], qkv[..., c:2 * c], qkv[..., 2 * c:]
    a = (q @ jnp.swapaxes(k, -1, -2)) / (c ** 0.5)
    mask = jnp.where(jnp.tril(jnp.ones((T, T))) > 0, 0.0, -jnp.inf)
    a = a + mask
    p = jax.nn.softmax(a, axis=-1)
    y = (p @ v).transpose(0, 2, 1, 3).reshape(B, T, C)
    x = x + y
    h2 = ln(x, g1, b1)
    m = jnp.maximum(h2 @ w1.T + bb1, 0.0)
    return x + m @ w2.T + bb2


if __name__ == "__main__":
    B, T, C = 2, 24, 32         # batch, seq, embed (T=24 -> 3 query tiles of 8)
    H = 4                       # num_heads
    M = 64                      # mlp_size

    key = jax.random.PRNGKey(0)
    ks = jax.random.split(key, 8)
    x = jax.random.normal(ks[0], (B, T, C), jnp.float32)

    g0 = 1.0 + 0.1 * jax.random.normal(ks[1], (C,), jnp.float32)
    b0 = 0.1 * jax.random.normal(ks[2], (C,), jnp.float32)
    g1 = 1.0 + 0.1 * jax.random.normal(ks[3], (C,), jnp.float32)
    b1 = 0.1 * jax.random.normal(ks[4], (C,), jnp.float32)
    w_attn = 0.1 * jax.random.normal(ks[5], (3 * C, C), jnp.float32)   # Linear(C, 3C), no bias
    w1 = 0.1 * jax.random.normal(ks[6], (M, C), jnp.float32)           # Linear(C, M)
    bb1 = 0.05 * jnp.cos(jnp.arange(M, dtype=jnp.float32))
    w2 = 0.1 * jax.random.normal(ks[7], (C, M), jnp.float32)           # Linear(M, C)
    bb2 = 0.05 * jnp.sin(jnp.arange(C, dtype=jnp.float32))

    params = (g0, b0, g1, b1, w_attn, w1, bb1, w2, bb2)

    out = transformer_block(x, params, num_heads=H)
    out = jax.block_until_ready(out)

    ref = jax.block_until_ready(reference_block(x, params, num_heads=H))
    # bf16 matmul operands (f32 accumulate) + online softmax + approx recip
    # => slightly looser tolerance.
    np.testing.assert_allclose(np.asarray(out), np.asarray(ref),
                               rtol=3e-2, atol=3e-2)

    print("KERNEL_OK")
</pallas_src>

<mosaic_0001>
module attributes {stable_mosaic.version = 11 : i64} {
  func.func @_block_kernel(%arg0: i32, %arg1: i32, %arg2: memref<1x8x32xf32, #tpu.memory_space<vmem>>, %arg3: memref<1x32xf32, #tpu.memory_space<vmem>>, %arg4: memref<1x32xf32, #tpu.memory_space<vmem>>, %arg5: memref<1x32xf32, #tpu.memory_space<vmem>>, %arg6: memref<1x32xf32, #tpu.memory_space<vmem>>, %arg7: memref<32x96xbf16, #tpu.memory_space<vmem>>, %arg8: memref<32x64xbf16, #tpu.memory_space<vmem>>, %arg9: memref<1x64xf32, #tpu.memory_space<vmem>>, %arg10: memref<64x32xbf16, #tpu.memory_space<vmem>>, %arg11: memref<1x32xf32, #tpu.memory_space<vmem>>, %arg12: memref<1x8x32xf32, #tpu.memory_space<vmem>>, %arg13: memref<4x24x8xbf16, #tpu.memory_space<vmem>>, %arg14: memref<4x24x8xbf16, #tpu.memory_space<vmem>>) attributes {dimension_semantics = [#tpu.dimension_semantics<parallel>, #tpu.dimension_semantics<arbitrary>], iteration_bounds = array<i64: 2, 3>, scalar_prefetch = 0 : i64, scratch_operands = 2 : i64, tpu.core_type = #tpu.core_type<tc>, window_params = [{transform_indices = @transform_0, window_bounds = array<i64: 1, 8, 32>}, {pipeline_mode = #tpu.pipeline_mode<synchronous>, transform_indices = @transform_1, window_bounds = array<i64: 1, 32>}, {pipeline_mode = #tpu.pipeline_mode<synchronous>, transform_indices = @transform_2, window_bounds = array<i64: 1, 32>}, {pipeline_mode = #tpu.pipeline_mode<synchronous>, transform_indices = @transform_3, window_bounds = array<i64: 1, 32>}, {pipeline_mode = #tpu.pipeline_mode<synchronous>, transform_indices = @transform_4, window_bounds = array<i64: 1, 32>}, {pipeline_mode = #tpu.pipeline_mode<synchronous>, transform_indices = @transform_5, window_bounds = array<i64: 32, 96>}, {pipeline_mode = #tpu.pipeline_mode<synchronous>, transform_indices = @transform_6, window_bounds = array<i64: 32, 64>}, {pipeline_mode = #tpu.pipeline_mode<synchronous>, transform_indices = @transform_7, window_bounds = array<i64: 1, 64>}, {pipeline_mode = #tpu.pipeline_mode<synchronous>, transform_indices = @transform_8, window_bounds = array<i64: 64, 32>}, {pipeline_mode = #tpu.pipeline_mode<synchronous>, transform_indices = @transform_9, window_bounds = array<i64: 1, 32>}, {transform_indices = @transform_10, window_bounds = array<i64: 1, 8, 32>}]} {
    %c8_i32 = arith.constant 8 : i32
    %0 = arith.muli %arg1, %c8_i32 : i32
    %1 = tpu.assume_multiple %0, 8 : i32
    %c0 = arith.constant 0 : index
    %c0_0 = arith.constant 0 : index
    %c0_1 = arith.constant 0 : index
    %2 = vector.load %arg2[%c0, %c0_0, %c0_1] : memref<1x8x32xf32, #tpu.memory_space<vmem>>, vector<1x8x32xf32>
    %3 = vector.shape_cast %2 : vector<1x8x32xf32> to vector<8x32xf32>
    %cst = arith.constant dense<0.000000e+00> : vector<8xf32>
    %4 = vector.multi_reduction <add>, %3, %cst [1] : vector<8x32xf32> to vector<8xf32>
    %5 = vector.shape_cast %4 : vector<8xf32> to vector<8x1xf32>
    %cst_2 = arith.constant 3.200000e+01 : f32
    %6 = vector.broadcast %cst_2 : f32 to vector<8x1xf32>
    %7 = arith.divf %5, %6 : vector<8x1xf32>
    %8 = vector.broadcast %7 : vector<8x1xf32> to vector<8x32xf32>
    %9 = arith.subf %3, %8 : vector<8x32xf32>
    %10 = arith.mulf %9, %9 : vector<8x32xf32>
    %cst_3 = arith.constant dense<0.000000e+00> : vector<8xf32>
    %11 = vector.multi_reduction <add>, %10, %cst_3 [1] : vector<8x32xf32> to vector<8xf32>
    %12 = vector.shape_cast %11 : vector<8xf32> to vector<8x1xf32>
    %cst_4 = arith.constant 3.200000e+01 : f32
    %13 = vector.broadcast %cst_4 : f32 to vector<8x1xf32>
    %14 = arith.divf %12, %13 : vector<8x1xf32>
    %15 = vector.broadcast %7 : vector<8x1xf32> to vector<8x32xf32>
    %16 = arith.subf %3, %15 : vector<8x32xf32>
    %cst_5 = arith.constant 9.99999974E-6 : f32
    %17 = vector.broadcast %cst_5 : f32 to vector<8x1xf32>
    %18 = arith.addf %14, %17 : vector<8x1xf32>
    %19 = math.rsqrt %18 : vector<8x1xf32>
    %20 = vector.broadcast %19 : vector<8x1xf32> to vector<8x32xf32>
    %21 = arith.mulf %16, %20 : vector<8x32xf32>
    %c0_6 = arith.constant 0 : index
    %c0_7 = arith.constant 0 : index
    %22 = vector.load %arg3[%c0_6, %c0_7] : memref<1x32xf32, #tpu.memory_space<vmem>>, vector<1x32xf32>
    %23 = vector.shape_cast %22 : vector<1x32xf32> to vector<32xf32>
    %24 = vector.shape_cast %23 : vector<32xf32> to vector<1x32xf32>
    %25 = vector.broadcast %24 : vector<1x32xf32> to vector<8x32xf32>
    %26 = arith.mulf %21, %25 : vector<8x32xf32>
    %c0_8 = arith.constant 0 : index
    %c0_9 = arith.constant 0 : index
    %27 = vector.load %arg4[%c0_8, %c0_9] : memref<1x32xf32, #tpu.memory_space<vmem>>, vector<1x32xf32>
    %28 = vector.shape_cast %27 : vector<1x32xf32> to vector<32xf32>
    %29 = vector.shape_cast %28 : vector<32xf32> to vector<1x32xf32>
    %30 = vector.broadcast %29 : vector<1x32xf32> to vector<8x32xf32>
    %31 = arith.addf %26, %30 : vector<8x32xf32>
    %32 = arith.truncf %31 : vector<8x32xf32> to vector<8x32xbf16>
    %c0_10 = arith.constant 0 : index
    %c0_11 = arith.constant 0 : index
    %33 = vector.load %arg7[%c0_10, %c0_11] : memref<32x96xbf16, #tpu.memory_space<vmem>>, vector<32x96xbf16>
    %cst_12 = arith.constant dense<0.000000e+00> : vector<8x96xf32>
    %34 = tpu.matmul %32, %33, %cst_12 {dimension_numbers = #tpu.dot_dimension_numbers<[1], [0], [0], [1], [0, 0, 1, 1], [], []>} : vector<8x32xbf16>, vector<32x96xbf16>, vector<8x96xf32> -> vector<8x96xf32>
    %35 = vector.shape_cast %34 : vector<8x96xf32> to vector<8x12x8xf32>
    %36 = tpu.transpose %35, [1, 0, 2] : vector<8x12x8xf32> -> vector<12x8x8xf32>
    %37 = arith.truncf %36 : vector<12x8x8xf32> to vector<12x8x8xbf16>
    %38 = vector.extract_strided_slice %37 {offsets = [0, 0, 0], sizes = [4, 8, 8], strides = [1, 1, 1]} : vector<12x8x8xbf16> to vector<4x8x8xbf16>
    %39 = vector.extract_strided_slice %37 {offsets = [4, 0, 0], sizes = [4, 8, 8], strides = [1, 1, 1]} : vector<12x8x8xbf16> to vector<4x8x8xbf16>
    %40 = vector.extract_strided_slice %37 {offsets = [8, 0, 0], sizes = [4, 8, 8], strides = [1, 1, 1]} : vector<12x8x8xbf16> to vector<4x8x8xbf16>
    %c0_13 = arith.constant 0 : index
    %41 = arith.index_cast %1 : i32 to index
    %c0_14 = arith.constant 0 : index
    %42 = vector.load %arg13[%c0_13, %41, %c0_14] : memref<4x24x8xbf16, #tpu.memory_space<vmem>>, vector<4x8x8xbf16>
    tpu.vector_store %arg13[%c0_13, %41, %c0_14], %39 {strides = array<i32>} : memref<4x24x8xbf16, #tpu.memory_space<vmem>>, vector<4x8x8xbf16>,
    %c0_15 = arith.constant 0 : index
    %43 = arith.index_cast %1 : i32 to index
    %c0_16 = arith.constant 0 : index
    %44 = vector.load %arg14[%c0_15, %43, %c0_16] : memref<4x24x8xbf16, #tpu.memory_space<vmem>>, vector<4x8x8xbf16>
    tpu.vector_store %arg14[%c0_15, %43, %c0_16], %40 {strides = array<i32>} : memref<4x24x8xbf16, #tpu.memory_space<vmem>>, vector<4x8x8xbf16>,
    %cst_17 = arith.constant 0xFF800000 : f32
    %45 = vector.broadcast %cst_17 : f32 to vector<4x8x1xf32>
    %cst_18 = arith.constant 0.000000e+00 : f32
    %46 = vector.broadcast %cst_18 : f32 to vector<4x8x1xf32>
    %cst_19 = arith.constant 0.000000e+00 : f32
    %47 = vector.broadcast %cst_19 : f32 to vector<4x8x8xf32>
    %c0_i32 = arith.constant 0 : i32
    %48 = arith.subi %arg1, %c0_i32 : i32
    %49 = arith.addi %c0_i32, %48 : i32
    %c1_i32 = arith.constant 1 : i32
    %50:3 = scf.for %arg15 = %c0_i32 to %49 step %c1_i32 iter_args(%arg16 = %45, %arg17 = %46, %arg18 = %47) -> (vector<4x8x1xf32>, vector<4x8x1xf32>, vector<4x8x8xf32>)  : i32 {
      %c8_i32_49 = arith.constant 8 : i32
      %135 = arith.muli %arg15, %c8_i32_49 : i32
      %136 = tpu.assume_multiple %135, 8 : i32
      %c0_50 = arith.constant 0 : index
      %137 = arith.index_cast %136 : i32 to index
      %c0_51 = arith.constant 0 : index
      %138 = vector.load %arg13[%c0_50, %137, %c0_51] : memref<4x24x8xbf16, #tpu.memory_space<vmem>>, vector<4x8x8xbf16>
      %c0_52 = arith.constant 0 : index
      %139 = arith.index_cast %136 : i32 to index
      %c0_53 = arith.constant 0 : index
      %140 = vector.load %arg14[%c0_52, %139, %c0_53] : memref<4x24x8xbf16, #tpu.memory_space<vmem>>, vector<4x8x8xbf16>
      "tpu.trace_start"() <{level = 10 : i32, message = "hqd,hkd->hqk"}> : () -> ()
      %cst_54 = arith.constant dense<0.000000e+00> : vector<4x8x8xf32>
      %141 = tpu.matmul %38, %138, %cst_54 {dimension_numbers = #tpu.dot_dimension_numbers<[2], [2], [1], [1], [0, 0, 0, 1, 1, 1], [0], [0]>} : vector<4x8x8xbf16>, vector<4x8x8xbf16>, vector<4x8x8xf32> -> vector<4x8x8xf32>
      "tpu.trace_stop"() : () -> ()
      %cst_55 = arith.constant 0.353553385 : f32
      %142 = vector.broadcast %cst_55 : f32 to vector<4x8x8xf32>
      %143 = arith.mulf %141, %142 : vector<4x8x8xf32>
      %cst_56 = arith.constant dense<0xFF800000> : vector<4x8xf32>
      %144 = vector.multi_reduction <maximumf>, %143, %cst_56 [2] : vector<4x8x8xf32> to vector<4x8xf32>
      %145 = vector.shape_cast %144 : vector<4x8xf32> to vector<4x8x1xf32>
      %146 = arith.maximumf %arg16, %145 : vector<4x8x1xf32>
      %147 = arith.subf %arg16, %146 : vector<4x8x1xf32>
      %148 = math.exp %147 : vector<4x8x1xf32>
      %149 = vector.broadcast %146 : vector<4x8x1xf32> to vector<4x8x8xf32>
      %150 = arith.subf %143, %149 : vector<4x8x8xf32>
      %151 = math.exp %150 : vector<4x8x8xf32>
      %152 = arith.mulf %148, %arg17 : vector<4x8x1xf32>
      %cst_57 = arith.constant dense<0.000000e+00> : vector<4x8xf32>
      %153 = vector.multi_reduction <add>, %151, %cst_57 [2] : vector<4x8x8xf32> to vector<4x8xf32>
      %154 = vector.shape_cast %153 : vector<4x8xf32> to vector<4x8x1xf32>
      %155 = arith.addf %152, %154 : vector<4x8x1xf32>
      %156 = vector.broadcast %148 : vector<4x8x1xf32> to vector<4x8x8xf32>
      %157 = arith.mulf %156, %arg18 : vector<4x8x8xf32>
      %158 = arith.truncf %151 : vector<4x8x8xf32> to vector<4x8x8xbf16>
      "tpu.trace_start"() <{level = 10 : i32, message = "hqk,hkd->hqd"}> : () -> ()
      %cst_58 = arith.constant dense<0.000000e+00> : vector<4x8x8xf32>
      %159 = tpu.matmul %158, %140, %cst_58 {dimension_numbers = #tpu.dot_dimension_numbers<[2], [1], [1], [2], [0, 0, 0, 1, 1, 2], [0], [0]>} : vector<4x8x8xbf16>, vector<4x8x8xbf16>, vector<4x8x8xf32> -> vector<4x8x8xf32>
      "tpu.trace_stop"() : () -> ()
      %160 = arith.addf %157, %159 : vector<4x8x8xf32>
      scf.yield %146, %155, %160 : vector<4x8x1xf32>, vector<4x8x1xf32>, vector<4x8x8xf32>
    }
    %51 = tpu.iota {dimensions = array<i32: 0>} : vector<8x8xi32>
    %52 = tpu.iota {dimensions = array<i32: 1>} : vector<8x8xi32>
    %53 = arith.cmpi sge, %51, %52 : vector<8x8xi32>
    %54 = vector.shape_cast %53 : vector<8x8xi1> to vector<1x8x8xi1>
    "tpu.trace_start"() <{level = 10 : i32, message = "hqd,hkd->hqk"}> : () -> ()
    %cst_20 = arith.constant dense<0.000000e+00> : vector<4x8x8xf32>
    %55 = tpu.matmul %38, %39, %cst_20 {dimension_numbers = #tpu.dot_dimension_numbers<[2], [2], [1], [1], [0, 0, 0, 1, 1, 1], [0], [0]>} : vector<4x8x8xbf16>, vector<4x8x8xbf16>, vector<4x8x8xf32> -> vector<4x8x8xf32>
    "tpu.trace_stop"() : () -> ()
    %cst_21 = arith.constant 0.353553385 : f32
    %56 = vector.broadcast %cst_21 : f32 to vector<4x8x8xf32>
    %57 = arith.mulf %55, %56 : vector<4x8x8xf32>
    %cst_22 = arith.constant 0xFF800000 : f32
    %58 = vector.shape_cast %54 : vector<1x8x8xi1> to vector<1x8x8xi1>
    %59 = vector.broadcast %58 : vector<1x8x8xi1> to vector<4x8x8xi1>
    %60 = vector.broadcast %cst_22 : f32 to vector<4x8x8xf32>
    %61 = arith.select %59, %57, %60 : vector<4x8x8xi1>, vector<4x8x8xf32>
    %cst_23 = arith.constant dense<0xFF800000> : vector<4x8xf32>
    %62 = vector.multi_reduction <maximumf>, %61, %cst_23 [2] : vector<4x8x8xf32> to vector<4x8xf32>
    %63 = vector.shape_cast %62 : vector<4x8xf32> to vector<4x8x1xf32>
    %64 = arith.maximumf %50#0, %63 : vector<4x8x1xf32>
    %65 = arith.subf %50#0, %64 : vector<4x8x1xf32>
    %66 = math.exp %65 : vector<4x8x1xf32>
    %67 = vector.broadcast %64 : vector<4x8x1xf32> to vector<4x8x8xf32>
    %68 = arith.subf %61, %67 : vector<4x8x8xf32>
    %69 = math.exp %68 : vector<4x8x8xf32>
    %70 = arith.mulf %66, %50#1 : vector<4x8x1xf32>
    %cst_24 = arith.constant dense<0.000000e+00> : vector<4x8xf32>
    %71 = vector.multi_reduction <add>, %69, %cst_24 [2] : vector<4x8x8xf32> to vector<4x8xf32>
    %72 = vector.shape_cast %71 : vector<4x8xf32> to vector<4x8x1xf32>
    %73 = arith.addf %70, %72 : vector<4x8x1xf32>
    %74 = vector.broadcast %66 : vector<4x8x1xf32> to vector<4x8x8xf32>
    %75 = arith.mulf %74, %50#2 : vector<4x8x8xf32>
    %76 = arith.truncf %69 : vector<4x8x8xf32> to vector<4x8x8xbf16>
    "tpu.trace_start"() <{level = 10 : i32, message = "hqk,hkd->hqd"}> : () -> ()
    %cst_25 = arith.constant dense<0.000000e+00> : vector<4x8x8xf32>
    %77 = tpu.matmul %76, %40, %cst_25 {dimension_numbers = #tpu.dot_dimension_numbers<[2], [1], [1], [2], [0, 0, 0, 1, 1, 2], [0], [0]>} : vector<4x8x8xbf16>, vector<4x8x8xbf16>, vector<4x8x8xf32> -> vector<4x8x8xf32>
    "tpu.trace_stop"() : () -> ()
    %78 = arith.addf %75, %77 : vector<4x8x8xf32>
    %79 = tpu.reciprocal %73 {approx = true} : vector<4x8x1xf32> -> vector<4x8x1xf32>
    %80 = vector.broadcast %79 : vector<4x8x1xf32> to vector<4x8x8xf32>
    %81 = arith.mulf %78, %80 : vector<4x8x8xf32>
    %82 = tpu.transpose %81, [1, 0, 2] : vector<4x8x8xf32> -> vector<8x4x8xf32>
    %83 = vector.shape_cast %82 : vector<8x4x8xf32> to vector<8x32xf32>
    %84 = arith.addf %3, %83 : vector<8x32xf32>
    %cst_26 = arith.constant dense<0.000000e+00> : vector<8xf32>
    %85 = vector.multi_reduction <add>, %84, %cst_26 [1] : vector<8x32xf32> to vector<8xf32>
    %86 = vector.shape_cast %85 : vector<8xf32> to vector<8x1xf32>
    %cst_27 = arith.constant 3.200000e+01 : f32
    %87 = vector.broadcast %cst_27 : f32 to vector<8x1xf32>
    %88 = arith.divf %86, %87 : vector<8x1xf32>
    %89 = vector.broadcast %88 : vector<8x1xf32> to vector<8x32xf32>
    %90 = arith.subf %84, %89 : vector<8x32xf32>
    %91 = arith.mulf %90, %90 : vector<8x32xf32>
    %cst_28 = arith.constant dense<0.000000e+00> : vector<8xf32>
    %92 = vector.multi_reduction <add>, %91, %cst_28 [1] : vector<8x32xf32> to vector<8xf32>
    %93 = vector.shape_cast %92 : vector<8xf32> to vector<8x1xf32>
    %cst_29 = arith.constant 3.200000e+01 : f32
    %94 = vector.broadcast %cst_29 : f32 to vector<8x1xf32>
    %95 = arith.divf %93, %94 : vector<8x1xf32>
    %96 = vector.broadcast %88 : vector<8x1xf32> to vector<8x32xf32>
    %97 = arith.subf %84, %96 : vector<8x32xf32>
    %cst_30 = arith.constant 9.99999974E-6 : f32
    %98 = vector.broadcast %cst_30 : f32 to vector<8x1xf32>
    %99 = arith.addf %95, %98 : vector<8x1xf32>
    %100 = math.rsqrt %99 : vector<8x1xf32>
    %101 = vector.broadcast %100 : vector<8x1xf32> to vector<8x32xf32>
    %102 = arith.mulf %97, %101 : vector<8x32xf32>
    %c0_31 = arith.constant 0 : index
    %c0_32 = arith.constant 0 : index
    %103 = vector.load %arg5[%c0_31, %c0_32] : memref<1x32xf32, #tpu.memory_space<vmem>>, vector<1x32xf32>
    %104 = vector.shape_cast %103 : vector<1x32xf32> to vector<32xf32>
    %105 = vector.shape_cast %104 : vector<32xf32> to vector<1x32xf32>
    %106 = vector.broadcast %105 : vector<1x32xf32> to vector<8x32xf32>
    %107 = arith.mulf %102, %106 : vector<8x32xf32>
    %c0_33 = arith.constant 0 : index
    %c0_34 = arith.constant 0 : index
    %108 = vector.load %arg6[%c0_33, %c0_34] : memref<1x32xf32, #tpu.memory_space<vmem>>, vector<1x32xf32>
    %109 = vector.shape_cast %108 : vector<1x32xf32> to vector<32xf32>
    %110 = vector.shape_cast %109 : vector<32xf32> to vector<1x32xf32>
    %111 = vector.broadcast %110 : vector<1x32xf32> to vector<8x32xf32>
    %112 = arith.addf %107, %111 : vector<8x32xf32>
    %113 = arith.truncf %112 : vector<8x32xf32> to vector<8x32xbf16>
    %c0_35 = arith.constant 0 : index
    %c0_36 = arith.constant 0 : index
    %114 = vector.load %arg8[%c0_35, %c0_36] : memref<32x64xbf16, #tpu.memory_space<vmem>>, vector<32x64xbf16>
    %cst_37 = arith.constant dense<0.000000e+00> : vector<8x64xf32>
    %115 = tpu.matmul %113, %114, %cst_37 {dimension_numbers = #tpu.dot_dimension_numbers<[1], [0], [0], [1], [0, 0, 1, 1], [], []>} : vector<8x32xbf16>, vector<32x64xbf16>, vector<8x64xf32> -> vector<8x64xf32>
    %c0_38 = arith.constant 0 : index
    %c0_39 = arith.constant 0 : index
    %116 = vector.load %arg9[%c0_38, %c0_39] : memref<1x64xf32, #tpu.memory_space<vmem>>, vector<1x64xf32>
    %117 = vector.shape_cast %116 : vector<1x64xf32> to vector<64xf32>
    %118 = vector.shape_cast %117 : vector<64xf32> to vector<1x64xf32>
    %119 = vector.broadcast %118 : vector<1x64xf32> to vector<8x64xf32>
    %120 = arith.addf %115, %119 : vector<8x64xf32>
    %cst_40 = arith.constant 0.000000e+00 : f32
    %121 = vector.broadcast %cst_40 : f32 to vector<8x64xf32>
    %122 = arith.maximumf %120, %121 : vector<8x64xf32>
    %123 = arith.truncf %122 : vector<8x64xf32> to vector<8x64xbf16>
    %c0_41 = arith.constant 0 : index
    %c0_42 = arith.constant 0 : index
    %124 = vector.load %arg10[%c0_41, %c0_42] : memref<64x32xbf16, #tpu.memory_space<vmem>>, vector<64x32xbf16>
    %cst_43 = arith.constant dense<0.000000e+00> : vector<8x32xf32>
    %125 = tpu.matmul %123, %124, %cst_43 {dimension_numbers = #tpu.dot_dimension_numbers<[1], [0], [0], [1], [0, 0, 1, 1], [], []>} : vector<8x64xbf16>, vector<64x32xbf16>, vector<8x32xf32> -> vector<8x32xf32>
    %c0_44 = arith.constant 0 : index
    %c0_45 = arith.constant 0 : index
    %126 = vector.load %arg11[%c0_44, %c0_45] : memref<1x32xf32, #tpu.memory_space<vmem>>, vector<1x32xf32>
    %127 = vector.shape_cast %126 : vector<1x32xf32> to vector<32xf32>
    %128 = vector.shape_cast %127 : vector<32xf32> to vector<1x32xf32>
    %129 = vector.broadcast %128 : vector<1x32xf32> to vector<8x32xf32>
    %130 = arith.addf %125, %129 : vector<8x32xf32>
    %131 = arith.addf %84, %130 : vector<8x32xf32>
    %c0_46 = arith.constant 0 : index
    %c0_47 = arith.constant 0 : index
    %c0_48 = arith.constant 0 : index
    %132 = vector.load %arg12[%c0_46, %c0_47, %c0_48] : memref<1x8x32xf32, #tpu.memory_space<vmem>>, vector<1x8x32xf32>
    %133 = vector.shape_cast %132 : vector<1x8x32xf32> to vector<8x32xf32>
    %134 = vector.shape_cast %131 : vector<8x32xf32> to vector<1x8x32xf32>
    tpu.vector_store %arg12[%c0_46, %c0_47, %c0_48], %134 {strides = array<i32>} : memref<1x8x32xf32, #tpu.memory_space<vmem>>, vector<1x8x32xf32>,
    return
  }
  func.func @transform_0(%arg0: i32, %arg1: i32) -> (i32, i32, i32) {
    %c0_i32 = arith.constant 0 : i32
    %c0_i32_0 = arith.constant 0 : i32
    return %arg0, %arg1, %c0_i32 : i32, i32, i32
  }
  func.func @transform_1(%arg0: i32, %arg1: i32) -> (i32, i32) {
    %c0_i32 = arith.constant 0 : i32
    %c0_i32_0 = arith.constant 0 : i32
    %c0_i32_1 = arith.constant 0 : i32
    return %c0_i32, %c0_i32_0 : i32, i32
  }
  func.func @transform_2(%arg0: i32, %arg1: i32) -> (i32, i32) {
    %c0_i32 = arith.constant 0 : i32
    %c0_i32_0 = arith.constant 0 : i32
    %c0_i32_1 = arith.constant 0 : i32
    return %c0_i32, %c0_i32_0 : i32, i32
  }
  func.func @transform_3(%arg0: i32, %arg1: i32) -> (i32, i32) {
    %c0_i32 = arith.constant 0 : i32
    %c0_i32_0 = arith.constant 0 : i32
    %c0_i32_1 = arith.constant 0 : i32
    return %c0_i32, %c0_i32_0 : i32, i32
  }
  func.func @transform_4(%arg0: i32, %arg1: i32) -> (i32, i32) {
    %c0_i32 = arith.constant 0 : i32
    %c0_i32_0 = arith.constant 0 : i32
    %c0_i32_1 = arith.constant 0 : i32
    return %c0_i32, %c0_i32_0 : i32, i32
  }
  func.func @transform_5(%arg0: i32, %arg1: i32) -> (i32, i32) {
    %c0_i32 = arith.constant 0 : i32
    %c0_i32_0 = arith.constant 0 : i32
    %c0_i32_1 = arith.constant 0 : i32
    return %c0_i32, %c0_i32_0 : i32, i32
  }
  func.func @transform_6(%arg0: i32, %arg1: i32) -> (i32, i32) {
    %c0_i32 = arith.constant 0 : i32
    %c0_i32_0 = arith.constant 0 : i32
    %c0_i32_1 = arith.constant 0 : i32
    return %c0_i32, %c0_i32_0 : i32, i32
  }
  func.func @transform_7(%arg0: i32, %arg1: i32) -> (i32, i32) {
    %c0_i32 = arith.constant 0 : i32
    %c0_i32_0 = arith.constant 0 : i32
    %c0_i32_1 = arith.constant 0 : i32
    return %c0_i32, %c0_i32_0 : i32, i32
  }
  func.func @transform_8(%arg0: i32, %arg1: i32) -> (i32, i32) {
    %c0_i32 = arith.constant 0 : i32
    %c0_i32_0 = arith.constant 0 : i32
    %c0_i32_1 = arith.constant 0 : i32
    return %c0_i32, %c0_i32_0 : i32, i32
  }
  func.func @transform_9(%arg0: i32, %arg1: i32) -> (i32, i32) {
    %c0_i32 = arith.constant 0 : i32
    %c0_i32_0 = arith.constant 0 : i32
    %c0_i32_1 = arith.constant 0 : i32
    return %c0_i32, %c0_i32_0 : i32, i32
  }
  func.func @transform_10(%arg0: i32, %arg1: i32) -> (i32, i32, i32) {
    %c0_i32 = arith.constant 0 : i32
    %c0_i32_0 = arith.constant 0 : i32
    return %arg0, %arg1, %c0_i32 : i32, i32, i32
  }
}

module attributes {stable_mosaic.version = 11 : i64} {
  func.func @_block_kernel(%arg0: i32, %arg1: i32, %arg2: memref<1x8x32xf32, #tpu.memory_space<vmem>>, %arg3: memref<1x32xf32, #tpu.memory_space<vmem>>, %arg4: memref<1x32xf32, #tpu.memory_space<vmem>>, %arg5: memref<1x32xf32, #tpu.memory_space<vmem>>, %arg6: memref<1x32xf32, #tpu.memory_space<vmem>>, %arg7: memref<32x96xbf16, #tpu.memory_space<vmem>>, %arg8: memref<32x64xbf16, #tpu.memory_space<vmem>>, %arg9: memref<1x64xf32, #tpu.memory_space<vmem>>, %arg10: memref<64x32xbf16, #tpu.memory_space<vmem>>, %arg11: memref<1x32xf32, #tpu.memory_space<vmem>>, %arg12: memref<1x8x32xf32, #tpu.memory_space<vmem>>, %arg13: memref<4x24x8xbf16, #tpu.memory_space<vmem>>, %arg14: memref<4x24x8xbf16, #tpu.memory_space<vmem>>) attributes {dimension_semantics = [#tpu.dimension_semantics<parallel>, #tpu.dimension_semantics<arbitrary>], iteration_bounds = array<i64: 2, 3>, scalar_prefetch = 0 : i64, scratch_operands = 2 : i64, tpu.core_type = #tpu.core_type<tc>, window_params = [{transform_indices = @transform_0, window_bounds = array<i64: 1, 8, 32>}, {pipeline_mode = #tpu.pipeline_mode<synchronous>, transform_indices = @transform_1, window_bounds = array<i64: 1, 32>}, {pipeline_mode = #tpu.pipeline_mode<synchronous>, transform_indices = @transform_2, window_bounds = array<i64: 1, 32>}, {pipeline_mode = #tpu.pipeline_mode<synchronous>, transform_indices = @transform_3, window_bounds = array<i64: 1, 32>}, {pipeline_mode = #tpu.pipeline_mode<synchronous>, transform_indices = @transform_4, window_bounds = array<i64: 1, 32>}, {pipeline_mode = #tpu.pipeline_mode<synchronous>, transform_indices = @transform_5, window_bounds = array<i64: 32, 96>}, {pipeline_mode = #tpu.pipeline_mode<synchronous>, transform_indices = @transform_6, window_bounds = array<i64: 32, 64>}, {pipeline_mode = #tpu.pipeline_mode<synchronous>, transform_indices = @transform_7, window_bounds = array<i64: 1, 64>}, {pipeline_mode = #tpu.pipeline_mode<synchronous>, transform_indices = @transform_8, window_bounds = array<i64: 64, 32>}, {pipeline_mode = #tpu.pipeline_mode<synchronous>, transform_indices = @transform_9, window_bounds = array<i64: 1, 32>}, {transform_indices = @transform_10, window_bounds = array<i64: 1, 8, 32>}]} {
    %c8_i32 = arith.constant 8 : i32
    %0 = arith.muli %arg1, %c8_i32 : i32
    %1 = tpu.assume_multiple %0, 8 : i32
    %c0 = arith.constant 0 : index
    %c0_0 = arith.constant 0 : index
    %c0_1 = arith.constant 0 : index
    %2 = vector.load %arg2[%c0, %c0_0, %c0_1] : memref<1x8x32xf32, #tpu.memory_space<vmem>>, vector<1x8x32xf32>
    %3 = vector.shape_cast %2 : vector<1x8x32xf32> to vector<8x32xf32>
    %cst = arith.constant dense<0.000000e+00> : vector<8xf32>
    %4 = vector.multi_reduction <add>, %3, %cst [1] : vector<8x32xf32> to vector<8xf32>
    %5 = vector.shape_cast %4 : vector<8xf32> to vector<8x1xf32>
    %cst_2 = arith.constant 3.200000e+01 : f32
    %6 = vector.broadcast %cst_2 : f32 to vector<8x1xf32>
    %7 = arith.divf %5, %6 : vector<8x1xf32>
    %8 = vector.broadcast %7 : vector<8x1xf32> to vector<8x32xf32>
    %9 = arith.subf %3, %8 : vector<8x32xf32>
    %10 = arith.mulf %9, %9 : vector<8x32xf32>
    %cst_3 = arith.constant dense<0.000000e+00> : vector<8xf32>
    %11 = vector.multi_reduction <add>, %10, %cst_3 [1] : vector<8x32xf32> to vector<8xf32>
    %12 = vector.shape_cast %11 : vector<8xf32> to vector<8x1xf32>
    %cst_4 = arith.constant 3.200000e+01 : f32
    %13 = vector.broadcast %cst_4 : f32 to vector<8x1xf32>
    %14 = arith.divf %12, %13 : vector<8x1xf32>
    %15 = vector.broadcast %7 : vector<8x1xf32> to vector<8x32xf32>
    %16 = arith.subf %3, %15 : vector<8x32xf32>
    %cst_5 = arith.constant 9.99999974E-6 : f32
    %17 = vector.broadcast %cst_5 : f32 to vector<8x1xf32>
    %18 = arith.addf %14, %17 : vector<8x1xf32>
    %19 = math.rsqrt %18 : vector<8x1xf32>
    %20 = vector.broadcast %19 : vector<8x1xf32> to vector<8x32xf32>
    %21 = arith.mulf %16, %20 : vector<8x32xf32>
    %c0_6 = arith.constant 0 : index
    %c0_7 = arith.constant 0 : index
    %22 = vector.load %arg3[%c0_6, %c0_7] : memref<1x32xf32, #tpu.memory_space<vmem>>, vector<1x32xf32>
    %23 = vector.shape_cast %22 : vector<1x32xf32> to vector<32xf32>
    %24 = vector.shape_cast %23 : vector<32xf32> to vector<1x32xf32>
    %25 = vector.broadcast %24 : vector<1x32xf32> to vector<8x32xf32>
    %26 = arith.mulf %21, %25 : vector<8x32xf32>
    %c0_8 = arith.constant 0 : index
    %c0_9 = arith.constant 0 : index
    %27 = vector.load %arg4[%c0_8, %c0_9] : memref<1x32xf32, #tpu.memory_space<vmem>>, vector<1x32xf32>
    %28 = vector.shape_cast %27 : vector<1x32xf32> to vector<32xf32>
    %29 = vector.shape_cast %28 : vector<32xf32> to vector<1x32xf32>
    %30 = vector.broadcast %29 : vector<1x32xf32> to vector<8x32xf32>
    %31 = arith.addf %26, %30 : vector<8x32xf32>
    %32 = arith.truncf %31 : vector<8x32xf32> to vector<8x32xbf16>
    %c0_10 = arith.constant 0 : index
    %c0_11 = arith.constant 0 : index
    %33 = vector.load %arg7[%c0_10, %c0_11] : memref<32x96xbf16, #tpu.memory_space<vmem>>, vector<32x96xbf16>
    %cst_12 = arith.constant dense<0.000000e+00> : vector<8x96xf32>
    %34 = tpu.matmul %32, %33, %cst_12 {dimension_numbers = #tpu.dot_dimension_numbers<[1], [0], [0], [1], [0, 0, 1, 1], [], []>} : vector<8x32xbf16>, vector<32x96xbf16>, vector<8x96xf32> -> vector<8x96xf32>
    %35 = vector.shape_cast %34 : vector<8x96xf32> to vector<8x12x8xf32>
    %36 = tpu.transpose %35, [1, 0, 2] : vector<8x12x8xf32> -> vector<12x8x8xf32>
    %37 = arith.truncf %36 : vector<12x8x8xf32> to vector<12x8x8xbf16>
    %38 = vector.extract_strided_slice %37 {offsets = [0, 0, 0], sizes = [4, 8, 8], strides = [1, 1, 1]} : vector<12x8x8xbf16> to vector<4x8x8xbf16>
    %39 = vector.extract_strided_slice %37 {offsets = [4, 0, 0], sizes = [4, 8, 8], strides = [1, 1, 1]} : vector<12x8x8xbf16> to vector<4x8x8xbf16>
    %40 = vector.extract_strided_slice %37 {offsets = [8, 0, 0], sizes = [4, 8, 8], strides = [1, 1, 1]} : vector<12x8x8xbf16> to vector<4x8x8xbf16>
    %c0_13 = arith.constant 0 : index
    %41 = arith.index_cast %1 : i32 to index
    %c0_14 = arith.constant 0 : index
    %42 = vector.load %arg13[%c0_13, %41, %c0_14] : memref<4x24x8xbf16, #tpu.memory_space<vmem>>, vector<4x8x8xbf16>
    tpu.vector_store %arg13[%c0_13, %41, %c0_14], %39 {strides = array<i32>} : memref<4x24x8xbf16, #tpu.memory_space<vmem>>, vector<4x8x8xbf16>,
    %c0_15 = arith.constant 0 : index
    %43 = arith.index_cast %1 : i32 to index
    %c0_16 = arith.constant 0 : index
    %44 = vector.load %arg14[%c0_15, %43, %c0_16] : memref<4x24x8xbf16, #tpu.memory_space<vmem>>, vector<4x8x8xbf16>
    tpu.vector_store %arg14[%c0_15, %43, %c0_16], %40 {strides = array<i32>} : memref<4x24x8xbf16, #tpu.memory_space<vmem>>, vector<4x8x8xbf16>,
    %cst_17 = arith.constant 0xFF800000 : f32
    %45 = vector.broadcast %cst_17 : f32 to vector<4x8x1xf32>
    %cst_18 = arith.constant 0.000000e+00 : f32
    %46 = vector.broadcast %cst_18 : f32 to vector<4x8x1xf32>
    %cst_19 = arith.constant 0.000000e+00 : f32
    %47 = vector.broadcast %cst_19 : f32 to vector<4x8x8xf32>
    %c0_i32 = arith.constant 0 : i32
    %48 = arith.subi %arg1, %c0_i32 : i32
    %49 = arith.addi %c0_i32, %48 : i32
    %c1_i32 = arith.constant 1 : i32
    %50:3 = scf.for %arg15 = %c0_i32 to %49 step %c1_i32 iter_args(%arg16 = %45, %arg17 = %46, %arg18 = %47) -> (vector<4x8x1xf32>, vector<4x8x1xf32>, vector<4x8x8xf32>)  : i32 {
      %c8_i32_49 = arith.constant 8 : i32
      %135 = arith.muli %arg15, %c8_i32_49 : i32
      %136 = tpu.assume_multiple %135, 8 : i32
      %c0_50 = arith.constant 0 : index
      %137 = arith.index_cast %136 : i32 to index
      %c0_51 = arith.constant 0 : index
      %138 = vector.load %arg13[%c0_50, %137, %c0_51] : memref<4x24x8xbf16, #tpu.memory_space<vmem>>, vector<4x8x8xbf16>
      %c0_52 = arith.constant 0 : index
      %139 = arith.index_cast %136 : i32 to index
      %c0_53 = arith.constant 0 : index
      %140 = vector.load %arg14[%c0_52, %139, %c0_53] : memref<4x24x8xbf16, #tpu.memory_space<vmem>>, vector<4x8x8xbf16>
      "tpu.trace_start"() <{level = 10 : i32, message = "hqd,hkd->hqk"}> : () -> ()
      %cst_54 = arith.constant dense<0.000000e+00> : vector<4x8x8xf32>
      %141 = tpu.matmul %38, %138, %cst_54 {dimension_numbers = #tpu.dot_dimension_numbers<[2], [2], [1], [1], [0, 0, 0, 1, 1, 1], [0], [0]>} : vector<4x8x8xbf16>, vector<4x8x8xbf16>, vector<4x8x8xf32> -> vector<4x8x8xf32>
      "tpu.trace_stop"() : () -> ()
      %cst_55 = arith.constant 0.353553385 : f32
      %142 = vector.broadcast %cst_55 : f32 to vector<4x8x8xf32>
      %143 = arith.mulf %141, %142 : vector<4x8x8xf32>
      %cst_56 = arith.constant dense<0xFF800000> : vector<4x8xf32>
      %144 = vector.multi_reduction <maximumf>, %143, %cst_56 [2] : vector<4x8x8xf32> to vector<4x8xf32>
      %145 = vector.shape_cast %144 : vector<4x8xf32> to vector<4x8x1xf32>
      %146 = arith.maximumf %arg16, %145 : vector<4x8x1xf32>
      %147 = arith.subf %arg16, %146 : vector<4x8x1xf32>
      %148 = math.exp %147 : vector<4x8x1xf32>
      %149 = vector.broadcast %146 : vector<4x8x1xf32> to vector<4x8x8xf32>
      %150 = arith.subf %143, %149 : vector<4x8x8xf32>
      %151 = math.exp %150 : vector<4x8x8xf32>
      %152 = arith.mulf %148, %arg17 : vector<4x8x1xf32>
      %cst_57 = arith.constant dense<0.000000e+00> : vector<4x8xf32>
      %153 = vector.multi_reduction <add>, %151, %cst_57 [2] : vector<4x8x8xf32> to vector<4x8xf32>
      %154 = vector.shape_cast %153 : vector<4x8xf32> to vector<4x8x1xf32>
      %155 = arith.addf %152, %154 : vector<4x8x1xf32>
      %156 = vector.broadcast %148 : vector<4x8x1xf32> to vector<4x8x8xf32>
      %157 = arith.mulf %156, %arg18 : vector<4x8x8xf32>
      %158 = arith.truncf %151 : vector<4x8x8xf32> to vector<4x8x8xbf16>
      "tpu.trace_start"() <{level = 10 : i32, message = "hqk,hkd->hqd"}> : () -> ()
      %cst_58 = arith.constant dense<0.000000e+00> : vector<4x8x8xf32>
      %159 = tpu.matmul %158, %140, %cst_58 {dimension_numbers = #tpu.dot_dimension_numbers<[2], [1], [1], [2], [0, 0, 0, 1, 1, 2], [0], [0]>} : vector<4x8x8xbf16>, vector<4x8x8xbf16>, vector<4x8x8xf32> -> vector<4x8x8xf32>
      "tpu.trace_stop"() : () -> ()
      %160 = arith.addf %157, %159 : vector<4x8x8xf32>
      scf.yield %146, %155, %160 : vector<4x8x1xf32>, vector<4x8x1xf32>, vector<4x8x8xf32>
    }
    %51 = tpu.iota {dimensions = array<i32: 0>} : vector<8x8xi32>
    %52 = tpu.iota {dimensions = array<i32: 1>} : vector<8x8xi32>
    %53 = arith.cmpi sge, %51, %52 : vector<8x8xi32>
    %54 = vector.shape_cast %53 : vector<8x8xi1> to vector<1x8x8xi1>
    "tpu.trace_start"() <{level = 10 : i32, message = "hqd,hkd->hqk"}> : () -> ()
    %cst_20 = arith.constant dense<0.000000e+00> : vector<4x8x8xf32>
    %55 = tpu.matmul %38, %39, %cst_20 {dimension_numbers = #tpu.dot_dimension_numbers<[2], [2], [1], [1], [0, 0, 0, 1, 1, 1], [0], [0]>} : vector<4x8x8xbf16>, vector<4x8x8xbf16>, vector<4x8x8xf32> -> vector<4x8x8xf32>
    "tpu.trace_stop"() : () -> ()
    %cst_21 = arith.constant 0.353553385 : f32
    %56 = vector.broadcast %cst_21 : f32 to vector<4x8x8xf32>
    %57 = arith.mulf %55, %56 : vector<4x8x8xf32>
    %cst_22 = arith.constant 0xFF800000 : f32
    %58 = vector.shape_cast %54 : vector<1x8x8xi1> to vector<1x8x8xi1>
    %59 = vector.broadcast %58 : vector<1x8x8xi1> to vector<4x8x8xi1>
    %60 = vector.broadcast %cst_22 : f32 to vector<4x8x8xf32>
    %61 = arith.select %59, %57, %60 : vector<4x8x8xi1>, vector<4x8x8xf32>
    %cst_23 = arith.constant dense<0xFF800000> : vector<4x8xf32>
    %62 = vector.multi_reduction <maximumf>, %61, %cst_23 [2] : vector<4x8x8xf32> to vector<4x8xf32>
    %63 = vector.shape_cast %62 : vector<4x8xf32> to vector<4x8x1xf32>
    %64 = arith.maximumf %50#0, %63 : vector<4x8x1xf32>
    %65 = arith.subf %50#0, %64 : vector<4x8x1xf32>
    %66 = math.exp %65 : vector<4x8x1xf32>
    %67 = vector.broadcast %64 : vector<4x8x1xf32> to vector<4x8x8xf32>
    %68 = arith.subf %61, %67 : vector<4x8x8xf32>
    %69 = math.exp %68 : vector<4x8x8xf32>
    %70 = arith.mulf %66, %50#1 : vector<4x8x1xf32>
    %cst_24 = arith.constant dense<0.000000e+00> : vector<4x8xf32>
    %71 = vector.multi_reduction <add>, %69, %cst_24 [2] : vector<4x8x8xf32> to vector<4x8xf32>
    %72 = vector.shape_cast %71 : vector<4x8xf32> to vector<4x8x1xf32>
    %73 = arith.addf %70, %72 : vector<4x8x1xf32>
    %74 = vector.broadcast %66 : vector<4x8x1xf32> to vector<4x8x8xf32>
    %75 = arith.mulf %74, %50#2 : vector<4x8x8xf32>
    %76 = arith.truncf %69 : vector<4x8x8xf32> to vector<4x8x8xbf16>
    "tpu.trace_start"() <{level = 10 : i32, message = "hqk,hkd->hqd"}> : () -> ()
    %cst_25 = arith.constant dense<0.000000e+00> : vector<4x8x8xf32>
    %77 = tpu.matmul %76, %40, %cst_25 {dimension_numbers = #tpu.dot_dimension_numbers<[2], [1], [1], [2], [0, 0, 0, 1, 1, 2], [0], [0]>} : vector<4x8x8xbf16>, vector<4x8x8xbf16>, vector<4x8x8xf32> -> vector<4x8x8xf32>
    "tpu.trace_stop"() : () -> ()
    %78 = arith.addf %75, %77 : vector<4x8x8xf32>
    %79 = tpu.reciprocal %73 {approx = true} : vector<4x8x1xf32> -> vector<4x8x1xf32>
    %80 = vector.broadcast %79 : vector<4x8x1xf32> to vector<4x8x8xf32>
    %81 = arith.mulf %78, %80 : vector<4x8x8xf32>
    %82 = tpu.transpose %81, [1, 0, 2] : vector<4x8x8xf32> -> vector<8x4x8xf32>
    %83 = vector.shape_cast %82 : vector<8x4x8xf32> to vector<8x32xf32>
    %84 = arith.addf %3, %83 : vector<8x32xf32>
    %cst_26 = arith.constant dense<0.000000e+00> : vector<8xf32>
    %85 = vector.multi_reduction <add>, %84, %cst_26 [1] : vector<8x32xf32> to vector<8xf32>
    %86 = vector.shape_cast %85 : vector<8xf32> to vector<8x1xf32>
    %cst_27 = arith.constant 3.200000e+01 : f32
    %87 = vector.broadcast %cst_27 : f32 to vector<8x1xf32>
    %88 = arith.divf %86, %87 : vector<8x1xf32>
    %89 = vector.broadcast %88 : vector<8x1xf32> to vector<8x32xf32>
    %90 = arith.subf %84, %89 : vector<8x32xf32>
    %91 = arith.mulf %90, %90 : vector<8x32xf32>
    %cst_28 = arith.constant dense<0.000000e+00> : vector<8xf32>
    %92 = vector.multi_reduction <add>, %91, %cst_28 [1] : vector<8x32xf32> to vector<8xf32>
    %93 = vector.shape_cast %92 : vector<8xf32> to vector<8x1xf32>
    %cst_29 = arith.constant 3.200000e+01 : f32
    %94 = vector.broadcast %cst_29 : f32 to vector<8x1xf32>
    %95 = arith.divf %93, %94 : vector<8x1xf32>
    %96 = vector.broadcast %88 : vector<8x1xf32> to vector<8x32xf32>
    %97 = arith.subf %84, %96 : vector<8x32xf32>
    %cst_30 = arith.constant 9.99999974E-6 : f32
    %98 = vector.broadcast %cst_30 : f32 to vector<8x1xf32>
    %99 = arith.addf %95, %98 : vector<8x1xf32>
    %100 = math.rsqrt %99 : vector<8x1xf32>
    %101 = vector.broadcast %100 : vector<8x1xf32> to vector<8x32xf32>
    %102 = arith.mulf %97, %101 : vector<8x32xf32>
    %c0_31 = arith.constant 0 : index
    %c0_32 = arith.constant 0 : index
    %103 = vector.load %arg5[%c0_31, %c0_32] : memref<1x32xf32, #tpu.memory_space<vmem>>, vector<1x32xf32>
    %104 = vector.shape_cast %103 : vector<1x32xf32> to vector<32xf32>
    %105 = vector.shape_cast %104 : vector<32xf32> to vector<1x32xf32>
    %106 = vector.broadcast %105 : vector<1x32xf32> to vector<8x32xf32>
    %107 = arith.mulf %102, %106 : vector<8x32xf32>
    %c0_33 = arith.constant 0 : index
    %c0_34 = arith.constant 0 : index
    %108 = vector.load %arg6[%c0_33, %c0_34] : memref<1x32xf32, #tpu.memory_space<vmem>>, vector<1x32xf32>
    %109 = vector.shape_cast %108 : vector<1x32xf32> to vector<32xf32>
    %110 = vector.shape_cast %109 : vector<32xf32> to vector<1x32xf32>
    %111 = vector.broadcast %110 : vector<1x32xf32> to vector<8x32xf32>
    %112 = arith.addf %107, %111 : vector<8x32xf32>
    %113 = arith.truncf %112 : vector<8x32xf32> to vector<8x32xbf16>
    %c0_35 = arith.constant 0 : index
    %c0_36 = arith.constant 0 : index
    %114 = vector.load %arg8[%c0_35, %c0_36] : memref<32x64xbf16, #tpu.memory_space<vmem>>, vector<32x64xbf16>
    %cst_37 = arith.constant dense<0.000000e+00> : vector<8x64xf32>
    %115 = tpu.matmul %113, %114, %cst_37 {dimension_numbers = #tpu.dot_dimension_numbers<[1], [0], [0], [1], [0, 0, 1, 1], [], []>} : vector<8x32xbf16>, vector<32x64xbf16>, vector<8x64xf32> -> vector<8x64xf32>
    %c0_38 = arith.constant 0 : index
    %c0_39 = arith.constant 0 : index
    %116 = vector.load %arg9[%c0_38, %c0_39] : memref<1x64xf32, #tpu.memory_space<vmem>>, vector<1x64xf32>
    %117 = vector.shape_cast %116 : vector<1x64xf32> to vector<64xf32>
    %118 = vector.shape_cast %117 : vector<64xf32> to vector<1x64xf32>
    %119 = vector.broadcast %118 : vector<1x64xf32> to vector<8x64xf32>
    %120 = arith.addf %115, %119 : vector<8x64xf32>
    %cst_40 = arith.constant 0.000000e+00 : f32
    %121 = vector.broadcast %cst_40 : f32 to vector<8x64xf32>
    %122 = arith.maximumf %120, %121 : vector<8x64xf32>
    %123 = arith.truncf %122 : vector<8x64xf32> to vector<8x64xbf16>
    %c0_41 = arith.constant 0 : index
    %c0_42 = arith.constant 0 : index
    %124 = vector.load %arg10[%c0_41, %c0_42] : memref<64x32xbf16, #tpu.memory_space<vmem>>, vector<64x32xbf16>
    %cst_43 = arith.constant dense<0.000000e+00> : vector<8x32xf32>
    %125 = tpu.matmul %123, %124, %cst_43 {dimension_numbers = #tpu.dot_dimension_numbers<[1], [0], [0], [1], [0, 0, 1, 1], [], []>} : vector<8x64xbf16>, vector<64x32xbf16>, vector<8x32xf32> -> vector<8x32xf32>
    %c0_44 = arith.constant 0 : index
    %c0_45 = arith.constant 0 : index
    %126 = vector.load %arg11[%c0_44, %c0_45] : memref<1x32xf32, #tpu.memory_space<vmem>>, vector<1x32xf32>
    %127 = vector.shape_cast %126 : vector<1x32xf32> to vector<32xf32>
    %128 = vector.shape_cast %127 : vector<32xf32> to vector<1x32xf32>
    %129 = vector.broadcast %128 : vector<1x32xf32> to vector<8x32xf32>
    %130 = arith.addf %125, %129 : vector<8x32xf32>
    %131 = arith.addf %84, %130 : vector<8x32xf32>
    %c0_46 = arith.constant 0 : index
    %c0_47 = arith.constant 0 : index
    %c0_48 = arith.constant 0 : index
    %132 = vector.load %arg12[%c0_46, %c0_47, %c0_48] : memref<1x8x32xf32, #tpu.memory_space<vmem>>, vector<1x8x32xf32>
    %133 = vector.shape_cast %132 : vector<1x8x32xf32> to vector<8x32xf32>
    %134 = vector.shape_cast %131 : vector<8x32xf32> to vector<1x8x32xf32>
    tpu.vector_store %arg12[%c0_46, %c0_47, %c0_48], %134 {strides = array<i32>} : memref<1x8x32xf32, #tpu.memory_space<vmem>>, vector<1x8x32xf32>,
    return
  }
  func.func @transform_0(%arg0: i32, %arg1: i32) -> (i32, i32, i32) {
    %c0_i32 = arith.constant 0 : i32
    %c0_i32_0 = arith.constant 0 : i32
    return %arg0, %arg1, %c0_i32 : i32, i32, i32
  }
  func.func @transform_1(%arg0: i32, %arg1: i32) -> (i32, i32) {
    %c0_i32 = arith.constant 0 : i32
    %c0_i32_0 = arith.constant 0 : i32
    %c0_i32_1 = arith.constant 0 : i32
    return %c0_i32, %c0_i32_0 : i32, i32
  }
  func.func @transform_2(%arg0: i32, %arg1: i32) -> (i32, i32) {
    %c0_i32 = arith.constant 0 : i32
    %c0_i32_0 = arith.constant 0 : i32
    %c0_i32_1 = arith.constant 0 : i32
    return %c0_i32, %c0_i32_0 : i32, i32
  }
  func.func @transform_3(%arg0: i32, %arg1: i32) -> (i32, i32) {
    %c0_i32 = arith.constant 0 : i32
    %c0_i32_0 = arith.constant 0 : i32
    %c0_i32_1 = arith.constant 0 : i32
    return %c0_i32, %c0_i32_0 : i32, i32
  }
  func.func @transform_4(%arg0: i32, %arg1: i32) -> (i32, i32) {
    %c0_i32 = arith.constant 0 : i32
    %c0_i32_0 = arith.constant 0 : i32
    %c0_i32_1 = arith.constant 0 : i32
    return %c0_i32, %c0_i32_0 : i32, i32
  }
  func.func @transform_5(%arg0: i32, %arg1: i32) -> (i32, i32) {
    %c0_i32 = arith.constant 0 : i32
    %c0_i32_0 = arith.constant 0 : i32
    %c0_i32_1 = arith.constant 0 : i32
    return %c0_i32, %c0_i32_0 : i32, i32
  }
  func.func @transform_6(%arg0: i32, %arg1: i32) -> (i32, i32) {
    %c0_i32 = arith.constant 0 : i32
    %c0_i32_0 = arith.constant 0 : i32
    %c0_i32_1 = arith.constant 0 : i32
    return %c0_i32, %c0_i32_0 : i32, i32
  }
  func.func @transform_7(%arg0: i32, %arg1: i32) -> (i32, i32) {
    %c0_i32 = arith.constant 0 : i32
    %c0_i32_0 = arith.constant 0 : i32
    %c0_i32_1 = arith.constant 0 : i32
    return %c0_i32, %c0_i32_0 : i32, i32
  }
  func.func @transform_8(%arg0: i32, %arg1: i32) -> (i32, i32) {
    %c0_i32 = arith.constant 0 : i32
    %c0_i32_0 = arith.constant 0 : i32
    %c0_i32_1 = arith.constant 0 : i32
    return %c0_i32, %c0_i32_0 : i32, i32
  }
  func.func @transform_9(%arg0: i32, %arg1: i32) -> (i32, i32) {
    %c0_i32 = arith.constant 0 : i32
    %c0_i32_0 = arith.constant 0 : i32
    %c0_i32_1 = arith.constant 0 : i32
    return %c0_i32, %c0_i32_0 : i32, i32
  }
  func.func @transform_10(%arg0: i32, %arg1: i32) -> (i32, i32, i32) {
    %c0_i32 = arith.constant 0 : i32
    %c0_i32_0 = arith.constant 0 : i32
    return %arg0, %arg1, %c0_i32 : i32, i32, i32
  }
}

</mosaic_0001>

<bundles_post_ra>
// kernel: tpu_custom_call.1
= control target key start
LH: loop header
LB: loop body
LE: loop exit
PB: predicated region body
PF: predicated region fallthrough
CT: control target
= control target key end

     0   :  { %s4239_s0 = inlined_call_operand.vmem [shape: f32[2,24,32], index: 0, kind: input, shape index: {}]   ;;  %s4240_s1 = inlined_call_operand.vmem [shape: f32[1,32], index: 1, kind: input, shape index: {}]   ;;  %s4241_s2 = inlined_call_operand.vmem [shape: f32[1,32], index: 2, kind: input, shape index: {}]   ;;  %s4242_s3 = inlined_call_operand.vmem [shape: f32[1,32], index: 3, kind: input, shape index: {}]   ;;  %s4243_s4 = inlined_call_operand.vmem [shape: f32[1,32], index: 4, kind: input, shape index: {}]   ;;  %s4244_s5 = inlined_call_operand.hbm [shape: bf16[32,96], index: 5, kind: input, shape index: {}]   ;;  %s4245_s6 = inlined_call_operand.hbm [shape: bf16[32,64], index: 6, kind: input, shape index: {}]   ;;  %s4246_s7 = inlined_call_operand.vmem [shape: f32[1,64], index: 7, kind: input, shape index: {}]   ;;  %s4247_s8 = inlined_call_operand.vmem [shape: bf16[64,32], index: 8, kind: input, shape index: {}]   ;;  %s4248_s9 = inlined_call_operand.vmem [shape: f32[1,32], index: 9, kind: input, shape index: {}]   ;;  %s4249_s10 = inlined_call_operand.hbm [shape: f32[2,24,32], index: 10, kind: output, shape index: {}]  }
   0x1   :  { %4264 = sst [smem:[#allocation22_spill]] %s4249_s10 }
   0x2   :  { %15 = vsyncpa [#allocation5], 0 }
   0x3   :  { %16 = vsyncpa [#allocation8], 0 }
   0x4   :  { %17 = vsyncpa [#allocation6], 0 }
   0x5   :  { %19 = vsyncpa [#allocation6 + $0x1], 0  ;;  %s3464_s13 = smov 0   ;;  %s3466_s14 = smov 0  }
   0x6   :  { %s3468_s15 = smov 0   ;;  %s3470_s16 = smov 0  }
   0x7   :  { %s3472_s17 = smov 0   ;;  %s3474_s18 = smov 0  }
   0x8   :  { %s3476_s19 = smov 0   ;;  %s3478_s20 = smov 0  }
   0x9 LB: > { %4265 = sst [smem:[#allocation13_spill]] %s3254_s13  ;;  %s2422_s21 = sadd.s32 4294967295, %s3282_s20   ;;  %s3282_s20 = sphi %s3478_s20, %s25_s20   ;;  %s3278_s19 = sphi %s3476_s19, %s4316_s19   ;;  %s3274_s18 = sphi %s3474_s18, %s4315_s18   ;;  %s3270_s17 = sphi %s3472_s17, %s4319_s17   ;;  %s3266_s16 = sphi %s3470_s16, %s4313_s16   ;;  %s3262_s15 = sphi %s3468_s15, %s4312_s15   ;;  %s3258_s14 = sphi %s3466_s14, %s4318_s14   ;;  %s3254_s13 = sphi %s3464_s13, %s4317_s13  }
   0xa   : > { %4266 = sst [smem:[#allocation14_spill]] %s3262_s15  ;;  %s2423_s22 = sadd.s32 4294967294, %s3282_s20  }
   0xb   : > { %4267 = sst [smem:[#allocation15_spill]] %s3274_s18  ;;  %s34_s23 = sadd.s32 1, %s3274_s18 }
   0xc   : > { %4268 = sst [smem:[#allocation16_spill]] %s3278_s19  ;;  %s37_s24 = sadd.s32 1, %s3278_s19 }
   0xd   : > { %4269 = sst [smem:[#allocation17_spill]] %s3282_s20  ;;  %p35_p0 = scmp.ge.s32.totalorder %s34_s23, 3 }
   0xe   : > { %s263_s25 = sadd.s32 1, %s3262_s15  ;;  %p273_p1 = scmp.ne.s32.totalorder %s3262_s15, %s3258_s14 }
   0xf   : > { %p274_p2 = scmp.eq.s32.totalorder %s2422_s21, 5  ;;  %s4321_s23 = smov (%p35_p0, %s34_s23), 0 }
  0x10   : > { %4270 = sst [smem:[#allocation18_spill]] %s4321_s23  ;;  %s4323_s24 = smov (!%p35_p0, %s37_s24), %s3278_s19 }
  0x11   : > { %s259_s26 = ssub.s32 %s3274_s18, %s4321_s23  ;;  %p3516_p3 = por %p274_p2, %p273_p1 }
  0x12   : > { %p39_p4 = scmp.ge.s32.totalorder %s4323_s24, 2  ;;  %p279_p5 = scmp.ne.s32.totalorder %s3258_s14, %s3254_s13 }
  0x13   : > { %s4271_s27 = scalar_select %p3516_p3, 1, 0 }
  0x14   : > { %p280_p6 = scmp.eq.s32.totalorder %s2423_s22, 5  ;;  %p2424_p7 = scmp.ge.s32.totalorder %s3282_s20, 1 }
  0x15   : > { %s4325_s24 = smov (%p39_p4, %s4323_s24), 0  ;;  %p287_p9 = scmp.lt.s32.totalorder %s3282_s20, 7 }
  0x16   : > { %4272 = sst [smem:[#allocation19_spill]] %s4325_s24  ;;  %p3525_p8 = por %p280_p6, %p279_p5 }
  0x17   : > { %s258_s29 = ssub.s32 %s3278_s19, %s4325_s24  ;;  %p3532_p10 = pnand %p2424_p7, %p287_p9 }
  0x18   : > { %s4273_s28 = scalar_select %p3525_p8, 1, 0 }
  0x19   : > { %s260_s30 = sor.u32 %s259_s26, %s258_s29  ;;  %p3536_p12 = scmp.eq.s32.totalorder %s2422_s21, 0 }
  0x1a   : > { %4274 = sst [smem:[#allocation20_spill]] %s4273_s28  ;;  %p261_p11 = scmp.eq.s32.totalorder %s260_s30, 0 }
  0x1b   : > { %s4275_s11 = scalar_select %p3532_p10, 1, 0 }
  0x1c   : > { %s4276_s12 = scalar_select %p3536_p12, 1, 0 }
  0x1d   : > { %p2668_p13 = pneg %p3532_p10  ;;  %s3384_s23 = smov [#allocation4]  }
  0x1e   : > { %s3543_s22 = scalar_select %p261_p11, %s3262_s15, %s263_s25  }
  0x1f   : > { %s311_s18 = sshll.u32 %s3384_s23, 4  ;;  %p3547_p0 = pnand %p3536_p12, %p2668_p13  ;;  %s312_s18 = int_to_ptr.vmem [resolvable:$true] %s311_s18 }
  0x20   : > { %4277 = sst [smem:[#allocation21_spill]] %s3543_s22  ;;  %s3024_s30 = scalar_lea.hbm %s4244_s5, 256 }
  0x21   : > { %p3025_p1 = scmp.ne.s32.totalorder %s4244_s5, %s3024_s30  ;;  %p3026_p2 = pneg %p3547_p0 }
  0x22   : > { %p3031_p6 = scmp.lt.u32.totalorder %s3024_s30, %s4244_s5 }
  0x23   : > { %p3027_p4 = pnand %p3026_p2, %p3025_p1 }
  0x25   : > { %p3028_p5 = pneg %p3027_p4 }
  0x27   : > { %p3033_p7 = pnand %p3031_p6, %p3028_p5 }
  0x29   : > { %3036 = shalt.err (!%p3033_p7)
}
  0x2a   : > { %s3037_s22 = scalar_lea.vmem %s312_s18, 256  ;;  %p3045_p8 = scmp.lt.s32.totalorder %s312_s18, %s312_s18 }
  0x2b   : > { %p3038_p9 = scmp.ne.s32.totalorder %s312_s18, %s3037_s22  ;;  %p3046_p3 = scmp.lt.s32.totalorder %s3037_s22, %s3037_s22 }
  0x2d   : > { %p3040_p11 = pnand %p3038_p9, %p3026_p2  ;;  %p3047_p12 = por %p3046_p3, %p3045_p8 }
  0x2f   : > { %p3041_p13 = pneg %p3040_p11 }
  0x31   : > { %p3048_p10 = pnand %p3047_p12, %p3041_p13 }
  0x33   : > { %3051 = shalt.err (!%p3048_p10)
}
  0x34   : > { %s3385_s19 = smov 64   ;;  %s3386_s24 = smov 4  }
  0x35   : > { %2671 = dma.hbm_to_vmem [thread:$0]  (!%p3547_p0), %s4244_s5, 256, %s312_s18, [#allocation5], %s3385_s19, %s3385_s19, %s3386_s24  }
  0x36   : > { %s3387_s30 = smov [#allocation7]   ;;  %s3052_s28 = scalar_lea.hbm %s4245_s6, 256 }
  0x37   : > { %s324_s23 = sshll.u32 %s3387_s30, 4  ;;  %p3053_p3 = scmp.ne.s32.totalorder %s4245_s6, %s3052_s28  ;;  %s325_s23 = int_to_ptr.vmem [resolvable:$true] %s324_s23 }
  0x38   : > { %p3059_p12 = scmp.lt.u32.totalorder %s3052_s28, %s4245_s6 }
  0x39   : > { %p3055_p8 = pnand %p3053_p3, %p3026_p2 }
  0x3b   : > { %p3056_p10 = pneg %p3055_p8 }
  0x3d   : > { %p3061_p1 = pnand %p3059_p12, %p3056_p10 }
  0x3f   : > { %3064 = shalt.err (!%p3061_p1)
}
  0x40   : > { %s3065_s18 = scalar_lea.vmem %s325_s23, 256  ;;  %p3073_p7 = scmp.lt.s32.totalorder %s325_s23, %s325_s23 }
  0x41   : > { %p3066_p4 = scmp.ne.s32.totalorder %s325_s23, %s3065_s18  ;;  %p3074_p9 = scmp.lt.s32.totalorder %s3065_s18, %s3065_s18 }
  0x43   : > { %p3068_p5 = pnand %p3066_p4, %p3026_p2  ;;  %p3075_p11 = por %p3074_p9, %p3073_p7 }
  0x45   : > { %p3069_p6 = pneg %p3068_p5 }
  0x47   : > { %p3076_p13 = pnand %p3075_p11, %p3069_p6 }
  0x49   : > { %3079 = shalt.err (!%p3076_p13)
}
  0x4a   : > { %2674 = dma.hbm_to_vmem [thread:$0]  (!%p3547_p0), %s4245_s6, 256, %s325_s23, [#allocation8], %s3385_s19, %s3385_s19, %s3386_s24  }
  0x4b   : > { %p4279_p3 = scmp.ne.s32.totalorder %s4275_s11, 0 }
  0x4c   : > { %p4280_p8 = scmp.ne.s32.totalorder (!%p4279_p3), %s4276_s12, 0 }
  0x4d   : > { %360 = sbr.rel (%p4279_p3) target bundleno = 2928 (0xb70), region = 60 }
  0x54   : > { %3241 = dma.done.wait (%p4280_p8), [#allocation5], 256  }
  0x55   : > { %3243 = vsyncadd (%p4280_p8), [#allocation5], 4294967040 }
  0x56   : > { %3245 = dma.done.wait (%p4280_p8), [#allocation8], 256  }
  0x57   : > { %3247 = vsyncadd (%p4280_p8), [#allocation8], 4294967040  ;;  %p405_p0 = scmp.lt.s32.totalorder %s3270_s17, 1  ;;  %p407_p2 = scmp.lt.s32.totalorder %s3266_s16, 2  ;;  %vm416_vm0 = vcmask 261120   ;;  %v2972_v7 = vld [vmem:[#allocation4] sm:$0xff]   ;;  %v546_v26 = vlaneseq }
  0x58   : > { %s402_s12 = sand.u32 1, %s3258_s14   ;;  %v3388_v8 = vmov 0.0   ;;  %vm3389_vm1 = vmmov 0   ;;  %v2973_v9 = vld [vmem:[#allocation4 + $0x8] sm:$0xff]   ;;  %v2434_v14 = vld [vmem:[%s4240_s1] ss:$0 sm:$0xff] }
  0x59   : > { %s406_s10 = scalar_select %p405_p0, %s3270_s17, 1  ;;  %2532 = vmatprep.subr.bf16.mxu0 %v3388_v8  ;;  %2536 = vmatprep.mubr.msk.bf16.mxu0 %vm3389_vm1, %v3388_v8  ;;  %v2435_v16 = vld [vmem:[%s4241_s2] ss:$0 sm:$0xff]  ;;  %v3401_v24 = vmov 1983009808   ;;  %v3646_v31 = vshrl.u32 %v546_v26, 7 }
  0x5a   : > { %s408_s20 = scalar_select %p407_p2, %s3266_s16, 2  ;;  %2533 = vmatpush3.bf16.msra.mxu0 %v2972_v7  ;;  %v544_v25 = vunpack.c.l.s4 %v3401_v24  ;;  %v3402_v28 = vmov 1934713408   ;;  %vm965_vm2 = vcmask 60416  }
  0x5b   : > { %s2656_s28 = smul.u32 3, %s406_s10  ;;  %s3619_s21 = sshll.u32 %s402_s12, 3  ;;  %2534 = vmatprep.subr.bf16.mxu0 %v3388_v8  ;;  %v608_v29 = vunpack.c.l.s4 %v3402_v28 }
  0x5c   : > { %s3390_s18 = smov 80   ;;  %s3391_s13 = smov 96   ;;  %v545_v30 = vunpack.c.0.s8 %v544_v25 }
  0x5d   : > { %s410_s11 = sadd.s32 %s2656_s28, %s408_s20  ;;  %s3392_s15 = smov 112   ;;  %v609_v34 = vunpack.c.0.s8 %v608_v29 }
  0x5e   : > { %s2432_s26 = sshll.u32 %s410_s11, 3  ;;  %2535 = vmatpush3.bf16.msra.mxu0 %v2973_v9  ;;  %s3393_s10 = smov 88   ;;  %v3649_v35 = vsub.s32 %v545_v30, %v3646_v31 }
  0x5f   : > { %s412_s29 = scalar_lea.vmem %s4239_s0, %s2432_s26  ;;  %s3394_s20 = smov 72   ;;  %v3652_v41 = vsub.s32 %v609_v34, %v3646_v31 }
  0x60   : > { %v3610_v0 = vld [vmem:[%s412_s29] sm:$0xff]  ;;  %s3395_s28 = smov 64   ;;  %s3396_s11 = smov 56  }
  0x61   : > { %v417_v1 = vsel %vm416_vm0, %v3610_v0, 0.0  ;;  %s3397_s26 = smov 48   ;;  %s3398_s19 = smov 40  }
  0x62   : > { %418 = vadd.xlane.f32.xlu0 %v417_v1  ;;  %s3399_s24 = smov 120   ;;  %s3400_s29 = smov 104  }
  0x63   : > { %s2433_s30 = sshll.u32 %s3266_s16, 3  ;;  %p2451_p10 = scmp.le.s32.totalorder %s3266_s16, 0 }
  0x64   : > { %s3667_s23 = sshra.s32 %s2433_s30, 3 }
  0x65   : > { %s2449_s25 = sshll.u32 %s3667_s23, 2 }
  0x66   : > { %s964_s22 = scalar_lea.vmem [#allocation2], %s2449_s25 }
  0xef   : > { %v419_v2 = vpop.xlane.xlu0 %418 }
  0xf0   : > { %v421_v3 = vmul.f32 0.03125, %v419_v2 }
  0xf2   : > { %v422_v4 = vsub.f32 %v3610_v0, %v421_v3 }
  0xf4   : > { %v423_v5 = vmul.f32 %v422_v4, %v422_v4 }
  0xf6   : > { %v424_v6 = vsel %vm416_vm0, %v423_v5, 0.0 }
  0xf7   : > { %425 = vadd.xlane.f32.xlu0 %v424_v6 }
 0x184   : > { %v426_v10 = vpop.xlane.xlu0 %425 }
 0x185   : > { %v427_v11 = vmul.f32 0.03125, %v426_v10 }
 0x187   : > { %v428_v12 = vadd.f32 1e-05, %v427_v11 }
 0x189   : > { %2974 = vrsqrt.f32 %v428_v12 }
 0x193   : > { %v2975_v13 = vpop.eup %2974 }
 0x194   : > { %v430_v15 = vmul.f32 %v2975_v13, %v422_v4 }
 0x196   : > { %v438_v17 = vmul.f32 %v2434_v14, %v430_v15 }
 0x198   : > { %v446_v18 = vadd.f32 %v2435_v16, %v438_v17 }
 0x19a   : > { %v447_v19 = vpack.c.bf16 %v446_v18, %v446_v18 }
 0x19c   : > { %2537 = vmatmul.mubr.msk.bf16.vlgmr.msra.gmra.mrb[0].mxu0 %vm416_vm0, %v447_v19 }
 0x26f   : > { %v3632_v20 = vpop.f32.mrb[0].mxu0 }
 0x270   : > { %523 = vrot.lane.b32.xlu0 %v3632_v20, %s3390_s18  ;;  %517 = vrot.lane.b32.xlu1 %v3632_v20, %s3391_s13  ;;  %v2538_v21 = vpop.f32.mrb[1].mxu0  ;;  %s971_s18 = scalar_lea.vmem [#allocation3], %s2449_s25  ;;  %s404_s13 = scalar_lea.vmem [#allocation9], %s3619_s21 }
 0x271   : > { %v504_v22 = vpop.f32.mrb[2].mxu0 }
 0x272   : > { %v2539_v23 = vpop.f32.mrb[3].mxu0 }
 0x274   : > { %511 = vrot.lane.b32.xlu0 %v3632_v20, %s3392_s15  ;;  %520 = vrot.lane.b32.xlu1 %v3632_v20, %s3393_s10  ;;  %s3802_s15 = smov (!%p2451_p10), 0  }
 0x278   : > { %526 = vrot.lane.b32.xlu1 %v3632_v20, %s3394_s20 }
 0x27c   : > { %529 = vrot.lane.b32.xlu1 %v3632_v20, %s3395_s28 }
 0x280   : > { %532 = vrot.lane.b32.xlu1 %v3632_v20, %s3396_s11 }
 0x284   : > { %535 = vrot.lane.b32.xlu1 %v3632_v20, %s3397_s26 }
 0x288   : > { %538 = vrot.lane.b32.xlu1 %v3632_v20, %s3398_s19 }
 0x28c   : > { %508 = vrot.lane.b32.xlu1 %v3632_v20, %s3399_s24 }
 0x290   : > { %514 = vrot.lane.b32.xlu1 %v3632_v20, %s3400_s29 }
 0x2e2   : > { %v518_v27 = vpop.permute.xlu1 %517  ;;  %v524_v32 = vpop.permute.xlu0 %523 }
 0x2e3   : > { %v573_v36 = vcombine.low %v518_v27, %v524_v32  ;;  %v574_v37 = vcombine.high %v518_v27, %v524_v32 }
 0x2e5   : > { %v581_v42 = vrot.slane %v573_v36, %v3649_v35  ;;  %v588_v43 = vrot.slane %v574_v37, %v3649_v35 }
 0x2e6   : > { %v521_v33 = vpop.permute.xlu1 %520  ;;  %v512_v25 = vpop.permute.xlu0 %511 }
 0x2ea   : > { %v527_v38 = vpop.permute.xlu1 %526 }
 0x2eb   : > { %v589_v39 = vcombine.low %v521_v33, %v527_v38  ;;  %v590_v40 = vcombine.high %v521_v33, %v527_v38  ;;  %v541_v38 = vcombine.low %v3632_v20, %v512_v25 }
 0x2ed   : > { %v597_v44 = vrot.slane %v589_v39, %v3649_v35  ;;  %v604_v45 = vrot.slane %v590_v40, %v3649_v35  ;;  %v542_v39 = vcombine.high %v3632_v20, %v512_v25 }
 0x2ee   : > { %v530_v46 = vpop.permute.xlu1 %529 }
 0x2ef   : > { %v637_v47 = vcombine.low %v581_v42, %v597_v44  ;;  %v638_v48 = vcombine.high %v581_v42, %v597_v44  ;;  %v653_v49 = vcombine.low %v588_v43, %v604_v45  ;;  %v654_v50 = vcombine.high %v588_v43, %v604_v45 }
 0x2f1   : > { %v645_v51 = vrot.slane %v637_v47, %v3652_v41  ;;  %v652_v52 = vrot.slane %v638_v48, %v3652_v41  ;;  %v661_v53 = vrot.slane %v653_v49, %v3652_v41  ;;  %v668_v54 = vrot.slane %v654_v50, %v3652_v41 }
 0x2f2   : > { %v533_v55 = vpop.permute.xlu1 %532 }
 0x2f3   : > { %v2440_v56 = vcombine.low %v645_v51, %v652_v52  ;;  %v2442_v57 = vcombine.high %v645_v51, %v652_v52  ;;  %v2444_v58 = vcombine.low %v661_v53, %v668_v54  ;;  %v2446_v59 = vcombine.high %v661_v53, %v668_v54 }
 0x2f4   : > { %v549_v52 = vrot.slane %v541_v38, %v3649_v35  ;;  %v556_v53 = vrot.slane %v542_v39, %v3649_v35 }
 0x2f5   : > { %v760_v60 = vrot.slane %v2440_v56, %v3649_v35  ;;  %v776_v61 = vrot.slane %v2442_v57, %v3649_v35  ;;  %v792_v62 = vrot.slane %v2444_v58, %v3649_v35  ;;  %v808_v63 = vrot.slane %v2446_v59, %v3649_v35 }
 0x2f6   : > { %v536_v1 = vpop.permute.xlu1 %535 }
 0x2f7   : > { %v825_v2 = vcombine.low %v760_v60, %v776_v61  ;;  %v826_v3 = vcombine.high %v760_v60, %v776_v61  ;;  %v857_v4 = vcombine.low %v792_v62, %v808_v63  ;;  %v858_v5 = vcombine.high %v792_v62, %v808_v63 }
 0x2f8   : > { %v677_v11 = vcombine.low %v530_v46, %v536_v1  ;;  %v678_v12 = vcombine.high %v530_v46, %v536_v1 }
 0x2f9   : > { %v833_v6 = vrot.slane %v825_v2, %v3652_v41  ;;  %v840_v7 = vrot.slane %v826_v3, %v3652_v41  ;;  %v865_v9 = vrot.slane %v857_v4, %v3652_v41  ;;  %v872_v10 = vrot.slane %v858_v5, %v3652_v41 }
 0x2fa   : > { %v539_v13 = vpop.permute.xlu1 %538  ;;  %v685_v27 = vrot.slane %v677_v11, %v3649_v35  ;;  %v692_v28 = vrot.slane %v678_v12, %v3649_v35 }
 0x2fb   : > { %v877_v14 = vcombine.low %v833_v6, %v865_v9  ;;  %v878_v15 = vcombine.high %v833_v6, %v865_v9  ;;  %v879_v16 = vcombine.low %v840_v7, %v872_v10  ;;  %v880_v17 = vcombine.high %v840_v7, %v872_v10 }
 0x2fc   : > { %v693_v18 = vcombine.low %v533_v55, %v539_v13  ;;  %v694_v19 = vcombine.high %v533_v55, %v539_v13 }
 0x2fd   : > { %v3674_v21 = vpack.c.bf16 %v877_v14, %v877_v14  ;;  %v3676_v22 = vpack.c.bf16 %v878_v15, %v878_v15  ;;  %v3678_v23 = vpack.c.bf16 %v879_v16, %v879_v16  ;;  %v3680_v24 = vpack.c.bf16 %v880_v17, %v880_v17 }
 0x2fe   : > { %v701_v29 = vrot.slane %v693_v18, %v3649_v35  ;;  %v708_v30 = vrot.slane %v694_v19, %v3649_v35  ;;  %v509_v32 = vpop.permute.xlu1 %508 }
 0x2ff   : > { %966 = vst.msk [vmem:[%s964_s22] sm:$0xf] %vm965_vm2, %v3674_v21  ;;  %967 = vst.msk [vmem:[%s964_s22 + $0xc] sm:$0xf] %vm965_vm2, %v3676_v22 }
 0x300   : > { %968 = vst.msk [vmem:[%s964_s22 + $0x18] sm:$0xf] %vm965_vm2, %v3678_v23  ;;  %969 = vst.msk [vmem:[%s964_s22 + $0x24] sm:$0xf] %vm965_vm2, %v3680_v24  ;;  %v709_v33 = vcombine.low %v685_v27, %v701_v29  ;;  %v710_v34 = vcombine.high %v685_v27, %v701_v29  ;;  %v725_v36 = vcombine.low %v692_v28, %v708_v30 }
 0x301   : > { %v726_v37 = vcombine.high %v692_v28, %v708_v30 }
 0x302   : > { %v717_v40 = vrot.slane %v709_v33, %v3652_v41  ;;  %v724_v42 = vrot.slane %v710_v34, %v3652_v41  ;;  %v733_v43 = vrot.slane %v725_v36, %v3652_v41  ;;  %v515_v45 = vpop.permute.xlu1 %514 }
 0x303   : > { %v740_v44 = vrot.slane %v726_v37, %v3652_v41  ;;  %v557_v46 = vcombine.low %v509_v32, %v515_v45  ;;  %v558_v47 = vcombine.high %v509_v32, %v515_v45 }
 0x304   : > { %v881_v48 = vcombine.low %v717_v40, %v724_v42  ;;  %v2447_v49 = vcombine.high %v717_v40, %v724_v42 }
 0x305   : > { %v897_v50 = vcombine.low %v733_v43, %v740_v44  ;;  %v2448_v51 = vcombine.high %v733_v43, %v740_v44  ;;  %v565_v20 = vrot.slane %v557_v46, %v3649_v35  ;;  %v572_v54 = vrot.slane %v558_v47, %v3649_v35 }
 0x306   : > { %v888_v55 = vrot.slane %v881_v48, %v3649_v35  ;;  %v896_v56 = vrot.slane %v2447_v49, %v3649_v35 }
 0x307   : > { %v904_v57 = vrot.slane %v897_v50, %v3649_v35  ;;  %v912_v58 = vrot.slane %v2448_v51, %v3649_v35  ;;  %v605_v59 = vcombine.low %v549_v52, %v565_v20  ;;  %v606_v60 = vcombine.high %v549_v52, %v565_v20 }
 0x308   : > { %v621_v61 = vcombine.low %v556_v53, %v572_v54  ;;  %v622_v62 = vcombine.high %v556_v53, %v572_v54  ;;  %v913_v63 = vcombine.low %v888_v55, %v896_v56  ;;  %v914_v1 = vcombine.high %v888_v55, %v896_v56 }
 0x309   : > { %v929_v2 = vcombine.low %v904_v57, %v912_v58  ;;  %v930_v3 = vcombine.high %v904_v57, %v912_v58  ;;  %v613_v4 = vrot.slane %v605_v59, %v3652_v41  ;;  %v620_v5 = vrot.slane %v606_v60, %v3652_v41 }
 0x30a   : > { %v629_v6 = vrot.slane %v621_v61, %v3652_v41  ;;  %v636_v7 = vrot.slane %v622_v62, %v3652_v41  ;;  %v921_v9 = vrot.slane %v913_v63, %v3652_v41  ;;  %v928_v10 = vrot.slane %v914_v1, %v3652_v41 }
 0x30b   : > { %v937_v11 = vrot.slane %v929_v2, %v3652_v41  ;;  %v944_v12 = vrot.slane %v930_v3, %v3652_v41  ;;  %v2439_v13 = vcombine.low %v613_v4, %v620_v5  ;;  %v2441_v14 = vcombine.high %v613_v4, %v620_v5 }
 0x30c   : > { %v2443_v15 = vcombine.low %v629_v6, %v636_v7  ;;  %v2445_v16 = vcombine.high %v629_v6, %v636_v7  ;;  %v3754_v20 = vmov 0.0   ;;  %v3756_v54 = vmov 0.0  }
 0x30d   : > { %v945_v17 = vcombine.low %v921_v9, %v937_v11  ;;  %v946_v18 = vcombine.high %v921_v9, %v937_v11  ;;  %v947_v19 = vcombine.low %v928_v10, %v944_v12  ;;  %v948_v25 = vcombine.high %v928_v10, %v944_v12 }
 0x30e   : > { %v753_v27 = vrot.slane %v2439_v13, %v3649_v35  ;;  %v769_v28 = vrot.slane %v2441_v14, %v3649_v35  ;;  %v785_v29 = vrot.slane %v2443_v15, %v3649_v35  ;;  %v801_v30 = vrot.slane %v2445_v16, %v3649_v35 }
 0x30f   : > { %v3722_v32 = vpack.c.bf16 %v945_v17, %v945_v17  ;;  %v3724_v33 = vpack.c.bf16 %v946_v18, %v946_v18  ;;  %v3726_v34 = vpack.c.bf16 %v947_v19, %v947_v19  ;;  %v3728_v36 = vpack.c.bf16 %v948_v25, %v948_v25 }
 0x310   : > { %v809_v37 = vcombine.low %v753_v27, %v769_v28  ;;  %v810_v38 = vcombine.high %v753_v27, %v769_v28  ;;  %v841_v39 = vcombine.low %v785_v29, %v801_v30  ;;  %v842_v40 = vcombine.high %v785_v29, %v801_v30 }
 0x311   : > { %972 = vst.msk [vmem:[%s971_s18] sm:$0xf] %vm965_vm2, %v3722_v32  ;;  %973 = vst.msk [vmem:[%s971_s18 + $0xc] sm:$0xf] %vm965_vm2, %v3724_v33  ;;  %v3758_v55 = vmov 0.0   ;;  %v3760_v56 = vmov 0.0  }
 0x312   : > { %974 = vst.msk [vmem:[%s971_s18 + $0x18] sm:$0xf] %vm965_vm2, %v3726_v34  ;;  %975 = vst.msk [vmem:[%s971_s18 + $0x24] sm:$0xf] %vm965_vm2, %v3728_v36  ;;  %v817_v42 = vrot.slane %v809_v37, %v3652_v41  ;;  %v824_v43 = vrot.slane %v810_v38, %v3652_v41  ;;  %v849_v44 = vrot.slane %v841_v39, %v3652_v41  ;;  %v3762_v57 = vmov 0.0   ;;  %2345 = sbr.rel (%p2451_p10) target bundleno = 1411 (0x583), region = 109 }
 0x313   : > { %v856_v45 = vrot.slane %v842_v40, %v3652_v41  ;;  %v3764_v58 = vmov 0.0   ;;  %v3766_v59 = vmov 0.0   ;;  %v3768_v60 = vmov 0.0  }
 0x314   : > { %v873_v46 = vcombine.low %v817_v42, %v849_v44  ;;  %v874_v47 = vcombine.high %v817_v42, %v849_v44  ;;  %v3770_v61 = vmov -inf   ;;  %v3772_v62 = vmov -inf  }
 0x315   : > { %v875_v48 = vcombine.low %v824_v43, %v856_v45  ;;  %v876_v49 = vcombine.high %v824_v43, %v856_v45  ;;  %v3774_v63 = vmov -inf   ;;  %v3776_v1 = vmov -inf  }
 0x316   : > { %v3744_v50 = vpack.c.bf16 %v873_v46, %v873_v46  ;;  %v3746_v51 = vpack.c.bf16 %v874_v47, %v874_v47  ;;  %v3778_v2 = vmov (!%p2451_p10), 0.0   ;;  %v3780_v3 = vmov (!%p2451_p10), 0.0  }
 0x317   : > { %v3748_v52 = vpack.c.bf16 %v875_v48, %v875_v48  ;;  %v3750_v53 = vpack.c.bf16 %v876_v49, %v876_v49  ;;  %v3782_v4 = vmov (!%p2451_p10), 0.0   ;;  %v3784_v5 = vmov (!%p2451_p10), 0.0  }
 0x318   : > { %v3786_v6 = vmov (!%p2451_p10), 0.0   ;;  %v3788_v7 = vmov (!%p2451_p10), 0.0   ;;  %v3790_v9 = vmov (!%p2451_p10), 0.0   ;;  %v3792_v10 = vmov (!%p2451_p10), 0.0  }
 0x319   : > { %v3794_v11 = vmov -inf   ;;  %v3796_v12 = vmov -inf   ;;  %v3798_v13 = vmov -inf   ;;  %v3800_v14 = vmov -inf  }
 0x31a LB: >> { %v3403_v15 = vmov 0.0   ;;  %s2452_s10 = sshll.u32 %s3334_s15, 3  ;;  %vm3404_vm3 = vmmov 0   ;;  %vm1009_vm4 = vcmask 64512   ;;  %vm1269_vm5 = vcmask 1043456   ;;  %s979_s15 = sadd.s32 1, %s3334_s15   ;;  %s3334_s15 = sphi %s3802_s15, %s979_s15   ;;  %v3330_v14 = vphi %v3800_v14, %v4294_v14   ;;  %v3326_v13 = vphi %v3798_v13, %v4293_v13   ;;  %v3322_v12 = vphi %v3796_v12, %v4292_v12   ;;  %v3318_v11 = vphi %v3794_v11, %v4291_v11   ;;  %v3314_v10 = vphi %v3792_v10, %v4290_v10   ;;  %v3310_v9 = vphi %v3790_v9, %v4289_v9   ;;  %v3306_v7 = vphi %v3788_v7, %v4288_v7   ;;  %v3302_v6 = vphi %v3786_v6, %v4287_v6   ;;  %v3298_v5 = vphi %v3784_v5, %v4286_v5   ;;  %v3294_v4 = vphi %v3782_v4, %v4285_v4   ;;  %v3290_v3 = vphi %v3780_v3, %v4284_v3   ;;  %v3286_v2 = vphi %v3778_v2, %v4283_v2  }
 0x31b   : >> { %2540 = vmatprep.subr.bf16.mxu0 %v3403_v15  ;;  %2546 = vmatprep.subr.bf16.mxu1 %v3403_v15  ;;  %s3850_s20 = sshra.s32 %s2452_s10, 3  ;;  %p3933_p12 = scmp.ge.s32.totalorder %s979_s15, %s3266_s16 }
 0x31c   : >> { %2542 = vmatprep.mubr.msk.bf16.mxu0 %vm3404_vm3, %v3403_v15  ;;  %2548 = vmatprep.mubr.msk.bf16.mxu1 %vm3404_vm3, %v3403_v15  ;;  %s2453_s28 = sshll.u32 %s3850_s20, 2 }
 0x31d   : >> { %s998_s11 = scalar_lea.vmem [#allocation2], %s2453_s28  ;;  %s1004_s26 = scalar_lea.vmem [#allocation3], %s2453_s28 }
 0x31e   : >> { %v999_v16 = vld [vmem:[%s998_s11] sm:$0xf]  ;;  %v1000_v17 = vld [vmem:[%s998_s11 + $0xc] sm:$0xf]  ;;  %v1001_v25 = vld [vmem:[%s998_s11 + $0x18] sm:$0xf] }
 0x31f   : >> { %v1014_v18 = vsel %vm1009_vm4, %v999_v16, 0  ;;  %v1060_v19 = vsel %vm1009_vm4, %v1000_v17, 0  ;;  %v1002_v27 = vld [vmem:[%s998_s11 + $0x24] sm:$0xf]  ;;  %v1106_v28 = vsel %vm1009_vm4, %v1001_v25, 0 }
 0x320   : >> { %2541 = vmatpush3.bf16.xpose.msra.mxu0 %v1014_v18  ;;  %2547 = vmatpush3.bf16.xpose.msra.mxu1 %v1060_v19  ;;  %v1152_v29 = vsel %vm1009_vm4, %v1002_v27, 0  ;;  %v1005_v1 = vld [vmem:[%s1004_s26] sm:$0xf]  ;;  %v1006_v17 = vld [vmem:[%s1004_s26 + $0xc] sm:$0xf] }
 0x321   : >> { %2552 = vmatprep.subr.bf16.mxu0 %v3403_v15  ;;  %2558 = vmatprep.subr.bf16.mxu1 %v3403_v15  ;;  %v1271_v16 = vsel %vm1269_vm5, %v1005_v1, 0  ;;  %v1317_v18 = vsel %vm1269_vm5, %v1006_v17, 0  ;;  %v1007_v19 = vld [vmem:[%s1004_s26 + $0x18] sm:$0xf]  ;;  %v1008_v27 = vld [vmem:[%s1004_s26 + $0x24] sm:$0xf] }
 0x322   : >> { %v1363_v25 = vsel %vm1269_vm5, %v1007_v19, 0 }
 0x327   : >> { %2543 = vmatmul.mubr.msk.bf16.vlgmr.msra.gmra.mrb[0].mxu0 %vm1009_vm4, %v3744_v50  ;;  %2549 = vmatmul.mubr.msk.bf16.vlgmr.msra.gmra.mrb[0].mxu1 %vm1009_vm4, %v3746_v51 }
 0x328   : >> { %2553 = vmatpush3.bf16.xpose.msra.mxu0 %v1106_v28  ;;  %2559 = vmatpush3.bf16.xpose.msra.mxu1 %v1152_v29  ;;  %v1409_v28 = vsel %vm1269_vm5, %v1008_v27, 0 }
 0x329   : >> { %2554 = vmatprep.mubr.msk.bf16.mxu0 %vm3404_vm3, %v3403_v15  ;;  %2560 = vmatprep.mubr.msk.bf16.mxu1 %vm3404_vm3, %v3403_v15 }
 0x32a   : >> { %2564 = vmatprep.subr.bf16.mxu0 %v3403_v15  ;;  %2570 = vmatprep.subr.bf16.mxu1 %v3403_v15 }
 0x32f   : >> { %2555 = vmatmul.mubr.msk.bf16.vlgmr.msra.gmra.mrb[4].mxu0 %vm1009_vm4, %v3748_v52  ;;  %2561 = vmatmul.mubr.msk.bf16.vlgmr.msra.gmra.mrb[4].mxu1 %vm1009_vm4, %v3750_v53 }
 0x330   : >> { %2566 = vmatprep.mubr.msk.bf16.mxu0 %vm3404_vm3, %v3403_v15  ;;  %2572 = vmatprep.mubr.msk.bf16.mxu1 %vm3404_vm3, %v3403_v15 }
 0x331   : >> { %2565 = vmatpush3.bf16.msra.mxu0 %v1271_v16  ;;  %2571 = vmatpush3.bf16.msra.mxu1 %v1317_v18 }
 0x332   : >> { %2576 = vmatprep.subr.bf16.mxu0 %v3403_v15  ;;  %2582 = vmatprep.subr.bf16.mxu1 %v3403_v15 }
 0x3fa   : >> { %v1050_v30 = vpop.f32.mrb[0].mxu0  ;;  %v1096_v37 = vpop.f32.mrb[0].mxu1 }
 0x3fb   : >> { %v1194_v38 = vmul.f32 0.35355338, %v1050_v30  ;;  %v2544_v39 = vpop.f32.mrb[1].mxu0  ;;  %v1195_v40 = vmul.f32 0.35355338, %v1096_v37  ;;  %v2550_v42 = vpop.f32.mrb[1].mxu1 }
 0x3fc   : >> { %v1053_v43 = vpop.f32.mrb[2].mxu0  ;;  %v1099_v44 = vpop.f32.mrb[2].mxu1 }
 0x3fd   : >> { %v2545_v45 = vpop.f32.mrb[3].mxu0  ;;  %v1198_v46 = vsel %vm1009_vm4, %v1194_v38, -inf  ;;  %v2551_v47 = vpop.f32.mrb[3].mxu1  ;;  %v1201_v48 = vsel %vm1009_vm4, %v1195_v40, -inf }
 0x3fe   : >> { %1199 = vmax.xlane.f32.xlu0 %v1198_v46 }
 0x402   : >> { %1202 = vmax.xlane.f32.xlu0 %v1201_v48  ;;  %v1142_v49 = vpop.f32.mrb[4].mxu0  ;;  %v1188_v20 = vpop.f32.mrb[4].mxu1 }
 0x403   : >> { %v1196_v54 = vmul.f32 0.35355338, %v1142_v49  ;;  %v2556_v55 = vpop.f32.mrb[5].mxu0  ;;  %v1197_v56 = vmul.f32 0.35355338, %v1188_v20  ;;  %v2562_v57 = vpop.f32.mrb[5].mxu1 }
 0x404   : >> { %v1145_v58 = vpop.f32.mrb[6].mxu0  ;;  %v1191_v59 = vpop.f32.mrb[6].mxu1 }
 0x405   : >> { %v2557_v60 = vpop.f32.mrb[7].mxu0  ;;  %v1204_v61 = vsel %vm1009_vm4, %v1196_v54, -inf  ;;  %v2563_v62 = vpop.f32.mrb[7].mxu1  ;;  %v1207_v63 = vsel %vm1009_vm4, %v1197_v56, -inf }
 0x406   : >> { %1205 = vmax.xlane.f32.xlu1 %v1204_v61 }
 0x40a   : >> { %1208 = vmax.xlane.f32.xlu1 %v1207_v63 }
 0x48b   : >> { %v1200_v29 = vpop.xlane.xlu0 %1199 }
 0x48c   : >> { %v3888_v30 = vmax.f32 %v3330_v14, %v1200_v29  }
 0x48e   : >> { %v1214_v37 = vsub.f32 %v3330_v14, %v3888_v30  ;;  %v1226_v39 = vsub.f32 %v1194_v38, %v3888_v30 }
 0x48f   : >> { %v1203_v42 = vpop.xlane.xlu0 %1202 }
 0x490   : >> { %v1230_v43 = vmul.f32 1.442695, %v1226_v39  ;;  %v3894_v44 = vmax.f32 %v3326_v13, %v1203_v42   ;;  %v1218_v19 = vmul.f32 1.442695, %v1214_v37 }
 0x492   : >> { %v1215_v45 = vsub.f32 %v3326_v13, %v3894_v44  ;;  %v1227_v46 = vsub.f32 %v1195_v40, %v3894_v44  ;;  %2976 = vpow2.f32 %v1230_v43 }
 0x493   : >> { %v1206_v47 = vpop.xlane.xlu1 %1205 }
 0x494   : >> { %v1232_v48 = vmul.f32 1.442695, %v1227_v46  ;;  %v3900_v49 = vmax.f32 %v3322_v12, %v1206_v47  }
 0x496   : >> { %v1216_v14 = vsub.f32 %v3322_v12, %v3900_v49  ;;  %v1228_v38 = vsub.f32 %v1196_v54, %v3900_v49  ;;  %2978 = vpow2.f32 %v1232_v48 }
 0x497   : >> { %v1209_v20 = vpop.xlane.xlu1 %1208 }
 0x498   : >> { %v1234_v55 = vmul.f32 1.442695, %v1228_v38  ;;  %v3906_v57 = vmax.f32 %v3318_v11, %v1209_v20   ;;  %v1222_v27 = vmul.f32 1.442695, %v1216_v14 }
 0x49a   : >> { %v4281_v61 = vmov %v3906_v57  ;;  %2980 = vpow2.f32 %v1234_v55 }
 0x49b   : >> { %v1217_v13 = vsub.f32 %v3318_v11, %v4281_v61  ;;  %v1229_v40 = vsub.f32 %v1197_v56, %v4281_v61 }
 0x49c   : >> { %v2977_v59 = vpop.eup %2976 }
 0x49d   : >> { %v1236_v58 = vmul.f32 1.442695, %v1229_v40  ;;  %v1242_v60 = vsel %vm1009_vm4, %v2977_v59, 0.0  ;;  %v1262_v62 = vpack.c.bf16 %v2977_v59, %v2977_v59 }
 0x49e   : >> { %1243 = vadd.xlane.f32.xlu0 %v1242_v60 }
 0x49f   : >> { %2982 = vpow2.f32 %v1236_v58  ;;  %2567 = vmatmul.mubr.msk.bf16.vlgmr.msra.gmra.mrb[8].mxu0 %vm1009_vm4, %v1262_v62 }
 0x4a0   : >> { %v2979_v12 = vpop.eup %2978  ;;  %2577 = vmatpush3.bf16.msra.mxu0 %v1363_v25  ;;  %2578 = vmatprep.mubr.msk.bf16.mxu0 %vm3404_vm3, %v3403_v15  ;;  %2984 = vpow2.f32 %v1218_v19  ;;  %v1220_v25 = vmul.f32 1.442695, %v1215_v45 }
 0x4a1   : >> { %v1245_v54 = vsel %vm1009_vm4, %v2979_v12, 0.0  ;;  %v1263_v11 = vpack.c.bf16 %v2979_v12, %v2979_v12 }
 0x4a2   : >> { %1246 = vadd.xlane.f32.xlu1 %v1245_v54  ;;  %2986 = vpow2.f32 %v1220_v25 }
 0x4a3   : >> { %2573 = vmatmul.mubr.msk.bf16.vlgmr.msra.gmra.mrb[8].mxu1 %vm1009_vm4, %v1263_v11  ;;  %2988 = vpow2.f32 %v1222_v27 }
 0x4a4   : >> { %v2981_v56 = vpop.eup %2980  ;;  %2583 = vmatpush3.bf16.msra.mxu1 %v1409_v28  ;;  %2584 = vmatprep.mubr.msk.bf16.mxu1 %vm3404_vm3, %v3403_v15  ;;  %v1224_v15 = vmul.f32 1.442695, %v1217_v13 }
 0x4a5   : >> { %v1248_v63 = vsel %vm1009_vm4, %v2981_v56, 0.0  ;;  %v1264_v1 = vpack.c.bf16 %v2981_v56, %v2981_v56 }
 0x4a6   : >> { %1249 = vadd.xlane.f32.xlu0 %v1248_v63  ;;  %2990 = vpow2.f32 %v1224_v15 }
 0x4a7   : >> { %2579 = vmatmul.mubr.msk.bf16.vlgmr.msra.gmra.mrb[12].mxu0 %vm1009_vm4, %v1264_v1 }
 0x4a9   : >> { %v2983_v16 = vpop.eup %2982 }
 0x4aa   : >> { %v1251_v17 = vsel %vm1009_vm4, %v2983_v16, 0.0  ;;  %v1265_v18 = vpack.c.bf16 %v2983_v16, %v2983_v16  ;;  %v2985_v28 = vpop.eup %2984 }
 0x4ab   : >> { %1252 = vadd.xlane.f32.xlu1 %v1251_v17  ;;  %v1238_v29 = vmul.f32 %v3314_v10, %v2985_v28  ;;  %v1258_v13 = vmul.f32 %v3298_v5, %v2985_v28 }
 0x4ac   : >> { %2585 = vmatmul.mubr.msk.bf16.vlgmr.msra.gmra.mrb[12].mxu1 %vm1009_vm4, %v1265_v18  ;;  %v2987_v39 = vpop.eup %2986 }
 0x4ad   : >> { %v1239_v46 = vmul.f32 %v3310_v9, %v2987_v39  ;;  %v2989_v47 = vpop.eup %2988  ;;  %v1259_v9 = vmul.f32 %v3294_v4, %v2987_v39 }
 0x4ae   : >> { %v1240_v37 = vmul.f32 %v3306_v7, %v2989_v47  ;;  %v1260_v63 = vmul.f32 %v3290_v3, %v2989_v47 }
 0x4b0   : >> { %v2991_v20 = vpop.eup %2990 }
 0x4b1   : >> { %v1241_v14 = vmul.f32 %v3302_v6, %v2991_v20  ;;  %v1261_v5 = vmul.f32 %v3286_v2, %v2991_v20 }
 0x52b   : >> { %v1244_v42 = vpop.xlane.xlu0 %1243 }
 0x52c   : >> { %v1254_v43 = vadd.f32 %v1244_v42, %v1238_v29  }
 0x52f   : >> { %v1247_v48 = vpop.xlane.xlu1 %1246 }
 0x530   : >> { %v1255_v38 = vadd.f32 %v1247_v48, %v1239_v46  }
 0x533   : >> { %v1250_v45 = vpop.xlane.xlu0 %1249 }
 0x534   : >> { %v1256_v40 = vadd.f32 %v1250_v45, %v1240_v37  }
 0x538   : >> { %v1253_v55 = vpop.xlane.xlu1 %1252 }
 0x539   : >> { %v1257_v57 = vadd.f32 %v1253_v55, %v1241_v14   ;;  %v4294_v14 = vmov %v3888_v30 }
 0x572   : >> { %v1307_v10 = vpop.f32.mrb[8].mxu0 }
 0x573   : >> { %v1451_v58 = vadd.f32 %v1307_v10, %v1258_v13   ;;  %v2568_v59 = vpop.f32.mrb[9].mxu0  ;;  %v4290_v10 = vmov %v1254_v43  ;;  %v4293_v13 = vmov %v3894_v44 }
 0x574   : >> { %v1310_v60 = vpop.f32.mrb[10].mxu0  ;;  %v4300_v59 = vmov (%p3933_p12), %v1255_v38 }
 0x575   : >> { %v2569_v62 = vpop.f32.mrb[11].mxu0  ;;  %v4301_v60 = vmov (%p3933_p12), %v1254_v43 }
 0x576   : >> { %v1353_v12 = vpop.f32.mrb[8].mxu1  ;;  %v4302_v62 = vmov (%p3933_p12), %v3900_v49 }
 0x577   : >> { %v1452_v56 = vadd.f32 %v1353_v12, %v1259_v9   ;;  %v2574_v54 = vpop.f32.mrb[9].mxu1  ;;  %v4289_v9 = vmov %v1255_v38  ;;  %v4292_v12 = vmov %v3900_v49 }
 0x578   : >> { %v1356_v7 = vpop.f32.mrb[10].mxu1 }
 0x579   : >> { %v2575_v11 = vpop.f32.mrb[11].mxu1  ;;  %v4285_v4 = vmov %v1452_v56  ;;  %v4288_v7 = vmov %v1256_v40  ;;  %v4297_v55 = vmov (%p3933_p12), %v1452_v56  ;;  %v4298_v56 = vmov (%p3933_p12), %v1451_v58 }
 0x57a   : >> { %v1399_v1 = vpop.f32.mrb[12].mxu0  ;;  %v4291_v11 = vmov %v4281_v61 }
 0x57b   : >> { %v1453_v16 = vadd.f32 %v1399_v1, %v1260_v63   ;;  %v2580_v6 = vpop.f32.mrb[13].mxu0  ;;  %v4303_v63 = vmov (%p3933_p12), %v3894_v44  ;;  %v4304_v1 = vmov (%p3933_p12), %v3888_v30 }
 0x57c   : >> { %v1402_v17 = vpop.f32.mrb[14].mxu0  ;;  %v4287_v6 = vmov %v1257_v57  ;;  %981 = sbr.rel (!%p3933_p12) target bundleno = 794 (0x31a), region = 115 }
 0x57d   : >> { %v2581_v18 = vpop.f32.mrb[15].mxu0  ;;  %v4284_v3 = vmov %v1453_v16  ;;  %v4296_v54 = vmov (%p3933_p12), %v1453_v16 }
 0x57f   : >> { %v1445_v19 = vpop.f32.mrb[12].mxu1 }
 0x580   : >> { %v1454_v25 = vadd.f32 %v1445_v19, %v1261_v5   ;;  %v2586_v27 = vpop.f32.mrb[13].mxu1  ;;  %v4286_v5 = vmov %v1451_v58  ;;  %v4299_v58 = vmov (%p3933_p12), %v1256_v40 }
 0x581   : >> { %v1448_v15 = vpop.f32.mrb[14].mxu1 }
 0x582   : >> { %v2587_v28 = vpop.f32.mrb[15].mxu1  ;;  %v4283_v2 = vmov %v1454_v25  ;;  %v4295_v20 = vmov (%p3933_p12), %v1454_v25 }
 0x583 PF: > { %2588 = vmatprep.subr.bf16.mxu0 %v3388_v8  ;;  %vm1460_vm6 = vcmask 64512   ;;  %2594 = vmatprep.subr.bf16.mxu1 %v3388_v8  ;;  %vm1726_vm8 = vcmask 1043456   ;;  %s3405_s24 = smov 16   ;;  %s3406_s29 = smov 8   ;;  %vm2069_vm9 = vcmask 130048   ;;  %vm2071_vm10 = vcmask 195584   ;;  %v3382_v1 = vphi %v3776_v1, %v4304_v1   ;;  %v3378_v63 = vphi %v3774_v63, %v4303_v63   ;;  %v3374_v62 = vphi %v3772_v62, %v4302_v62   ;;  %v3370_v61 = vphi %v3770_v61, %v4281_v61   ;;  %v3366_v60 = vphi %v3768_v60, %v4301_v60   ;;  %v3362_v59 = vphi %v3766_v59, %v4300_v59   ;;  %v3358_v58 = vphi %v3764_v58, %v4299_v58   ;;  %v3354_v57 = vphi %v3762_v57, %v1257_v57   ;;  %v3350_v56 = vphi %v3760_v56, %v4298_v56   ;;  %v3346_v55 = vphi %v3758_v55, %v4297_v55   ;;  %v3342_v54 = vphi %v3756_v54, %v4296_v54   ;;  %v3338_v20 = vphi %v3754_v20, %v4295_v20  }
 0x584   : > { %v1465_v2 = vsel %vm1460_vm6, %v3674_v21, 0  ;;  %v1511_v3 = vsel %vm1460_vm6, %v3676_v22, 0  ;;  %2590 = vmatprep.mubr.msk.bf16.mxu0 %vm3389_vm1, %v3388_v8  ;;  %2596 = vmatprep.mubr.msk.bf16.mxu1 %vm3389_vm1, %v3388_v8  ;;  %v1557_v4 = vsel %vm1460_vm6, %v3678_v23, 0  ;;  %v1603_v21 = vsel %vm1460_vm6, %v3680_v24, 0  ;;  %s3407_s30 = smov 24   ;;  %s2657_s23 = smul.u32 3, %s3270_s17 }
 0x585   : > { %2589 = vmatpush3.bf16.xpose.msra.mxu0 %v1465_v2  ;;  %2595 = vmatpush3.bf16.xpose.msra.mxu1 %v1511_v3  ;;  %v1458_v22 = vand.u32 127, %v546_v26  ;;  %v1728_v16 = vsel %vm1726_vm8, %v3722_v32, 0  ;;  %v1774_v6 = vsel %vm1726_vm8, %v3724_v33, 0  ;;  %vm2211_vm11 = vcmask 523264   ;;  %s2273_s10 = sshll.u32 %s404_s13, 4  ;;  %s4305_s11 = sld [smem:[#allocation22_spill]]  ;;  %s4183_s10 = int_to_ptr.vmem [resolvable:$true] %s2273_s10 }
 0x586   : > { %2600 = vmatprep.subr.bf16.mxu0 %v3388_v8  ;;  %2606 = vmatprep.subr.bf16.mxu1 %v3388_v8  ;;  %s2269_s25 = sadd.s32 %s3266_s16, %s2657_s23  ;;  %s2258_s16 = scalar_lea.sflag [#allocation6], %s402_s12 }
 0x587   : > { %vm1459_vm7 = vcmp.ge.s32.totalorder %v3646_v31, %v1458_v22  ;;  %s2486_s15 = sshll.u32 %s2269_s25, 7  ;;  %s3080_s17 = scalar_lea.vmem %s4183_s10, 128 }
 0x588   : > { %p3081_p1 = scmp.ne.s32.totalorder %s4183_s10, %s3080_s17  ;;  %p4306_p4 = scmp.ne.s32.totalorder %s4271_s27, 0 }
 0x589   : > { %s3408_s19 = smov [#allocation9]  }
 0x58a   : > { %p3082_p5 = pnand %p3081_p1, %p4306_p4 }
 0x58b   : > { %s4181_s26 = scalar_lea.hbm %s4305_s11, %s2486_s15 }
 0x58c   : > { %2591 = vmatmul.mubr.msk.bf16.vlgmr.msra.gmra.mrb[0].mxu0 %vm1460_vm6, %v3744_v50  ;;  %2597 = vmatmul.mubr.msk.bf16.vlgmr.msra.gmra.mrb[0].mxu1 %vm1460_vm6, %v3746_v51  ;;  %p3083_p6 = pneg %p3082_p5 }
 0x58d   : > { %2601 = vmatpush3.bf16.xpose.msra.mxu0 %v1557_v4  ;;  %2607 = vmatpush3.bf16.xpose.msra.mxu1 %v1603_v21 }
 0x58e   : > { %2602 = vmatprep.mubr.msk.bf16.mxu0 %vm3389_vm1, %v3388_v8  ;;  %2608 = vmatprep.mubr.msk.bf16.mxu1 %vm3389_vm1, %v3388_v8 }
 0x58f   : > { %2612 = vmatprep.subr.bf16.mxu0 %v3388_v8  ;;  %2618 = vmatprep.subr.bf16.mxu1 %v3388_v8 }
 0x594   : > { %2603 = vmatmul.mubr.msk.bf16.vlgmr.msra.gmra.mrb[4].mxu0 %vm1460_vm6, %v3748_v52  ;;  %2609 = vmatmul.mubr.msk.bf16.vlgmr.msra.gmra.mrb[4].mxu1 %vm1460_vm6, %v3750_v53 }
 0x595   : > { %2614 = vmatprep.mubr.msk.bf16.mxu0 %vm3389_vm1, %v3388_v8  ;;  %2620 = vmatprep.mubr.msk.bf16.mxu1 %vm3389_vm1, %v3388_v8 }
 0x596   : > { %2613 = vmatpush3.bf16.msra.mxu0 %v1728_v16  ;;  %2619 = vmatpush3.bf16.msra.mxu1 %v1774_v6 }
 0x597   : > { %2624 = vmatprep.subr.bf16.mxu0 %v3388_v8  ;;  %2630 = vmatprep.subr.bf16.mxu1 %v3388_v8 }
 0x65f   : > { %v1501_v23 = vpop.f32.mrb[0].mxu0  ;;  %v1547_v24 = vpop.f32.mrb[0].mxu1 }
 0x660   : > { %v1645_v50 = vmul.f32 0.35355338, %v1501_v23  ;;  %v2592_v51 = vpop.f32.mrb[1].mxu0  ;;  %v1646_v30 = vmul.f32 0.35355338, %v1547_v24  ;;  %v2598_v44 = vpop.f32.mrb[1].mxu1 }
 0x661   : > { %v1504_v52 = vpop.f32.mrb[2].mxu0  ;;  %v1550_v49 = vpop.f32.mrb[2].mxu1  ;;  %v1820_v51 = vsel %vm1726_vm8, %v3726_v34, 0 }
 0x662   : > { %v2593_v29 = vpop.f32.mrb[3].mxu0  ;;  %v2599_v53 = vpop.f32.mrb[3].mxu1  ;;  %v1651_v39 = vsel %vm1459_vm7, %v1645_v50, -inf  ;;  %v1652_v42 = vsel %vm1459_vm7, %v1646_v30, -inf  ;;  %v1866_v49 = vsel %vm1726_vm8, %v3728_v36, 0 }
 0x663   : > { %v1655_v26 = vsel %vm1460_vm6, %v1651_v39, -inf  ;;  %v1658_v43 = vsel %vm1460_vm6, %v1652_v42, -inf }
 0x664   : > { %1656 = vmax.xlane.f32.xlu0 %v1655_v26 }
 0x667   : > { %v1593_v46 = vpop.f32.mrb[4].mxu0  ;;  %v1639_v47 = vpop.f32.mrb[4].mxu1 }
 0x668   : > { %v1647_v48 = vmul.f32 0.35355338, %v1593_v46  ;;  %v2604_v38 = vpop.f32.mrb[5].mxu0  ;;  %1659 = vmax.xlane.f32.xlu0 %v1658_v43  ;;  %v1648_v37 = vmul.f32 0.35355338, %v1639_v47  ;;  %v2610_v45 = vpop.f32.mrb[5].mxu1 }
 0x669   : > { %v1596_v40 = vpop.f32.mrb[6].mxu0  ;;  %v1642_v14 = vpop.f32.mrb[6].mxu1 }
 0x66a   : > { %v2605_v13 = vpop.f32.mrb[7].mxu0  ;;  %v2611_v10 = vpop.f32.mrb[7].mxu1  ;;  %v1653_v9 = vsel %vm1459_vm7, %v1647_v48, -inf  ;;  %v1654_v12 = vsel %vm1459_vm7, %v1648_v37, -inf }
 0x66b   : > { %v1661_v7 = vsel %vm1460_vm6, %v1653_v9, -inf  ;;  %v1664_v11 = vsel %vm1460_vm6, %v1654_v12, -inf }
 0x66c   : > { %1662 = vmax.xlane.f32.xlu1 %v1661_v7 }
 0x670   : > { %1665 = vmax.xlane.f32.xlu1 %v1664_v11 }
 0x6f1   : > { %v1657_v31 = vpop.xlane.xlu0 %1656 }
 0x6f2   : > { %v1667_v17 = vmax.f32 %v3382_v1, %v1657_v31 }
 0x6f4   : > { %v1683_v18 = vsub.f32 %v1651_v39, %v1667_v17  ;;  %v1671_v26 = vsub.f32 %v3382_v1, %v1667_v17 }
 0x6f5   : > { %v1660_v5 = vpop.xlane.xlu0 %1659 }
 0x6f6   : > { %v1687_v19 = vmul.f32 1.442695, %v1683_v18  ;;  %v1668_v25 = vmax.f32 %v3378_v63, %v1660_v5  ;;  %v1675_v43 = vmul.f32 1.442695, %v1671_v26 }
 0x6f8   : > { %v1684_v27 = vsub.f32 %v1652_v42, %v1668_v25  ;;  %2998 = vpow2.f32 %v1687_v19  ;;  %v1672_v46 = vsub.f32 %v3378_v63, %v1668_v25 }
 0x6f9   : > { %v1663_v32 = vpop.xlane.xlu1 %1662 }
 0x6fa   : > { %v1689_v15 = vmul.f32 1.442695, %v1684_v27  ;;  %v1669_v28 = vmax.f32 %v3374_v62, %v1663_v32  ;;  %v1677_v47 = vmul.f32 1.442695, %v1672_v46 }
 0x6fc   : > { %v1685_v2 = vsub.f32 %v1653_v9, %v1669_v28  ;;  %3000 = vpow2.f32 %v1689_v15  ;;  %v1673_v48 = vsub.f32 %v3374_v62, %v1669_v28 }
 0x6fd   : > { %v1666_v33 = vpop.xlane.xlu1 %1665 }
 0x6fe   : > { %v1691_v3 = vmul.f32 1.442695, %v1685_v2  ;;  %v1670_v4 = vmax.f32 %v3370_v61, %v1666_v33  ;;  %v1679_v38 = vmul.f32 1.442695, %v1673_v48 }
 0x700   : > { %v1686_v21 = vsub.f32 %v1654_v12, %v1670_v4  ;;  %3002 = vpow2.f32 %v1691_v3  ;;  %v1674_v37 = vsub.f32 %v3370_v61, %v1670_v4 }
 0x702   : > { %v1693_v22 = vmul.f32 1.442695, %v1686_v21  ;;  %v2999_v23 = vpop.eup %2998  ;;  %v1681_v45 = vmul.f32 1.442695, %v1674_v37 }
 0x703   : > { %v1699_v24 = vsel %vm1460_vm6, %v2999_v23, 0.0  ;;  %v1719_v50 = vpack.c.bf16 %v2999_v23, %v2999_v23 }
 0x704   : > { %3004 = vpow2.f32 %v1693_v22  ;;  %1700 = vadd.xlane.f32.xlu0 %v1699_v24 }
 0x705   : > { %2615 = vmatmul.mubr.msk.bf16.vlgmr.msra.gmra.mrb[8].mxu0 %vm1460_vm6, %v1719_v50  ;;  %3006 = vpow2.f32 %v1675_v43 }
 0x706   : > { %v3001_v30 = vpop.eup %3000  ;;  %2625 = vmatpush3.bf16.msra.mxu0 %v1820_v51  ;;  %2626 = vmatprep.mubr.msk.bf16.mxu0 %vm3389_vm1, %v3388_v8  ;;  %3008 = vpow2.f32 %v1677_v47 }
 0x707   : > { %v1702_v44 = vsel %vm1460_vm6, %v3001_v30, 0.0  ;;  %v1720_v52 = vpack.c.bf16 %v3001_v30, %v3001_v30  ;;  %2636 = vmatprep.subr.bf16.mxu0 %v3388_v8  ;;  %3010 = vpow2.f32 %v1679_v38 }
 0x708   : > { %1703 = vadd.xlane.f32.xlu1 %v1702_v44  ;;  %3012 = vpow2.f32 %v1681_v45 }
 0x709   : > { %2621 = vmatmul.mubr.msk.bf16.vlgmr.msra.gmra.mrb[8].mxu1 %vm1460_vm6, %v1720_v52 }
 0x70a   : > { %v3003_v34 = vpop.eup %3002  ;;  %2631 = vmatpush3.bf16.msra.mxu1 %v1866_v49  ;;  %2632 = vmatprep.mubr.msk.bf16.mxu1 %vm3389_vm1, %v3388_v8 }
 0x70b   : > { %v1705_v29 = vsel %vm1460_vm6, %v3003_v34, 0.0  ;;  %v1721_v53 = vpack.c.bf16 %v3003_v34, %v3003_v34  ;;  %2644 = vmatprep.subr.bf16.mxu1 %v3388_v8 }
 0x70c   : > { %1706 = vadd.xlane.f32.xlu0 %v1705_v29 }
 0x70d   : > { %2627 = vmatmul.mubr.msk.bf16.vlgmr.msra.gmra.mrb[12].mxu0 %vm1460_vm6, %v1721_v53 }
 0x70e   : > { %v3005_v39 = vpop.eup %3004  ;;  %2640 = vmatprep.mubr.msk.bf16.mxu0 %vm3389_vm1, %v3388_v8 }
 0x70f   : > { %v1708_v36 = vsel %vm1460_vm6, %v3005_v39, 0.0  ;;  %v1722_v42 = vpack.c.bf16 %v3005_v39, %v3005_v39  ;;  %v3007_v40 = vpop.eup %3006 }
 0x710   : > { %1709 = vadd.xlane.f32.xlu1 %v1708_v36  ;;  %v1695_v13 = vmul.f32 %v3366_v60, %v3007_v40  ;;  %v3009_v10 = vpop.eup %3008  ;;  %v1715_v17 = vmul.f32 %v3350_v56, %v3007_v40 }
 0x711   : > { %2633 = vmatmul.mubr.msk.bf16.vlgmr.msra.gmra.mrb[12].mxu1 %vm1460_vm6, %v1722_v42  ;;  %v1696_v63 = vmul.f32 %v3362_v59, %v3009_v10  ;;  %v3011_v12 = vpop.eup %3010  ;;  %v1716_v15 = vmul.f32 %v3346_v55, %v3009_v10 }
 0x712   : > { %2652 = vmatprep.mubr.msk.bf16.mxu1 %vm3389_vm1, %v3388_v8  ;;  %v1697_v11 = vmul.f32 %v3358_v58, %v3011_v12  ;;  %v3013_v16 = vpop.eup %3012  ;;  %v1717_v56 = vmul.f32 %v3342_v54, %v3011_v12 }
 0x713   : > { %v1698_v31 = vmul.f32 %v3354_v57, %v3013_v16  ;;  %v1718_v44 = vmul.f32 %v3338_v20, %v3013_v16 }
 0x791   : > { %v1701_v14 = vpop.xlane.xlu0 %1700 }
 0x792   : > { %v1711_v1 = vadd.f32 %v1701_v14, %v1695_v13 }
 0x794   : > { %3014 = vrcp.f32 %v1711_v1 }
 0x795   : > { %v1704_v9 = vpop.xlane.xlu1 %1703 }
 0x796   : > { %v1712_v7 = vadd.f32 %v1704_v9, %v1696_v63 }
 0x798   : > { %3016 = vrcp.f32 %v1712_v7 }
 0x799   : > { %v1707_v62 = vpop.xlane.xlu0 %1706 }
 0x79a   : > { %v1713_v61 = vadd.f32 %v1707_v62, %v1697_v11 }
 0x79c   : > { %3018 = vrcp.f32 %v1713_v61 }
 0x79d   : > { %v1710_v6 = vpop.xlane.xlu1 %1709 }
 0x79e   : > { %v1714_v60 = vadd.f32 %v1710_v6, %v1698_v31  ;;  %v3015_v59 = vpop.eup %3014 }
 0x7a0   : > { %3020 = vrcp.f32 %v1714_v60 }
 0x7a2   : > { %v3017_v33 = vpop.eup %3016 }
 0x7a6   : > { %v3019_v24 = vpop.eup %3018 }
 0x7aa   : > { %v3021_v53 = vpop.eup %3020 }
 0x7d8   : > { %v1764_v18 = vpop.f32.mrb[8].mxu0 }
 0x7d9   : > { %v1908_v5 = vadd.f32 %v1764_v18, %v1715_v17  ;;  %v2616_v19 = vpop.f32.mrb[9].mxu0 }
 0x7da   : > { %v1767_v25 = vpop.f32.mrb[10].mxu0 }
 0x7db   : > { %v1916_v27 = vmul.f32 %v3015_v59, %v1908_v5  ;;  %v2617_v32 = vpop.f32.mrb[11].mxu0 }
 0x7dc   : > { %v1810_v58 = vpop.f32.mrb[8].mxu1 }
 0x7dd   : > { %v1909_v28 = vadd.f32 %v1810_v58, %v1716_v15  ;;  %v2622_v2 = vpop.f32.mrb[9].mxu1 }
 0x7de   : > { %v1813_v3 = vpop.f32.mrb[10].mxu1 }
 0x7df   : > { %v1917_v57 = vmul.f32 %v3017_v33, %v1909_v28  ;;  %v2623_v4 = vpop.f32.mrb[11].mxu1 }
 0x7e0   : > { %v1856_v21 = vpop.f32.mrb[12].mxu0 }
 0x7e1   : > { %v1910_v22 = vadd.f32 %v1856_v21, %v1717_v56  ;;  %v2628_v23 = vpop.f32.mrb[13].mxu0 }
 0x7e2   : > { %v1859_v50 = vpop.f32.mrb[14].mxu0  ;;  %v2992_v23 = vld [vmem:[#allocation7] sm:$0xff]  }
 0x7e3   : > { %v1918_v51 = vmul.f32 %v3019_v24, %v1910_v22  ;;  %v2629_v30 = vpop.f32.mrb[15].mxu0  ;;  %2637 = vmatpush3.bf16.msra.mxu0 %v2992_v23  ;;  %v2993_v24 = vld [vmem:[#allocation7 + $0x8] sm:$0xff]   ;;  %v2995_v50 = vld [vmem:[%s4247_s8 + $0x8] sm:$0xff]  }
 0x7e4   : > { %v1902_v55 = vpop.f32.mrb[12].mxu1  ;;  %2638 = vmatprep.subr.bf16.mxu0 %v3388_v8 }
 0x7e5   : > { %v1920_v52 = vcombine.low %v1916_v27, %v1918_v51  ;;  %v1921_v49 = vcombine.high %v1916_v27, %v1918_v51  ;;  %v1911_v34 = vadd.f32 %v1902_v55, %v1718_v44  ;;  %v2634_v29 = vpop.f32.mrb[13].mxu1 }
 0x7e6   : > { %v1905_v39 = vpop.f32.mrb[14].mxu1 }
 0x7e7   : > { %v1919_v36 = vmul.f32 %v3021_v53, %v1911_v34  ;;  %v2635_v42 = vpop.f32.mrb[15].mxu1  ;;  %v1928_v43 = vrot.slane %v1920_v52, %v3649_v35  ;;  %v1935_v46 = vrot.slane %v1921_v49, %v3649_v35  ;;  %2639 = vmatpush3.bf16.msra.mxu0 %v2993_v24  ;;  %v2473_v52 = vld [vmem:[%s4242_s3] ss:$0 sm:$0xff] }
 0x7e8   : > { %v2474_v34 = vld [vmem:[%s4243_s4] ss:$0 sm:$0xff]  ;;  %v2997_v42 = vld [vmem:[%s4247_s8 + $0x18] sm:$0xff]  }
 0x7e9   : > { %v1936_v26 = vcombine.low %v1917_v57, %v1919_v36  ;;  %v1937_v54 = vcombine.high %v1917_v57, %v1919_v36  ;;  %v2996_v36 = vld [vmem:[%s4247_s8 + $0x10] sm:$0xff]  }
 0x7eb   : > { %v1944_v47 = vrot.slane %v1936_v26, %v3649_v35  ;;  %v1951_v48 = vrot.slane %v1937_v54, %v3649_v35  ;;  %v2475_v26 = vld [vmem:[%s4246_s7] ss:$0 sm:$0xff] }
 0x7ed   : > { %v1952_v20 = vcombine.low %v1928_v43, %v1944_v47  ;;  %v1953_v38 = vcombine.high %v1928_v43, %v1944_v47  ;;  %v1968_v37 = vcombine.low %v1935_v46, %v1951_v48  ;;  %v1969_v45 = vcombine.high %v1935_v46, %v1951_v48 }
 0x7ef   : > { %v1960_v40 = vrot.slane %v1952_v20, %v3652_v41  ;;  %v1967_v14 = vrot.slane %v1953_v38, %v3652_v41  ;;  %v1976_v13 = vrot.slane %v1968_v37, %v3652_v41  ;;  %v1983_v10 = vrot.slane %v1969_v45, %v3652_v41 }
 0x7f1   : > { %v1988_v1 = vcombine.low %v1960_v40, %v1967_v14  ;;  %v2471_v9 = vcombine.high %v1960_v40, %v1967_v14  ;;  %v2004_v63 = vcombine.low %v1976_v13, %v1983_v10  ;;  %v2472_v12 = vcombine.high %v1976_v13, %v1983_v10 }
 0x7f3   : > { %v1995_v7 = vrot.slane %v1988_v1, %v3649_v35  ;;  %v2003_v62 = vrot.slane %v2471_v9, %v3649_v35  ;;  %v2011_v11 = vrot.slane %v2004_v63, %v3649_v35  ;;  %v2019_v16 = vrot.slane %v2472_v12, %v3649_v35 }
 0x7f5   : > { %v2021_v61 = vcombine.high %v1995_v7, %v2003_v62  ;;  %v2037_v6 = vcombine.high %v2011_v11, %v2019_v16  ;;  %v2020_v31 = vcombine.low %v1995_v7, %v2003_v62  ;;  %v2036_v17 = vcombine.low %v2011_v11, %v2019_v16 }
 0x7f7   : > { %v2035_v60 = vrot.slane %v2021_v61, %v3652_v41  ;;  %v2051_v18 = vrot.slane %v2037_v6, %v3652_v41  ;;  %v2028_v5 = vrot.slane %v2020_v31, %v3652_v41  ;;  %v2044_v19 = vrot.slane %v2036_v17, %v3652_v41 }
 0x7f9   : > { %v2054_v59 = vcombine.low %v2035_v60, %v2051_v18  ;;  %v2053_v25 = vcombine.high %v2028_v5, %v2044_v19  ;;  %v2055_v27 = vcombine.high %v2035_v60, %v2051_v18  ;;  %v2052_v32 = vcombine.low %v2028_v5, %v2044_v19 }
 0x7fb   : > { %2061 = vrot.lane.b32.xlu1 %v2054_v59, %s3405_s24  ;;  %2057 = vrot.lane.b32.xlu0 %v2053_v25, %s3406_s29  ;;  %s3084_s24 = sshll.u32 %s3408_s19, 4  ;;  %s3085_s24 = int_to_ptr.vmem [resolvable:$false] %s3084_s24 }
 0x7fc   : > { %s3086_s29 = scalar_lea.vmem %s3085_s24, 256  ;;  %p3087_p7 = scmp.lt.s32.totalorder %s4183_s10, %s3085_s24 }
 0x7fd   : > { %p3088_p9 = scmp.lt.s32.totalorder %s3086_s29, %s3080_s17 }
 0x7ff   : > { %2065 = vrot.lane.b32.xlu1 %v2055_v27, %s3407_s30  ;;  %p3089_p11 = por %p3088_p9, %p3087_p7 }
 0x801   : > { %p3090_p13 = pnand %p3089_p11, %p3083_p6 }
 0x86d   : > { %v2062_v35 = vpop.permute.xlu1 %2061  ;;  %v2058_v15 = vpop.permute.xlu0 %2057 }
 0x86e   : > { %v2068_v58 = vsel %vm1460_vm6, %v2052_v32, %v2058_v15 }
 0x86f   : > { %v2070_v2 = vsel %vm2069_vm9, %v2068_v58, %v2062_v35 }
 0x871   : > { %v2066_v28 = vpop.permute.xlu1 %2065 }
 0x872   : > { %v2072_v33 = vsel %vm2071_vm10, %v2070_v2, %v2066_v28 }
 0x873   : > { %v2073_v41 = vadd.f32 %v2072_v33, %v3610_v0  ;;  %v2994_v0 = vld [vmem:[%s4247_s8] sm:$0xff]  }
 0x874   : > { %2645 = vmatpush3.bf16.msra.mxu1 %v2994_v0 }
 0x875   : > { %v2074_v3 = vsel %vm416_vm0, %v2073_v41, 0.0  ;;  %2646 = vmatprep.subr.bf16.mxu1 %v3388_v8 }
 0x876   : > { %2075 = vadd.xlane.f32.xlu1 %v2074_v3 }
 0x878   : > { %2647 = vmatpush3.bf16.msra.mxu1 %v2995_v50 }
 0x879   : > { %2648 = vmatprep.subr.bf16.mxu1 %v3388_v8 }
 0x87c   : > { %2649 = vmatpush3.bf16.msra.mxu1 %v2996_v36 }
 0x87d   : > { %2650 = vmatprep.subr.bf16.mxu1 %v3388_v8  ;;  %v2479_v8 = vld [vmem:[%s4248_s9] ss:$0 sm:$0xff] }
 0x880   : > { %2651 = vmatpush3.bf16.msra.mxu1 %v2997_v42 }
 0x903   : > { %v2076_v57 = vpop.xlane.xlu1 %2075 }
 0x904   : > { %v2077_v4 = vmul.f32 0.03125, %v2076_v57 }
 0x906   : > { %v2078_v56 = vsub.f32 %v2073_v41, %v2077_v4 }
 0x908   : > { %v2079_v21 = vmul.f32 %v2078_v56, %v2078_v56 }
 0x90a   : > { %v2080_v22 = vsel %vm416_vm0, %v2079_v21, 0.0 }
 0x90b   : > { %2081 = vadd.xlane.f32.xlu0 %v2080_v22 }
 0x998   : > { %v2082_v51 = vpop.xlane.xlu0 %2081 }
 0x999   : > { %v2083_v30 = vmul.f32 0.03125, %v2082_v51 }
 0x99b   : > { %v2084_v44 = vadd.f32 1e-05, %v2083_v30 }
 0x99d   : > { %3022 = vrsqrt.f32 %v2084_v44 }
 0x9a7   : > { %v3023_v55 = vpop.eup %3022 }
 0x9a8   : > { %v2086_v49 = vmul.f32 %v3023_v55, %v2078_v56 }
 0x9aa   : > { %v2094_v29 = vmul.f32 %v2473_v52, %v2086_v49 }
 0x9ac   : > { %v2102_v53 = vadd.f32 %v2474_v34, %v2094_v29 }
 0x9ae   : > { %v2103_v39 = vpack.c.bf16 %v2102_v53, %v2102_v53 }
 0x9b0   : > { %2641 = vmatmul.mubr.msk.bf16.vlgmr.msra.gmra.mrb[16].mxu0 %vm416_vm0, %v2103_v39 }
 0xa83   : > { %v2164_v54 = vpop.f32.mrb[16].mxu0 }
 0xa84   : > { %v2165_v43 = vadd.f32 %v2475_v26, %v2164_v54  ;;  %v2642_v46 = vpop.f32.mrb[17].mxu0 }
 0xa85   : > { %v2167_v47 = vpop.f32.mrb[18].mxu0 }
 0xa86   : > { %v2170_v48 = vmax.f32 %v2165_v43, 0.0  ;;  %v2643_v20 = vpop.f32.mrb[19].mxu0 }
 0xa88   : > { %v2171_v38 = vpack.c.bf16 %v2170_v48, %v2170_v48 }
 0xa8a   : > { %2653 = vmatmul.mubr.msk.bf16.vlgmr.msra.gmra.mrb[16].mxu1 %vm2211_vm11, %v2171_v38 }
 0xb5d   : > { %v2249_v37 = vpop.f32.mrb[16].mxu1 }
 0xb5e   : > { %v2250_v45 = vadd.f32 %v2479_v8, %v2249_v37  ;;  %v2654_v40 = vpop.f32.mrb[17].mxu1 }
 0xb5f   : > { %v2252_v14 = vpop.f32.mrb[18].mxu1 }
 0xb60   : > { %v2255_v13 = vadd.f32 %v2250_v45, %v2073_v41  ;;  %v2655_v10 = vpop.f32.mrb[19].mxu1 }
 0xb62   : > { %2256 = vst.msk [vmem:[%s404_s13] sm:$0xff] %vm416_vm0, %v2255_v13 }
 0xb63   : > { %3093 = shalt.err (!%p3090_p13)
}
 0xb64   : > { %s3094_s12 = scalar_lea.hbm %s4181_s26, 128  ;;  %s3098_s30 = scalar_lea.hbm %s4305_s11, 768 }
 0xb65   : > { %p3095_p3 = scmp.ne.s32.totalorder %s4181_s26, %s3094_s12  ;;  %p3099_p2 = scmp.lt.u32.totalorder %s4181_s26, %s4305_s11 }
 0xb66   : > { %p3100_p10 = scmp.lt.u32.totalorder %s3098_s30, %s3094_s12  ;;  %p3102_p1 = scmp.lt.u32.totalorder %s3094_s12, %s4181_s26 }
 0xb67   : > { %p3096_p8 = pnand %p3095_p3, %p4306_p4 }
 0xb68   : > { %p3101_p12 = por %p3100_p10, %p3099_p2 }
 0xb69   : > { %p3097_p0 = pneg %p3096_p8 }
 0xb6a   : > { %p3103_p5 = por %p3102_p1, %p3101_p12 }
 0xb6c   : > { %p3104_p6 = pnand %p3103_p5, %p3097_p0 }
 0xb6e   : > { %3107 = shalt.err (!%p3104_p6)
}
 0xb6f   : > { %2666 = dma.vmem_to_hbm [thread:$0]  (%p4306_p4), %s4183_s10, 128, %s4181_s26, %s2258_s16  }
 0xb70 PF: > { %s4307_s22 = sld [smem:[#allocation17_spill]]  ;;  %s4308_s18 = sld [smem:[#allocation13_spill]] }
 0xb71   : > { %s4309_s15 = sld [smem:[#allocation20_spill]] }
 0xb76   : > { %p2683_p7 = scmp.ge.s32.totalorder %s4307_s22, 2  ;;  %s2285_s20 = sand.u32 1, %s4308_s18  }
 0xb77   : > { %p4310_p9 = scmp.ne.s32.totalorder %s4309_s15, 0  ;;  %s2286_s28 = scalar_lea.sflag [#allocation6], %s2285_s20 }
 0xb79   : > { %p2676_p11 = pnand %p2683_p7, %p4310_p9 }
 0xb7b   : > { %3249 = dma.done.wait (!%p2676_p11), %s2286_s28, 128  }
 0xb7c   : > { %3251 = vsyncadd (!%p2676_p11), %s2286_s28, 4294967168  ;;  %s25_s20 = sadd.s32 1, %s4307_s22   ;;  %s4311_s17 = sld [smem:[#allocation14_spill]] }
 0xb7d   : > { %p22_p13 = scmp.ge.s32.totalorder %s25_s20, 8   ;;  %s4312_s15 = sld [smem:[#allocation21_spill]] }
 0xb7e   : > { %s4313_s16 = sld [smem:[#allocation15_spill]]  ;;  %s4314_s27 = sld [smem:[#allocation16_spill]] }
 0xb7f   : > { %s4315_s18 = sld [smem:[#allocation18_spill]]  ;;  %s4316_s19 = sld [smem:[#allocation19_spill]] }
 0xb80   : > { %s4317_s13 = smov %s3258_s14  ;;  %24 = sbr.rel (!%p22_p13) target bundleno = 9 (0x9), region = 126 }
 0xb82   : > { %s4318_s14 = smov %s4311_s17 }
 0xb84   : > { %s4319_s17 = smov %s4314_s27 }
 0xb87   :  { %2291 = vsyncpa [#allocation5], 1 }
 0xb88   :  { %2293 = vsyncpa [#allocation5 + $0x1], 1 }
 0xb89   :  { %2294 = vsyncpa [#allocation8], 1 }
 0xb8a   :  { %2295 = vsyncpa [#allocation6], 1 }
 0xb8b   :  { %2297 = vsyncpa [#allocation6 + $0x1], 1 }

// kernel: tpu_custom_call.1
= control target key start
LH: loop header
LB: loop body
LE: loop exit
PB: predicated region body
PF: predicated region fallthrough
CT: control target
= control target key end

     0   :  { %s4239_s0 = inlined_call_operand.vmem [shape: f32[2,24,32], index: 0, kind: input, shape index: {}]   ;;  %s4240_s1 = inlined_call_operand.vmem [shape: f32[1,32], index: 1, kind: input, shape index: {}]   ;;  %s4241_s2 = inlined_call_operand.vmem [shape: f32[1,32], index: 2, kind: input, shape index: {}]   ;;  %s4242_s3 = inlined_call_operand.vmem [shape: f32[1,32], index: 3, kind: input, shape index: {}]   ;;  %s4243_s4 = inlined_call_operand.vmem [shape: f32[1,32], index: 4, kind: input, shape index: {}]   ;;  %s4244_s5 = inlined_call_operand.hbm [shape: bf16[32,96], index: 5, kind: input, shape index: {}]   ;;  %s4245_s6 = inlined_call_operand.hbm [shape: bf16[32,64], index: 6, kind: input, shape index: {}]   ;;  %s4246_s7 = inlined_call_operand.vmem [shape: f32[1,64], index: 7, kind: input, shape index: {}]   ;;  %s4247_s8 = inlined_call_operand.vmem [shape: bf16[64,32], index: 8, kind: input, shape index: {}]   ;;  %s4248_s9 = inlined_call_operand.vmem [shape: f32[1,32], index: 9, kind: input, shape index: {}]   ;;  %s4249_s10 = inlined_call_operand.hbm [shape: f32[2,24,32], index: 10, kind: output, shape index: {}]  }
   0x1   :  { %4264 = sst [smem:[#allocation22_spill]] %s4249_s10 }
   0x2   :  { %15 = vsyncpa [#allocation5], 0 }
   0x3   :  { %16 = vsyncpa [#allocation8], 0 }
   0x4   :  { %17 = vsyncpa [#allocation6], 0 }
   0x5   :  { %19 = vsyncpa [#allocation6 + $0x1], 0  ;;  %s3464_s13 = smov 0   ;;  %s3466_s14 = smov 0  }
   0x6   :  { %s3468_s15 = smov 0   ;;  %s3470_s16 = smov 0  }
   0x7   :  { %s3472_s17 = smov 0   ;;  %s3474_s18 = smov 0  }
   0x8   :  { %s3476_s19 = smov 0   ;;  %s3478_s20 = smov 0  }
   0x9 LB: > { %4265 = sst [smem:[#allocation13_spill]] %s3254_s13  ;;  %s2422_s21 = sadd.s32 4294967295, %s3282_s20   ;;  %s3282_s20 = sphi %s3478_s20, %s25_s20   ;;  %s3278_s19 = sphi %s3476_s19, %s4316_s19   ;;  %s3274_s18 = sphi %s3474_s18, %s4315_s18   ;;  %s3270_s17 = sphi %s3472_s17, %s4319_s17   ;;  %s3266_s16 = sphi %s3470_s16, %s4313_s16   ;;  %s3262_s15 = sphi %s3468_s15, %s4312_s15   ;;  %s3258_s14 = sphi %s3466_s14, %s4318_s14   ;;  %s3254_s13 = sphi %s3464_s13, %s4317_s13  }
   0xa   : > { %4266 = sst [smem:[#allocation14_spill]] %s3262_s15  ;;  %s2423_s22 = sadd.s32 4294967294, %s3282_s20  }
   0xb   : > { %4267 = sst [smem:[#allocation15_spill]] %s3274_s18  ;;  %s34_s23 = sadd.s32 1, %s3274_s18 }
   0xc   : > { %4268 = sst [smem:[#allocation16_spill]] %s3278_s19  ;;  %s37_s24 = sadd.s32 1, %s3278_s19 }
   0xd   : > { %4269 = sst [smem:[#allocation17_spill]] %s3282_s20  ;;  %p35_p0 = scmp.ge.s32.totalorder %s34_s23, 3 }
   0xe   : > { %s263_s25 = sadd.s32 1, %s3262_s15  ;;  %p273_p1 = scmp.ne.s32.totalorder %s3262_s15, %s3258_s14 }
   0xf   : > { %p274_p2 = scmp.eq.s32.totalorder %s2422_s21, 5  ;;  %s4321_s23 = smov (%p35_p0, %s34_s23), 0 }
  0x10   : > { %4270 = sst [smem:[#allocation18_spill]] %s4321_s23  ;;  %s4323_s24 = smov (!%p35_p0, %s37_s24), %s3278_s19 }
  0x11   : > { %s259_s26 = ssub.s32 %s3274_s18, %s4321_s23  ;;  %p3516_p3 = por %p274_p2, %p273_p1 }
  0x12   : > { %p39_p4 = scmp.ge.s32.totalorder %s4323_s24, 2  ;;  %p279_p5 = scmp.ne.s32.totalorder %s3258_s14, %s3254_s13 }
  0x13   : > { %s4271_s27 = scalar_select %p3516_p3, 1, 0 }
  0x14   : > { %p280_p6 = scmp.eq.s32.totalorder %s2423_s22, 5  ;;  %p2424_p7 = scmp.ge.s32.totalorder %s3282_s20, 1 }
  0x15   : > { %s4325_s24 = smov (%p39_p4, %s4323_s24), 0  ;;  %p287_p9 = scmp.lt.s32.totalorder %s3282_s20, 7 }
  0x16   : > { %4272 = sst [smem:[#allocation19_spill]] %s4325_s24  ;;  %p3525_p8 = por %p280_p6, %p279_p5 }
  0x17   : > { %s258_s29 = ssub.s32 %s3278_s19, %s4325_s24  ;;  %p3532_p10 = pnand %p2424_p7, %p287_p9 }
  0x18   : > { %s4273_s28 = scalar_select %p3525_p8, 1, 0 }
  0x19   : > { %s260_s30 = sor.u32 %s259_s26, %s258_s29  ;;  %p3536_p12 = scmp.eq.s32.totalorder %s2422_s21, 0 }
  0x1a   : > { %4274 = sst [smem:[#allocation20_spill]] %s4273_s28  ;;  %p261_p11 = scmp.eq.s32.totalorder %s260_s30, 0 }
  0x1b   : > { %s4275_s11 = scalar_select %p3532_p10, 1, 0 }
  0x1c   : > { %s4276_s12 = scalar_select %p3536_p12, 1, 0 }
  0x1d   : > { %p2668_p13 = pneg %p3532_p10  ;;  %s3384_s23 = smov [#allocation4]  }
  0x1e   : > { %s3543_s22 = scalar_select %p261_p11, %s3262_s15, %s263_s25  }
  0x1f   : > { %s311_s18 = sshll.u32 %s3384_s23, 4  ;;  %p3547_p0 = pnand %p3536_p12, %p2668_p13  ;;  %s312_s18 = int_to_ptr.vmem [resolvable:$true] %s311_s18 }
  0x20   : > { %4277 = sst [smem:[#allocation21_spill]] %s3543_s22  ;;  %s3024_s30 = scalar_lea.hbm %s4244_s5, 256 }
  0x21   : > { %p3025_p1 = scmp.ne.s32.totalorder %s4244_s5, %s3024_s30  ;;  %p3026_p2 = pneg %p3547_p0 }
  0x22   : > { %p3031_p6 = scmp.lt.u32.totalorder %s3024_s30, %s4244_s5 }
  0x23   : > { %p3027_p4 = pnand %p3026_p2, %p3025_p1 }
  0x25   : > { %p3028_p5 = pneg %p3027_p4 }
  0x27   : > { %p3033_p7 = pnand %p3031_p6, %p3028_p5 }
  0x29   : > { %3036 = shalt.err (!%p3033_p7)
}
  0x2a   : > { %s3037_s22 = scalar_lea.vmem %s312_s18, 256  ;;  %p3045_p8 = scmp.lt.s32.totalorder %s312_s18, %s312_s18 }
  0x2b   : > { %p3038_p9 = scmp.ne.s32.totalorder %s312_s18, %s3037_s22  ;;  %p3046_p3 = scmp.lt.s32.totalorder %s3037_s22, %s3037_s22 }
  0x2d   : > { %p3040_p11 = pnand %p3038_p9, %p3026_p2  ;;  %p3047_p12 = por %p3046_p3, %p3045_p8 }
  0x2f   : > { %p3041_p13 = pneg %p3040_p11 }
  0x31   : > { %p3048_p10 = pnand %p3047_p12, %p3041_p13 }
  0x33   : > { %3051 = shalt.err (!%p3048_p10)
}
  0x34   : > { %s3385_s19 = smov 64   ;;  %s3386_s24 = smov 4  }
  0x35   : > { %2671 = dma.hbm_to_vmem [thread:$0]  (!%p3547_p0), %s4244_s5, 256, %s312_s18, [#allocation5], %s3385_s19, %s3385_s19, %s3386_s24  }
  0x36   : > { %s3387_s30 = smov [#allocation7]   ;;  %s3052_s28 = scalar_lea.hbm %s4245_s6, 256 }
  0x37   : > { %s324_s23 = sshll.u32 %s3387_s30, 4  ;;  %p3053_p3 = scmp.ne.s32.totalorder %s4245_s6, %s3052_s28  ;;  %s325_s23 = int_to_ptr.vmem [resolvable:$true] %s324_s23 }
  0x38   : > { %p3059_p12 = scmp.lt.u32.totalorder %s3052_s28, %s4245_s6 }
  0x39   : > { %p3055_p8 = pnand %p3053_p3, %p3026_p2 }
  0x3b   : > { %p3056_p10 = pneg %p3055_p8 }
  0x3d   : > { %p3061_p1 = pnand %p3059_p12, %p3056_p10 }
  0x3f   : > { %3064 = shalt.err (!%p3061_p1)
}
  0x40   : > { %s3065_s18 = scalar_lea.vmem %s325_s23, 256  ;;  %p3073_p7 = scmp.lt.s32.totalorder %s325_s23, %s325_s23 }
  0x41   : > { %p3066_p4 = scmp.ne.s32.totalorder %s325_s23, %s3065_s18  ;;  %p3074_p9 = scmp.lt.s32.totalorder %s3065_s18, %s3065_s18 }
  0x43   : > { %p3068_p5 = pnand %p3066_p4, %p3026_p2  ;;  %p3075_p11 = por %p3074_p9, %p3073_p7 }
  0x45   : > { %p3069_p6 = pneg %p3068_p5 }
  0x47   : > { %p3076_p13 = pnand %p3075_p11, %p3069_p6 }
  0x49   : > { %3079 = shalt.err (!%p3076_p13)
}
  0x4a   : > { %2674 = dma.hbm_to_vmem [thread:$0]  (!%p3547_p0), %s4245_s6, 256, %s325_s23, [#allocation8], %s3385_s19, %s3385_s19, %s3386_s24  }
  0x4b   : > { %p4279_p3 = scmp.ne.s32.totalorder %s4275_s11, 0 }
  0x4c   : > { %p4280_p8 = scmp.ne.s32.totalorder (!%p4279_p3), %s4276_s12, 0 }
  0x4d   : > { %360 = sbr.rel (%p4279_p3) target bundleno = 2928 (0xb70), region = 60 }
  0x54   : > { %3241 = dma.done.wait (%p4280_p8), [#allocation5], 256  }
  0x55   : > { %3243 = vsyncadd (%p4280_p8), [#allocation5], 4294967040 }
  0x56   : > { %3245 = dma.done.wait (%p4280_p8), [#allocation8], 256  }
  0x57   : > { %3247 = vsyncadd (%p4280_p8), [#allocation8], 4294967040  ;;  %p405_p0 = scmp.lt.s32.totalorder %s3270_s17, 1  ;;  %p407_p2 = scmp.lt.s32.totalorder %s3266_s16, 2  ;;  %vm416_vm0 = vcmask 261120   ;;  %v2972_v7 = vld [vmem:[#allocation4] sm:$0xff]   ;;  %v546_v26 = vlaneseq }
  0x58   : > { %s402_s12 = sand.u32 1, %s3258_s14   ;;  %v3388_v8 = vmov 0.0   ;;  %vm3389_vm1 = vmmov 0   ;;  %v2973_v9 = vld [vmem:[#allocation4 + $0x8] sm:$0xff]   ;;  %v2434_v14 = vld [vmem:[%s4240_s1] ss:$0 sm:$0xff] }
  0x59   : > { %s406_s10 = scalar_select %p405_p0, %s3270_s17, 1  ;;  %2532 = vmatprep.subr.bf16.mxu0 %v3388_v8  ;;  %2536 = vmatprep.mubr.msk.bf16.mxu0 %vm3389_vm1, %v3388_v8  ;;  %v2435_v16 = vld [vmem:[%s4241_s2] ss:$0 sm:$0xff]  ;;  %v3401_v24 = vmov 1983009808   ;;  %v3646_v31 = vshrl.u32 %v546_v26, 7 }
  0x5a   : > { %s408_s20 = scalar_select %p407_p2, %s3266_s16, 2  ;;  %2533 = vmatpush3.bf16.msra.mxu0 %v2972_v7  ;;  %v544_v25 = vunpack.c.l.s4 %v3401_v24  ;;  %v3402_v28 = vmov 1934713408   ;;  %vm965_vm2 = vcmask 60416  }
  0x5b   : > { %s2656_s28 = smul.u32 3, %s406_s10  ;;  %s3619_s21 = sshll.u32 %s402_s12, 3  ;;  %2534 = vmatprep.subr.bf16.mxu0 %v3388_v8  ;;  %v608_v29 = vunpack.c.l.s4 %v3402_v28 }
  0x5c   : > { %s3390_s18 = smov 80   ;;  %s3391_s13 = smov 96   ;;  %v545_v30 = vunpack.c.0.s8 %v544_v25 }
  0x5d   : > { %s410_s11 = sadd.s32 %s2656_s28, %s408_s20  ;;  %s3392_s15 = smov 112   ;;  %v609_v34 = vunpack.c.0.s8 %v608_v29 }
  0x5e   : > { %s2432_s26 = sshll.u32 %s410_s11, 3  ;;  %2535 = vmatpush3.bf16.msra.mxu0 %v2973_v9  ;;  %s3393_s10 = smov 88   ;;  %v3649_v35 = vsub.s32 %v545_v30, %v3646_v31 }
  0x5f   : > { %s412_s29 = scalar_lea.vmem %s4239_s0, %s2432_s26  ;;  %s3394_s20 = smov 72   ;;  %v3652_v41 = vsub.s32 %v609_v34, %v3646_v31 }
  0x60   : > { %v3610_v0 = vld [vmem:[%s412_s29] sm:$0xff]  ;;  %s3395_s28 = smov 64   ;;  %s3396_s11 = smov 56  }
  0x61   : > { %v417_v1 = vsel %vm416_vm0, %v3610_v0, 0.0  ;;  %s3397_s26 = smov 48   ;;  %s3398_s19 = smov 40  }
  0x62   : > { %418 = vadd.xlane.f32.xlu0 %v417_v1  ;;  %s3399_s24 = smov 120   ;;  %s3400_s29 = smov 104  }
  0x63   : > { %s2433_s30 = sshll.u32 %s3266_s16, 3  ;;  %p2451_p10 = scmp.le.s32.totalorder %s3266_s16, 0 }
  0x64   : > { %s3667_s23 = sshra.s32 %s2433_s30, 3 }
  0x65   : > { %s2449_s25 = sshll.u32 %s3667_s23, 2 }
  0x66   : > { %s964_s22 = scalar_lea.vmem [#allocation2], %s2449_s25 }
  0xef   : > { %v419_v2 = vpop.xlane.xlu0 %418 }
  0xf0   : > { %v421_v3 = vmul.f32 0.03125, %v419_v2 }
  0xf2   : > { %v422_v4 = vsub.f32 %v3610_v0, %v421_v3 }
  0xf4   : > { %v423_v5 = vmul.f32 %v422_v4, %v422_v4 }
  0xf6   : > { %v424_v6 = vsel %vm416_vm0, %v423_v5, 0.0 }
  0xf7   : > { %425 = vadd.xlane.f32.xlu0 %v424_v6 }
 0x184   : > { %v426_v10 = vpop.xlane.xlu0 %425 }
 0x185   : > { %v427_v11 = vmul.f32 0.03125, %v426_v10 }
 0x187   : > { %v428_v12 = vadd.f32 1e-05, %v427_v11 }
 0x189   : > { %2974 = vrsqrt.f32 %v428_v12 }
 0x193   : > { %v2975_v13 = vpop.eup %2974 }
 0x194   : > { %v430_v15 = vmul.f32 %v2975_v13, %v422_v4 }
 0x196   : > { %v438_v17 = vmul.f32 %v2434_v14, %v430_v15 }
 0x198   : > { %v446_v18 = vadd.f32 %v2435_v16, %v438_v17 }
 0x19a   : > { %v447_v19 = vpack.c.bf16 %v446_v18, %v446_v18 }
 0x19c   : > { %2537 = vmatmul.mubr.msk.bf16.vlgmr.msra.gmra.mrb[0].mxu0 %vm416_vm0, %v447_v19 }
 0x26f   : > { %v3632_v20 = vpop.f32.mrb[0].mxu0 }
 0x270   : > { %523 = vrot.lane.b32.xlu0 %v3632_v20, %s3390_s18  ;;  %517 = vrot.lane.b32.xlu1 %v3632_v20, %s3391_s13  ;;  %v2538_v21 = vpop.f32.mrb[1].mxu0  ;;  %s971_s18 = scalar_lea.vmem [#allocation3], %s2449_s25  ;;  %s404_s13 = scalar_lea.vmem [#allocation9], %s3619_s21 }
 0x271   : > { %v504_v22 = vpop.f32.mrb[2].mxu0 }
 0x272   : > { %v2539_v23 = vpop.f32.mrb[3].mxu0 }
 0x274   : > { %511 = vrot.lane.b32.xlu0 %v3632_v20, %s3392_s15  ;;  %520 = vrot.lane.b32.xlu1 %v3632_v20, %s3393_s10  ;;  %s3802_s15 = smov (!%p2451_p10), 0  }
 0x278   : > { %526 = vrot.lane.b32.xlu1 %v3632_v20, %s3394_s20 }
 0x27c   : > { %529 = vrot.lane.b32.xlu1 %v3632_v20, %s3395_s28 }
 0x280   : > { %532 = vrot.lane.b32.xlu1 %v3632_v20, %s3396_s11 }
 0x284   : > { %535 = vrot.lane.b32.xlu1 %v3632_v20, %s3397_s26 }
 0x288   : > { %538 = vrot.lane.b32.xlu1 %v3632_v20, %s3398_s19 }
 0x28c   : > { %508 = vrot.lane.b32.xlu1 %v3632_v20, %s3399_s24 }
 0x290   : > { %514 = vrot.lane.b32.xlu1 %v3632_v20, %s3400_s29 }
 0x2e2   : > { %v518_v27 = vpop.permute.xlu1 %517  ;;  %v524_v32 = vpop.permute.xlu0 %523 }
 0x2e3   : > { %v573_v36 = vcombine.low %v518_v27, %v524_v32  ;;  %v574_v37 = vcombine.high %v518_v27, %v524_v32 }
 0x2e5   : > { %v581_v42 = vrot.slane %v573_v36, %v3649_v35  ;;  %v588_v43 = vrot.slane %v574_v37, %v3649_v35 }
 0x2e6   : > { %v521_v33 = vpop.permute.xlu1 %520  ;;  %v512_v25 = vpop.permute.xlu0 %511 }
 0x2ea   : > { %v527_v38 = vpop.permute.xlu1 %526 }
 0x2eb   : > { %v589_v39 = vcombine.low %v521_v33, %v527_v38  ;;  %v590_v40 = vcombine.high %v521_v33, %v527_v38  ;;  %v541_v38 = vcombine.low %v3632_v20, %v512_v25 }
 0x2ed   : > { %v597_v44 = vrot.slane %v589_v39, %v3649_v35  ;;  %v604_v45 = vrot.slane %v590_v40, %v3649_v35  ;;  %v542_v39 = vcombine.high %v3632_v20, %v512_v25 }
 0x2ee   : > { %v530_v46 = vpop.permute.xlu1 %529 }
 0x2ef   : > { %v637_v47 = vcombine.low %v581_v42, %v597_v44  ;;  %v638_v48 = vcombine.high %v581_v42, %v597_v44  ;;  %v653_v49 = vcombine.low %v588_v43, %v604_v45  ;;  %v654_v50 = vcombine.high %v588_v43, %v604_v45 }
 0x2f1   : > { %v645_v51 = vrot.slane %v637_v47, %v3652_v41  ;;  %v652_v52 = vrot.slane %v638_v48, %v3652_v41  ;;  %v661_v53 = vrot.slane %v653_v49, %v3652_v41  ;;  %v668_v54 = vrot.slane %v654_v50, %v3652_v41 }
 0x2f2   : > { %v533_v55 = vpop.permute.xlu1 %532 }
 0x2f3   : > { %v2440_v56 = vcombine.low %v645_v51, %v652_v52  ;;  %v2442_v57 = vcombine.high %v645_v51, %v652_v52  ;;  %v2444_v58 = vcombine.low %v661_v53, %v668_v54  ;;  %v2446_v59 = vcombine.high %v661_v53, %v668_v54 }
 0x2f4   : > { %v549_v52 = vrot.slane %v541_v38, %v3649_v35  ;;  %v556_v53 = vrot.slane %v542_v39, %v3649_v35 }
 0x2f5   : > { %v760_v60 = vrot.slane %v2440_v56, %v3649_v35  ;;  %v776_v61 = vrot.slane %v2442_v57, %v3649_v35  ;;  %v792_v62 = vrot.slane %v2444_v58, %v3649_v35  ;;  %v808_v63 = vrot.slane %v2446_v59, %v3649_v35 }
 0x2f6   : > { %v536_v1 = vpop.permute.xlu1 %535 }
 0x2f7   : > { %v825_v2 = vcombine.low %v760_v60, %v776_v61  ;;  %v826_v3 = vcombine.high %v760_v60, %v776_v61  ;;  %v857_v4 = vcombine.low %v792_v62, %v808_v63  ;;  %v858_v5 = vcombine.high %v792_v62, %v808_v63 }
 0x2f8   : > { %v677_v11 = vcombine.low %v530_v46, %v536_v1  ;;  %v678_v12 = vcombine.high %v530_v46, %v536_v1 }
 0x2f9   : > { %v833_v6 = vrot.slane %v825_v2, %v3652_v41  ;;  %v840_v7 = vrot.slane %v826_v3, %v3652_v41  ;;  %v865_v9 = vrot.slane %v857_v4, %v3652_v41  ;;  %v872_v10 = vrot.slane %v858_v5, %v3652_v41 }
 0x2fa   : > { %v539_v13 = vpop.permute.xlu1 %538  ;;  %v685_v27 = vrot.slane %v677_v11, %v3649_v35  ;;  %v692_v28 = vrot.slane %v678_v12, %v3649_v35 }
 0x2fb   : > { %v877_v14 = vcombine.low %v833_v6, %v865_v9  ;;  %v878_v15 = vcombine.high %v833_v6, %v865_v9  ;;  %v879_v16 = vcombine.low %v840_v7, %v872_v10  ;;  %v880_v17 = vcombine.high %v840_v7, %v872_v10 }
 0x2fc   : > { %v693_v18 = vcombine.low %v533_v55, %v539_v13  ;;  %v694_v19 = vcombine.high %v533_v55, %v539_v13 }
 0x2fd   : > { %v3674_v21 = vpack.c.bf16 %v877_v14, %v877_v14  ;;  %v3676_v22 = vpack.c.bf16 %v878_v15, %v878_v15  ;;  %v3678_v23 = vpack.c.bf16 %v879_v16, %v879_v16  ;;  %v3680_v24 = vpack.c.bf16 %v880_v17, %v880_v17 }
 0x2fe   : > { %v701_v29 = vrot.slane %v693_v18, %v3649_v35  ;;  %v708_v30 = vrot.slane %v694_v19, %v3649_v35  ;;  %v509_v32 = vpop.permute.xlu1 %508 }
 0x2ff   : > { %966 = vst.msk [vmem:[%s964_s22] sm:$0xf] %vm965_vm2, %v3674_v21  ;;  %967 = vst.msk [vmem:[%s964_s22 + $0xc] sm:$0xf] %vm965_vm2, %v3676_v22 }
 0x300   : > { %968 = vst.msk [vmem:[%s964_s22 + $0x18] sm:$0xf] %vm965_vm2, %v3678_v23  ;;  %969 = vst.msk [vmem:[%s964_s22 + $0x24] sm:$0xf] %vm965_vm2, %v3680_v24  ;;  %v709_v33 = vcombine.low %v685_v27, %v701_v29  ;;  %v710_v34 = vcombine.high %v685_v27, %v701_v29  ;;  %v725_v36 = vcombine.low %v692_v28, %v708_v30 }
 0x301   : > { %v726_v37 = vcombine.high %v692_v28, %v708_v30 }
 0x302   : > { %v717_v40 = vrot.slane %v709_v33, %v3652_v41  ;;  %v724_v42 = vrot.slane %v710_v34, %v3652_v41  ;;  %v733_v43 = vrot.slane %v725_v36, %v3652_v41  ;;  %v515_v45 = vpop.permute.xlu1 %514 }
 0x303   : > { %v740_v44 = vrot.slane %v726_v37, %v3652_v41  ;;  %v557_v46 = vcombine.low %v509_v32, %v515_v45  ;;  %v558_v47 = vcombine.high %v509_v32, %v515_v45 }
 0x304   : > { %v881_v48 = vcombine.low %v717_v40, %v724_v42  ;;  %v2447_v49 = vcombine.high %v717_v40, %v724_v42 }
 0x305   : > { %v897_v50 = vcombine.low %v733_v43, %v740_v44  ;;  %v2448_v51 = vcombine.high %v733_v43, %v740_v44  ;;  %v565_v20 = vrot.slane %v557_v46, %v3649_v35  ;;  %v572_v54 = vrot.slane %v558_v47, %v3649_v35 }
 0x306   : > { %v888_v55 = vrot.slane %v881_v48, %v3649_v35  ;;  %v896_v56 = vrot.slane %v2447_v49, %v3649_v35 }
 0x307   : > { %v904_v57 = vrot.slane %v897_v50, %v3649_v35  ;;  %v912_v58 = vrot.slane %v2448_v51, %v3649_v35  ;;  %v605_v59 = vcombine.low %v549_v52, %v565_v20  ;;  %v606_v60 = vcombine.high %v549_v52, %v565_v20 }
 0x308   : > { %v621_v61 = vcombine.low %v556_v53, %v572_v54  ;;  %v622_v62 = vcombine.high %v556_v53, %v572_v54  ;;  %v913_v63 = vcombine.low %v888_v55, %v896_v56  ;;  %v914_v1 = vcombine.high %v888_v55, %v896_v56 }
 0x309   : > { %v929_v2 = vcombine.low %v904_v57, %v912_v58  ;;  %v930_v3 = vcombine.high %v904_v57, %v912_v58  ;;  %v613_v4 = vrot.slane %v605_v59, %v3652_v41  ;;  %v620_v5 = vrot.slane %v606_v60, %v3652_v41 }
 0x30a   : > { %v629_v6 = vrot.slane %v621_v61, %v3652_v41  ;;  %v636_v7 = vrot.slane %v622_v62, %v3652_v41  ;;  %v921_v9 = vrot.slane %v913_v63, %v3652_v41  ;;  %v928_v10 = vrot.slane %v914_v1, %v3652_v41 }
 0x30b   : > { %v937_v11 = vrot.slane %v929_v2, %v3652_v41  ;;  %v944_v12 = vrot.slane %v930_v3, %v3652_v41  ;;  %v2439_v13 = vcombine.low %v613_v4, %v620_v5  ;;  %v2441_v14 = vcombine.high %v613_v4, %v620_v5 }
 0x30c   : > { %v2443_v15 = vcombine.low %v629_v6, %v636_v7  ;;  %v2445_v16 = vcombine.high %v629_v6, %v636_v7  ;;  %v3754_v20 = vmov 0.0   ;;  %v3756_v54 = vmov 0.0  }
 0x30d   : > { %v945_v17 = vcombine.low %v921_v9, %v937_v11  ;;  %v946_v18 = vcombine.high %v921_v9, %v937_v11  ;;  %v947_v19 = vcombine.low %v928_v10, %v944_v12  ;;  %v948_v25 = vcombine.high %v928_v10, %v944_v12 }
 0x30e   : > { %v753_v27 = vrot.slane %v2439_v13, %v3649_v35  ;;  %v769_v28 = vrot.slane %v2441_v14, %v3649_v35  ;;  %v785_v29 = vrot.slane %v2443_v15, %v3649_v35  ;;  %v801_v30 = vrot.slane %v2445_v16, %v3649_v35 }
 0x30f   : > { %v3722_v32 = vpack.c.bf16 %v945_v17, %v945_v17  ;;  %v3724_v33 = vpack.c.bf16 %v946_v18, %v946_v18  ;;  %v3726_v34 = vpack.c.bf16 %v947_v19, %v947_v19  ;;  %v3728_v36 = vpack.c.bf16 %v948_v25, %v948_v25 }
 0x310   : > { %v809_v37 = vcombine.low %v753_v27, %v769_v28  ;;  %v810_v38 = vcombine.high %v753_v27, %v769_v28  ;;  %v841_v39 = vcombine.low %v785_v29, %v801_v30  ;;  %v842_v40 = vcombine.high %v785_v29, %v801_v30 }
 0x311   : > { %972 = vst.msk [vmem:[%s971_s18] sm:$0xf] %vm965_vm2, %v3722_v32  ;;  %973 = vst.msk [vmem:[%s971_s18 + $0xc] sm:$0xf] %vm965_vm2, %v3724_v33  ;;  %v3758_v55 = vmov 0.0   ;;  %v3760_v56 = vmov 0.0  }
 0x312   : > { %974 = vst.msk [vmem:[%s971_s18 + $0x18] sm:$0xf] %vm965_vm2, %v3726_v34  ;;  %975 = vst.msk [vmem:[%s971_s18 + $0x24] sm:$0xf] %vm965_vm2, %v3728_v36  ;;  %v817_v42 = vrot.slane %v809_v37, %v3652_v41  ;;  %v824_v43 = vrot.slane %v810_v38, %v3652_v41  ;;  %v849_v44 = vrot.slane %v841_v39, %v3652_v41  ;;  %v3762_v57 = vmov 0.0   ;;  %2345 = sbr.rel (%p2451_p10) target bundleno = 1411 (0x583), region = 109 }
 0x313   : > { %v856_v45 = vrot.slane %v842_v40, %v3652_v41  ;;  %v3764_v58 = vmov 0.0   ;;  %v3766_v59 = vmov 0.0   ;;  %v3768_v60 = vmov 0.0  }
 0x314   : > { %v873_v46 = vcombine.low %v817_v42, %v849_v44  ;;  %v874_v47 = vcombine.high %v817_v42, %v849_v44  ;;  %v3770_v61 = vmov -inf   ;;  %v3772_v62 = vmov -inf  }
 0x315   : > { %v875_v48 = vcombine.low %v824_v43, %v856_v45  ;;  %v876_v49 = vcombine.high %v824_v43, %v856_v45  ;;  %v3774_v63 = vmov -inf   ;;  %v3776_v1 = vmov -inf  }
 0x316   : > { %v3744_v50 = vpack.c.bf16 %v873_v46, %v873_v46  ;;  %v3746_v51 = vpack.c.bf16 %v874_v47, %v874_v47  ;;  %v3778_v2 = vmov (!%p2451_p10), 0.0   ;;  %v3780_v3 = vmov (!%p2451_p10), 0.0  }
 0x317   : > { %v3748_v52 = vpack.c.bf16 %v875_v48, %v875_v48  ;;  %v3750_v53 = vpack.c.bf16 %v876_v49, %v876_v49  ;;  %v3782_v4 = vmov (!%p2451_p10), 0.0   ;;  %v3784_v5 = vmov (!%p2451_p10), 0.0  }
 0x318   : > { %v3786_v6 = vmov (!%p2451_p10), 0.0   ;;  %v3788_v7 = vmov (!%p2451_p10), 0.0   ;;  %v3790_v9 = vmov (!%p2451_p10), 0.0   ;;  %v3792_v10 = vmov (!%p2451_p10), 0.0  }
 0x319   : > { %v3794_v11 = vmov -inf   ;;  %v3796_v12 = vmov -inf   ;;  %v3798_v13 = vmov -inf   ;;  %v3800_v14 = vmov -inf  }
 0x31a LB: >> { %v3403_v15 = vmov 0.0   ;;  %s2452_s10 = sshll.u32 %s3334_s15, 3  ;;  %vm3404_vm3 = vmmov 0   ;;  %vm1009_vm4 = vcmask 64512   ;;  %vm1269_vm5 = vcmask 1043456   ;;  %s979_s15 = sadd.s32 1, %s3334_s15   ;;  %s3334_s15 = sphi %s3802_s15, %s979_s15   ;;  %v3330_v14 = vphi %v3800_v14, %v4294_v14   ;;  %v3326_v13 = vphi %v3798_v13, %v4293_v13   ;;  %v3322_v12 = vphi %v3796_v12, %v4292_v12   ;;  %v3318_v11 = vphi %v3794_v11, %v4291_v11   ;;  %v3314_v10 = vphi %v3792_v10, %v4290_v10   ;;  %v3310_v9 = vphi %v3790_v9, %v4289_v9   ;;  %v3306_v7 = vphi %v3788_v7, %v4288_v7   ;;  %v3302_v6 = vphi %v3786_v6, %v4287_v6   ;;  %v3298_v5 = vphi %v3784_v5, %v4286_v5   ;;  %v3294_v4 = vphi %v3782_v4, %v4285_v4   ;;  %v3290_v3 = vphi %v3780_v3, %v4284_v3   ;;  %v3286_v2 = vphi %v3778_v2, %v4283_v2  }
 0x31b   : >> { %2540 = vmatprep.subr.bf16.mxu0 %v3403_v15  ;;  %2546 = vmatprep.subr.bf16.mxu1 %v3403_v15  ;;  %s3850_s20 = sshra.s32 %s2452_s10, 3  ;;  %p3933_p12 = scmp.ge.s32.totalorder %s979_s15, %s3266_s16 }
 0x31c   : >> { %2542 = vmatprep.mubr.msk.bf16.mxu0 %vm3404_vm3, %v3403_v15  ;;  %2548 = vmatprep.mubr.msk.bf16.mxu1 %vm3404_vm3, %v3403_v15  ;;  %s2453_s28 = sshll.u32 %s3850_s20, 2 }
 0x31d   : >> { %s998_s11 = scalar_lea.vmem [#allocation2], %s2453_s28  ;;  %s1004_s26 = scalar_lea.vmem [#allocation3], %s2453_s28 }
 0x31e   : >> { %v999_v16 = vld [vmem:[%s998_s11] sm:$0xf]  ;;  %v1000_v17 = vld [vmem:[%s998_s11 + $0xc] sm:$0xf]  ;;  %v1001_v25 = vld [vmem:[%s998_s11 + $0x18] sm:$0xf] }
 0x31f   : >> { %v1014_v18 = vsel %vm1009_vm4, %v999_v16, 0  ;;  %v1060_v19 = vsel %vm1009_vm4, %v1000_v17, 0  ;;  %v1002_v27 = vld [vmem:[%s998_s11 + $0x24] sm:$0xf]  ;;  %v1106_v28 = vsel %vm1009_vm4, %v1001_v25, 0 }
 0x320   : >> { %2541 = vmatpush3.bf16.xpose.msra.mxu0 %v1014_v18  ;;  %2547 = vmatpush3.bf16.xpose.msra.mxu1 %v1060_v19  ;;  %v1152_v29 = vsel %vm1009_vm4, %v1002_v27, 0  ;;  %v1005_v1 = vld [vmem:[%s1004_s26] sm:$0xf]  ;;  %v1006_v17 = vld [vmem:[%s1004_s26 + $0xc] sm:$0xf] }
 0x321   : >> { %2552 = vmatprep.subr.bf16.mxu0 %v3403_v15  ;;  %2558 = vmatprep.subr.bf16.mxu1 %v3403_v15  ;;  %v1271_v16 = vsel %vm1269_vm5, %v1005_v1, 0  ;;  %v1317_v18 = vsel %vm1269_vm5, %v1006_v17, 0  ;;  %v1007_v19 = vld [vmem:[%s1004_s26 + $0x18] sm:$0xf]  ;;  %v1008_v27 = vld [vmem:[%s1004_s26 + $0x24] sm:$0xf] }
 0x322   : >> { %v1363_v25 = vsel %vm1269_vm5, %v1007_v19, 0 }
 0x327   : >> { %2543 = vmatmul.mubr.msk.bf16.vlgmr.msra.gmra.mrb[0].mxu0 %vm1009_vm4, %v3744_v50  ;;  %2549 = vmatmul.mubr.msk.bf16.vlgmr.msra.gmra.mrb[0].mxu1 %vm1009_vm4, %v3746_v51 }
 0x328   : >> { %2553 = vmatpush3.bf16.xpose.msra.mxu0 %v1106_v28  ;;  %2559 = vmatpush3.bf16.xpose.msra.mxu1 %v1152_v29  ;;  %v1409_v28 = vsel %vm1269_vm5, %v1008_v27, 0 }
 0x329   : >> { %2554 = vmatprep.mubr.msk.bf16.mxu0 %vm3404_vm3, %v3403_v15  ;;  %2560 = vmatprep.mubr.msk.bf16.mxu1 %vm3404_vm3, %v3403_v15 }
 0x32a   : >> { %2564 = vmatprep.subr.bf16.mxu0 %v3403_v15  ;;  %2570 = vmatprep.subr.bf16.mxu1 %v3403_v15 }
 0x32f   : >> { %2555 = vmatmul.mubr.msk.bf16.vlgmr.msra.gmra.mrb[4].mxu0 %vm1009_vm4, %v3748_v52  ;;  %2561 = vmatmul.mubr.msk.bf16.vlgmr.msra.gmra.mrb[4].mxu1 %vm1009_vm4, %v3750_v53 }
 0x330   : >> { %2566 = vmatprep.mubr.msk.bf16.mxu0 %vm3404_vm3, %v3403_v15  ;;  %2572 = vmatprep.mubr.msk.bf16.mxu1 %vm3404_vm3, %v3403_v15 }
 0x331   : >> { %2565 = vmatpush3.bf16.msra.mxu0 %v1271_v16  ;;  %2571 = vmatpush3.bf16.msra.mxu1 %v1317_v18 }
 0x332   : >> { %2576 = vmatprep.subr.bf16.mxu0 %v3403_v15  ;;  %2582 = vmatprep.subr.bf16.mxu1 %v3403_v15 }
 0x3fa   : >> { %v1050_v30 = vpop.f32.mrb[0].mxu0  ;;  %v1096_v37 = vpop.f32.mrb[0].mxu1 }
 0x3fb   : >> { %v1194_v38 = vmul.f32 0.35355338, %v1050_v30  ;;  %v2544_v39 = vpop.f32.mrb[1].mxu0  ;;  %v1195_v40 = vmul.f32 0.35355338, %v1096_v37  ;;  %v2550_v42 = vpop.f32.mrb[1].mxu1 }
 0x3fc   : >> { %v1053_v43 = vpop.f32.mrb[2].mxu0  ;;  %v1099_v44 = vpop.f32.mrb[2].mxu1 }
 0x3fd   : >> { %v2545_v45 = vpop.f32.mrb[3].mxu0  ;;  %v1198_v46 = vsel %vm1009_vm4, %v1194_v38, -inf  ;;  %v2551_v47 = vpop.f32.mrb[3].mxu1  ;;  %v1201_v48 = vsel %vm1009_vm4, %v1195_v40, -inf }
 0x3fe   : >> { %1199 = vmax.xlane.f32.xlu0 %v1198_v46 }
 0x402   : >> { %1202 = vmax.xlane.f32.xlu0 %v1201_v48  ;;  %v1142_v49 = vpop.f32.mrb[4].mxu0  ;;  %v1188_v20 = vpop.f32.mrb[4].mxu1 }
 0x403   : >> { %v1196_v54 = vmul.f32 0.35355338, %v1142_v49  ;;  %v2556_v55 = vpop.f32.mrb[5].mxu0  ;;  %v1197_v56 = vmul.f32 0.35355338, %v1188_v20  ;;  %v2562_v57 = vpop.f32.mrb[5].mxu1 }
 0x404   : >> { %v1145_v58 = vpop.f32.mrb[6].mxu0  ;;  %v1191_v59 = vpop.f32.mrb[6].mxu1 }
 0x405   : >> { %v2557_v60 = vpop.f32.mrb[7].mxu0  ;;  %v1204_v61 = vsel %vm1009_vm4, %v1196_v54, -inf  ;;  %v2563_v62 = vpop.f32.mrb[7].mxu1  ;;  %v1207_v63 = vsel %vm1009_vm4, %v1197_v56, -inf }
 0x406   : >> { %1205 = vmax.xlane.f32.xlu1 %v1204_v61 }
 0x40a   : >> { %1208 = vmax.xlane.f32.xlu1 %v1207_v63 }
 0x48b   : >> { %v1200_v29 = vpop.xlane.xlu0 %1199 }
 0x48c   : >> { %v3888_v30 = vmax.f32 %v3330_v14, %v1200_v29  }
 0x48e   : >> { %v1214_v37 = vsub.f32 %v3330_v14, %v3888_v30  ;;  %v1226_v39 = vsub.f32 %v1194_v38, %v3888_v30 }
 0x48f   : >> { %v1203_v42 = vpop.xlane.xlu0 %1202 }
 0x490   : >> { %v1230_v43 = vmul.f32 1.442695, %v1226_v39  ;;  %v3894_v44 = vmax.f32 %v3326_v13, %v1203_v42   ;;  %v1218_v19 = vmul.f32 1.442695, %v1214_v37 }
 0x492   : >> { %v1215_v45 = vsub.f32 %v3326_v13, %v3894_v44  ;;  %v1227_v46 = vsub.f32 %v1195_v40, %v3894_v44  ;;  %2976 = vpow2.f32 %v1230_v43 }
 0x493   : >> { %v1206_v47 = vpop.xlane.xlu1 %1205 }
 0x494   : >> { %v1232_v48 = vmul.f32 1.442695, %v1227_v46  ;;  %v3900_v49 = vmax.f32 %v3322_v12, %v1206_v47  }
 0x496   : >> { %v1216_v14 = vsub.f32 %v3322_v12, %v3900_v49  ;;  %v1228_v38 = vsub.f32 %v1196_v54, %v3900_v49  ;;  %2978 = vpow2.f32 %v1232_v48 }
 0x497   : >> { %v1209_v20 = vpop.xlane.xlu1 %1208 }
 0x498   : >> { %v1234_v55 = vmul.f32 1.442695, %v1228_v38  ;;  %v3906_v57 = vmax.f32 %v3318_v11, %v1209_v20   ;;  %v1222_v27 = vmul.f32 1.442695, %v1216_v14 }
 0x49a   : >> { %v4281_v61 = vmov %v3906_v57  ;;  %2980 = vpow2.f32 %v1234_v55 }
 0x49b   : >> { %v1217_v13 = vsub.f32 %v3318_v11, %v4281_v61  ;;  %v1229_v40 = vsub.f32 %v1197_v56, %v4281_v61 }
 0x49c   : >> { %v2977_v59 = vpop.eup %2976 }
 0x49d   : >> { %v1236_v58 = vmul.f32 1.442695, %v1229_v40  ;;  %v1242_v60 = vsel %vm1009_vm4, %v2977_v59, 0.0  ;;  %v1262_v62 = vpack.c.bf16 %v2977_v59, %v2977_v59 }
 0x49e   : >> { %1243 = vadd.xlane.f32.xlu0 %v1242_v60 }
 0x49f   : >> { %2982 = vpow2.f32 %v1236_v58  ;;  %2567 = vmatmul.mubr.msk.bf16.vlgmr.msra.gmra.mrb[8].mxu0 %vm1009_vm4, %v1262_v62 }
 0x4a0   : >> { %v2979_v12 = vpop.eup %2978  ;;  %2577 = vmatpush3.bf16.msra.mxu0 %v1363_v25  ;;  %2578 = vmatprep.mubr.msk.bf16.mxu0 %vm3404_vm3, %v3403_v15  ;;  %2984 = vpow2.f32 %v1218_v19  ;;  %v1220_v25 = vmul.f32 1.442695, %v1215_v45 }
 0x4a1   : >> { %v1245_v54 = vsel %vm1009_vm4, %v2979_v12, 0.0  ;;  %v1263_v11 = vpack.c.bf16 %v2979_v12, %v2979_v12 }
 0x4a2   : >> { %1246 = vadd.xlane.f32.xlu1 %v1245_v54  ;;  %2986 = vpow2.f32 %v1220_v25 }
 0x4a3   : >> { %2573 = vmatmul.mubr.msk.bf16.vlgmr.msra.gmra.mrb[8].mxu1 %vm1009_vm4, %v1263_v11  ;;  %2988 = vpow2.f32 %v1222_v27 }
 0x4a4   : >> { %v2981_v56 = vpop.eup %2980  ;;  %2583 = vmatpush3.bf16.msra.mxu1 %v1409_v28  ;;  %2584 = vmatprep.mubr.msk.bf16.mxu1 %vm3404_vm3, %v3403_v15  ;;  %v1224_v15 = vmul.f32 1.442695, %v1217_v13 }
 0x4a5   : >> { %v1248_v63 = vsel %vm1009_vm4, %v2981_v56, 0.0  ;;  %v1264_v1 = vpack.c.bf16 %v2981_v56, %v2981_v56 }
 0x4a6   : >> { %1249 = vadd.xlane.f32.xlu0 %v1248_v63  ;;  %2990 = vpow2.f32 %v1224_v15 }
 0x4a7   : >> { %2579 = vmatmul.mubr.msk.bf16.vlgmr.msra.gmra.mrb[12].mxu0 %vm1009_vm4, %v1264_v1 }
 0x4a9   : >> { %v2983_v16 = vpop.eup %2982 }
 0x4aa   : >> { %v1251_v17 = vsel %vm1009_vm4, %v2983_v16, 0.0  ;;  %v1265_v18 = vpack.c.bf16 %v2983_v16, %v2983_v16  ;;  %v2985_v28 = vpop.eup %2984 }
 0x4ab   : >> { %1252 = vadd.xlane.f32.xlu1 %v1251_v17  ;;  %v1238_v29 = vmul.f32 %v3314_v10, %v2985_v28  ;;  %v1258_v13 = vmul.f32 %v3298_v5, %v2985_v28 }
 0x4ac   : >> { %2585 = vmatmul.mubr.msk.bf16.vlgmr.msra.gmra.mrb[12].mxu1 %vm1009_vm4, %v1265_v18  ;;  %v2987_v39 = vpop.eup %2986 }
 0x4ad   : >> { %v1239_v46 = vmul.f32 %v3310_v9, %v2987_v39  ;;  %v2989_v47 = vpop.eup %2988  ;;  %v1259_v9 = vmul.f32 %v3294_v4, %v2987_v39 }
 0x4ae   : >> { %v1240_v37 = vmul.f32 %v3306_v7, %v2989_v47  ;;  %v1260_v63 = vmul.f32 %v3290_v3, %v2989_v47 }
 0x4b0   : >> { %v2991_v20 = vpop.eup %2990 }
 0x4b1   : >> { %v1241_v14 = vmul.f32 %v3302_v6, %v2991_v20  ;;  %v1261_v5 = vmul.f32 %v3286_v2, %v2991_v20 }
 0x52b   : >> { %v1244_v42 = vpop.xlane.xlu0 %1243 }
 0x52c   : >> { %v1254_v43 = vadd.f32 %v1244_v42, %v1238_v29  }
 0x52f   : >> { %v1247_v48 = vpop.xlane.xlu1 %1246 }
 0x530   : >> { %v1255_v38 = vadd.f32 %v1247_v48, %v1239_v46  }
 0x533   : >> { %v1250_v45 = vpop.xlane.xlu0 %1249 }
 0x534   : >> { %v1256_v40 = vadd.f32 %v1250_v45, %v1240_v37  }
 0x538   : >> { %v1253_v55 = vpop.xlane.xlu1 %1252 }
 0x539   : >> { %v1257_v57 = vadd.f32 %v1253_v55, %v1241_v14   ;;  %v4294_v14 = vmov %v3888_v30 }
 0x572   : >> { %v1307_v10 = vpop.f32.mrb[8].mxu0 }
 0x573   : >> { %v1451_v58 = vadd.f32 %v1307_v10, %v1258_v13   ;;  %v2568_v59 = vpop.f32.mrb[9].mxu0  ;;  %v4290_v10 = vmov %v1254_v43  ;;  %v4293_v13 = vmov %v3894_v44 }
 0x574   : >> { %v1310_v60 = vpop.f32.mrb[10].mxu0  ;;  %v4300_v59 = vmov (%p3933_p12), %v1255_v38 }
 0x575   : >> { %v2569_v62 = vpop.f32.mrb[11].mxu0  ;;  %v4301_v60 = vmov (%p3933_p12), %v1254_v43 }
 0x576   : >> { %v1353_v12 = vpop.f32.mrb[8].mxu1  ;;  %v4302_v62 = vmov (%p3933_p12), %v3900_v49 }
 0x577   : >> { %v1452_v56 = vadd.f32 %v1353_v12, %v1259_v9   ;;  %v2574_v54 = vpop.f32.mrb[9].mxu1  ;;  %v4289_v9 = vmov %v1255_v38  ;;  %v4292_v12 = vmov %v3900_v49 }
 0x578   : >> { %v1356_v7 = vpop.f32.mrb[10].mxu1 }
 0x579   : >> { %v2575_v11 = vpop.f32.mrb[11].mxu1  ;;  %v4285_v4 = vmov %v1452_v56  ;;  %v4288_v7 = vmov %v1256_v40  ;;  %v4297_v55 = vmov (%p3933_p12), %v1452_v56  ;;  %v4298_v56 = vmov (%p3933_p12), %v1451_v58 }
 0x57a   : >> { %v1399_v1 = vpop.f32.mrb[12].mxu0  ;;  %v4291_v11 = vmov %v4281_v61 }
 0x57b   : >> { %v1453_v16 = vadd.f32 %v1399_v1, %v1260_v63   ;;  %v2580_v6 = vpop.f32.mrb[13].mxu0  ;;  %v4303_v63 = vmov (%p3933_p12), %v3894_v44  ;;  %v4304_v1 = vmov (%p3933_p12), %v3888_v30 }
 0x57c   : >> { %v1402_v17 = vpop.f32.mrb[14].mxu0  ;;  %v4287_v6 = vmov %v1257_v57  ;;  %981 = sbr.rel (!%p3933_p12) target bundleno = 794 (0x31a), region = 115 }
 0x57d   : >> { %v2581_v18 = vpop.f32.mrb[15].mxu0  ;;  %v4284_v3 = vmov %v1453_v16  ;;  %v4296_v54 = vmov (%p3933_p12), %v1453_v16 }
 0x57f   : >> { %v1445_v19 = vpop.f32.mrb[12].mxu1 }
 0x580   : >> { %v1454_v25 = vadd.f32 %v1445_v19, %v1261_v5   ;;  %v2586_v27 = vpop.f32.mrb[13].mxu1  ;;  %v4286_v5 = vmov %v1451_v58  ;;  %v4299_v58 = vmov (%p3933_p12), %v1256_v40 }
 0x581   : >> { %v1448_v15 = vpop.f32.mrb[14].mxu1 }
 0x582   : >> { %v2587_v28 = vpop.f32.mrb[15].mxu1  ;;  %v4283_v2 = vmov %v1454_v25  ;;  %v4295_v20 = vmov (%p3933_p12), %v1454_v25 }
 0x583 PF: > { %2588 = vmatprep.subr.bf16.mxu0 %v3388_v8  ;;  %vm1460_vm6 = vcmask 64512   ;;  %2594 = vmatprep.subr.bf16.mxu1 %v3388_v8  ;;  %vm1726_vm8 = vcmask 1043456   ;;  %s3405_s24 = smov 16   ;;  %s3406_s29 = smov 8   ;;  %vm2069_vm9 = vcmask 130048   ;;  %vm2071_vm10 = vcmask 195584   ;;  %v3382_v1 = vphi %v3776_v1, %v4304_v1   ;;  %v3378_v63 = vphi %v3774_v63, %v4303_v63   ;;  %v3374_v62 = vphi %v3772_v62, %v4302_v62   ;;  %v3370_v61 = vphi %v3770_v61, %v4281_v61   ;;  %v3366_v60 = vphi %v3768_v60, %v4301_v60   ;;  %v3362_v59 = vphi %v3766_v59, %v4300_v59   ;;  %v3358_v58 = vphi %v3764_v58, %v4299_v58   ;;  %v3354_v57 = vphi %v3762_v57, %v1257_v57   ;;  %v3350_v56 = vphi %v3760_v56, %v4298_v56   ;;  %v3346_v55 = vphi %v3758_v55, %v4297_v55   ;;  %v3342_v54 = vphi %v3756_v54, %v4296_v54   ;;  %v3338_v20 = vphi %v3754_v20, %v4295_v20  }
 0x584   : > { %v1465_v2 = vsel %vm1460_vm6, %v3674_v21, 0  ;;  %v1511_v3 = vsel %vm1460_vm6, %v3676_v22, 0  ;;  %2590 = vmatprep.mubr.msk.bf16.mxu0 %vm3389_vm1, %v3388_v8  ;;  %2596 = vmatprep.mubr.msk.bf16.mxu1 %vm3389_vm1, %v3388_v8  ;;  %v1557_v4 = vsel %vm1460_vm6, %v3678_v23, 0  ;;  %v1603_v21 = vsel %vm1460_vm6, %v3680_v24, 0  ;;  %s3407_s30 = smov 24   ;;  %s2657_s23 = smul.u32 3, %s3270_s17 }
 0x585   : > { %2589 = vmatpush3.bf16.xpose.msra.mxu0 %v1465_v2  ;;  %2595 = vmatpush3.bf16.xpose.msra.mxu1 %v1511_v3  ;;  %v1458_v22 = vand.u32 127, %v546_v26  ;;  %v1728_v16 = vsel %vm1726_vm8, %v3722_v32, 0  ;;  %v1774_v6 = vsel %vm1726_vm8, %v3724_v33, 0  ;;  %vm2211_vm11 = vcmask 523264   ;;  %s2273_s10 = sshll.u32 %s404_s13, 4  ;;  %s4305_s11 = sld [smem:[#allocation22_spill]]  ;;  %s4183_s10 = int_to_ptr.vmem [resolvable:$true] %s2273_s10 }
 0x586   : > { %2600 = vmatprep.subr.bf16.mxu0 %v3388_v8  ;;  %2606 = vmatprep.subr.bf16.mxu1 %v3388_v8  ;;  %s2269_s25 = sadd.s32 %s3266_s16, %s2657_s23  ;;  %s2258_s16 = scalar_lea.sflag [#allocation6], %s402_s12 }
 0x587   : > { %vm1459_vm7 = vcmp.ge.s32.totalorder %v3646_v31, %v1458_v22  ;;  %s2486_s15 = sshll.u32 %s2269_s25, 7  ;;  %s3080_s17 = scalar_lea.vmem %s4183_s10, 128 }
 0x588   : > { %p3081_p1 = scmp.ne.s32.totalorder %s4183_s10, %s3080_s17  ;;  %p4306_p4 = scmp.ne.s32.totalorder %s4271_s27, 0 }
 0x589   : > { %s3408_s19 = smov [#allocation9]  }
 0x58a   : > { %p3082_p5 = pnand %p3081_p1, %p4306_p4 }
 0x58b   : > { %s4181_s26 = scalar_lea.hbm %s4305_s11, %s2486_s15 }
 0x58c   : > { %2591 = vmatmul.mubr.msk.bf16.vlgmr.msra.gmra.mrb[0].mxu0 %vm1460_vm6, %v3744_v50  ;;  %2597 = vmatmul.mubr.msk.bf16.vlgmr.msra.gmra.mrb[0].mxu1 %vm1460_vm6, %v3746_v51  ;;  %p3083_p6 = pneg %p3082_p5 }
 0x58d   : > { %2601 = vmatpush3.bf16.xpose.msra.mxu0 %v1557_v4  ;;  %2607 = vmatpush3.bf16.xpose.msra.mxu1 %v1603_v21 }
 0x58e   : > { %2602 = vmatprep.mubr.msk.bf16.mxu0 %vm3389_vm1, %v3388_v8  ;;  %2608 = vmatprep.mubr.msk.bf16.mxu1 %vm3389_vm1, %v3388_v8 }
 0x58f   : > { %2612 = vmatprep.subr.bf16.mxu0 %v3388_v8  ;;  %2618 = vmatprep.subr.bf16.mxu1 %v3388_v8 }
 0x594   : > { %2603 = vmatmul.mubr.msk.bf16.vlgmr.msra.gmra.mrb[4].mxu0 %vm1460_vm6, %v3748_v52  ;;  %2609 = vmatmul.mubr.msk.bf16.vlgmr.msra.gmra.mrb[4].mxu1 %vm1460_vm6, %v3750_v53 }
 0x595   : > { %2614 = vmatprep.mubr.msk.bf16.mxu0 %vm3389_vm1, %v3388_v8  ;;  %2620 = vmatprep.mubr.msk.bf16.mxu1 %vm3389_vm1, %v3388_v8 }
 0x596   : > { %2613 = vmatpush3.bf16.msra.mxu0 %v1728_v16  ;;  %2619 = vmatpush3.bf16.msra.mxu1 %v1774_v6 }
 0x597   : > { %2624 = vmatprep.subr.bf16.mxu0 %v3388_v8  ;;  %2630 = vmatprep.subr.bf16.mxu1 %v3388_v8 }
 0x65f   : > { %v1501_v23 = vpop.f32.mrb[0].mxu0  ;;  %v1547_v24 = vpop.f32.mrb[0].mxu1 }
 0x660   : > { %v1645_v50 = vmul.f32 0.35355338, %v1501_v23  ;;  %v2592_v51 = vpop.f32.mrb[1].mxu0  ;;  %v1646_v30 = vmul.f32 0.35355338, %v1547_v24  ;;  %v2598_v44 = vpop.f32.mrb[1].mxu1 }
 0x661   : > { %v1504_v52 = vpop.f32.mrb[2].mxu0  ;;  %v1550_v49 = vpop.f32.mrb[2].mxu1  ;;  %v1820_v51 = vsel %vm1726_vm8, %v3726_v34, 0 }
 0x662   : > { %v2593_v29 = vpop.f32.mrb[3].mxu0  ;;  %v2599_v53 = vpop.f32.mrb[3].mxu1  ;;  %v1651_v39 = vsel %vm1459_vm7, %v1645_v50, -inf  ;;  %v1652_v42 = vsel %vm1459_vm7, %v1646_v30, -inf  ;;  %v1866_v49 = vsel %vm1726_vm8, %v3728_v36, 0 }
 0x663   : > { %v1655_v26 = vsel %vm1460_vm6, %v1651_v39, -inf  ;;  %v1658_v43 = vsel %vm1460_vm6, %v1652_v42, -inf }
 0x664   : > { %1656 = vmax.xlane.f32.xlu0 %v1655_v26 }
 0x667   : > { %v1593_v46 = vpop.f32.mrb[4].mxu0  ;;  %v1639_v47 = vpop.f32.mrb[4].mxu1 }
 0x668   : > { %v1647_v48 = vmul.f32 0.35355338, %v1593_v46  ;;  %v2604_v38 = vpop.f32.mrb[5].mxu0  ;;  %1659 = vmax.xlane.f32.xlu0 %v1658_v43  ;;  %v1648_v37 = vmul.f32 0.35355338, %v1639_v47  ;;  %v2610_v45 = vpop.f32.mrb[5].mxu1 }
 0x669   : > { %v1596_v40 = vpop.f32.mrb[6].mxu0  ;;  %v1642_v14 = vpop.f32.mrb[6].mxu1 }
 0x66a   : > { %v2605_v13 = vpop.f32.mrb[7].mxu0  ;;  %v2611_v10 = vpop.f32.mrb[7].mxu1  ;;  %v1653_v9 = vsel %vm1459_vm7, %v1647_v48, -inf  ;;  %v1654_v12 = vsel %vm1459_vm7, %v1648_v37, -inf }
 0x66b   : > { %v1661_v7 = vsel %vm1460_vm6, %v1653_v9, -inf  ;;  %v1664_v11 = vsel %vm1460_vm6, %v1654_v12, -inf }
 0x66c   : > { %1662 = vmax.xlane.f32.xlu1 %v1661_v7 }
 0x670   : > { %1665 = vmax.xlane.f32.xlu1 %v1664_v11 }
 0x6f1   : > { %v1657_v31 = vpop.xlane.xlu0 %1656 }
 0x6f2   : > { %v1667_v17 = vmax.f32 %v3382_v1, %v1657_v31 }
 0x6f4   : > { %v1683_v18 = vsub.f32 %v1651_v39, %v1667_v17  ;;  %v1671_v26 = vsub.f32 %v3382_v1, %v1667_v17 }
 0x6f5   : > { %v1660_v5 = vpop.xlane.xlu0 %1659 }
 0x6f6   : > { %v1687_v19 = vmul.f32 1.442695, %v1683_v18  ;;  %v1668_v25 = vmax.f32 %v3378_v63, %v1660_v5  ;;  %v1675_v43 = vmul.f32 1.442695, %v1671_v26 }
 0x6f8   : > { %v1684_v27 = vsub.f32 %v1652_v42, %v1668_v25  ;;  %2998 = vpow2.f32 %v1687_v19  ;;  %v1672_v46 = vsub.f32 %v3378_v63, %v1668_v25 }
 0x6f9   : > { %v1663_v32 = vpop.xlane.xlu1 %1662 }
 0x6fa   : > { %v1689_v15 = vmul.f32 1.442695, %v1684_v27  ;;  %v1669_v28 = vmax.f32 %v3374_v62, %v1663_v32  ;;  %v1677_v47 = vmul.f32 1.442695, %v1672_v46 }
 0x6fc   : > { %v1685_v2 = vsub.f32 %v1653_v9, %v1669_v28  ;;  %3000 = vpow2.f32 %v1689_v15  ;;  %v1673_v48 = vsub.f32 %v3374_v62, %v1669_v28 }
 0x6fd   : > { %v1666_v33 = vpop.xlane.xlu1 %1665 }
 0x6fe   : > { %v1691_v3 = vmul.f32 1.442695, %v1685_v2  ;;  %v1670_v4 = vmax.f32 %v3370_v61, %v1666_v33  ;;  %v1679_v38 = vmul.f32 1.442695, %v1673_v48 }
 0x700   : > { %v1686_v21 = vsub.f32 %v1654_v12, %v1670_v4  ;;  %3002 = vpow2.f32 %v1691_v3  ;;  %v1674_v37 = vsub.f32 %v3370_v61, %v1670_v4 }
 0x702   : > { %v1693_v22 = vmul.f32 1.442695, %v1686_v21  ;;  %v2999_v23 = vpop.eup %2998  ;;  %v1681_v45 = vmul.f32 1.442695, %v1674_v37 }
 0x703   : > { %v1699_v24 = vsel %vm1460_vm6, %v2999_v23, 0.0  ;;  %v1719_v50 = vpack.c.bf16 %v2999_v23, %v2999_v23 }
 0x704   : > { %3004 = vpow2.f32 %v1693_v22  ;;  %1700 = vadd.xlane.f32.xlu0 %v1699_v24 }
 0x705   : > { %2615 = vmatmul.mubr.msk.bf16.vlgmr.msra.gmra.mrb[8].mxu0 %vm1460_vm6, %v1719_v50  ;;  %3006 = vpow2.f32 %v1675_v43 }
 0x706   : > { %v3001_v30 = vpop.eup %3000  ;;  %2625 = vmatpush3.bf16.msra.mxu0 %v1820_v51  ;;  %2626 = vmatprep.mubr.msk.bf16.mxu0 %vm3389_vm1, %v3388_v8  ;;  %3008 = vpow2.f32 %v1677_v47 }
 0x707   : > { %v1702_v44 = vsel %vm1460_vm6, %v3001_v30, 0.0  ;;  %v1720_v52 = vpack.c.bf16 %v3001_v30, %v3001_v30  ;;  %2636 = vmatprep.subr.bf16.mxu0 %v3388_v8  ;;  %3010 = vpow2.f32 %v1679_v38 }
 0x708   : > { %1703 = vadd.xlane.f32.xlu1 %v1702_v44  ;;  %3012 = vpow2.f32 %v1681_v45 }
 0x709   : > { %2621 = vmatmul.mubr.msk.bf16.vlgmr.msra.gmra.mrb[8].mxu1 %vm1460_vm6, %v1720_v52 }
 0x70a   : > { %v3003_v34 = vpop.eup %3002  ;;  %2631 = vmatpush3.bf16.msra.mxu1 %v1866_v49  ;;  %2632 = vmatprep.mubr.msk.bf16.mxu1 %vm3389_vm1, %v3388_v8 }
 0x70b   : > { %v1705_v29 = vsel %vm1460_vm6, %v3003_v34, 0.0  ;;  %v1721_v53 = vpack.c.bf16 %v3003_v34, %v3003_v34  ;;  %2644 = vmatprep.subr.bf16.mxu1 %v3388_v8 }
 0x70c   : > { %1706 = vadd.xlane.f32.xlu0 %v1705_v29 }
 0x70d   : > { %2627 = vmatmul.mubr.msk.bf16.vlgmr.msra.gmra.mrb[12].mxu0 %vm1460_vm6, %v1721_v53 }
 0x70e   : > { %v3005_v39 = vpop.eup %3004  ;;  %2640 = vmatprep.mubr.msk.bf16.mxu0 %vm3389_vm1, %v3388_v8 }
 0x70f   : > { %v1708_v36 = vsel %vm1460_vm6, %v3005_v39, 0.0  ;;  %v1722_v42 = vpack.c.bf16 %v3005_v39, %v3005_v39  ;;  %v3007_v40 = vpop.eup %3006 }
 0x710   : > { %1709 = vadd.xlane.f32.xlu1 %v1708_v36  ;;  %v1695_v13 = vmul.f32 %v3366_v60, %v3007_v40  ;;  %v3009_v10 = vpop.eup %3008  ;;  %v1715_v17 = vmul.f32 %v3350_v56, %v3007_v40 }
 0x711   : > { %2633 = vmatmul.mubr.msk.bf16.vlgmr.msra.gmra.mrb[12].mxu1 %vm1460_vm6, %v1722_v42  ;;  %v1696_v63 = vmul.f32 %v3362_v59, %v3009_v10  ;;  %v3011_v12 = vpop.eup %3010  ;;  %v1716_v15 = vmul.f32 %v3346_v55, %v3009_v10 }
 0x712   : > { %2652 = vmatprep.mubr.msk.bf16.mxu1 %vm3389_vm1, %v3388_v8  ;;  %v1697_v11 = vmul.f32 %v3358_v58, %v3011_v12  ;;  %v3013_v16 = vpop.eup %3012  ;;  %v1717_v56 = vmul.f32 %v3342_v54, %v3011_v12 }
 0x713   : > { %v1698_v31 = vmul.f32 %v3354_v57, %v3013_v16  ;;  %v1718_v44 = vmul.f32 %v3338_v20, %v3013_v16 }
 0x791   : > { %v1701_v14 = vpop.xlane.xlu0 %1700 }
 0x792   : > { %v1711_v1 = vadd.f32 %v1701_v14, %v1695_v13 }
 0x794   : > { %3014 = vrcp.f32 %v1711_v1 }
 0x795   : > { %v1704_v9 = vpop.xlane.xlu1 %1703 }
 0x796   : > { %v1712_v7 = vadd.f32 %v1704_v9, %v1696_v63 }
 0x798   : > { %3016 = vrcp.f32 %v1712_v7 }
 0x799   : > { %v1707_v62 = vpop.xlane.xlu0 %1706 }
 0x79a   : > { %v1713_v61 = vadd.f32 %v1707_v62, %v1697_v11 }
 0x79c   : > { %3018 = vrcp.f32 %v1713_v61 }
 0x79d   : > { %v1710_v6 = vpop.xlane.xlu1 %1709 }
 0x79e   : > { %v1714_v60 = vadd.f32 %v1710_v6, %v1698_v31  ;;  %v3015_v59 = vpop.eup %3014 }
 0x7a0   : > { %3020 = vrcp.f32 %v1714_v60 }
 0x7a2   : > { %v3017_v33 = vpop.eup %3016 }
 0x7a6   : > { %v3019_v24 = vpop.eup %3018 }
 0x7aa   : > { %v3021_v53 = vpop.eup %3020 }
 0x7d8   : > { %v1764_v18 = vpop.f32.mrb[8].mxu0 }
 0x7d9   : > { %v1908_v5 = vadd.f32 %v1764_v18, %v1715_v17  ;;  %v2616_v19 = vpop.f32.mrb[9].mxu0 }
 0x7da   : > { %v1767_v25 = vpop.f32.mrb[10].mxu0 }
 0x7db   : > { %v1916_v27 = vmul.f32 %v3015_v59, %v1908_v5  ;;  %v2617_v32 = vpop.f32.mrb[11].mxu0 }
 0x7dc   : > { %v1810_v58 = vpop.f32.mrb[8].mxu1 }
 0x7dd   : > { %v1909_v28 = vadd.f32 %v1810_v58, %v1716_v15  ;;  %v2622_v2 = vpop.f32.mrb[9].mxu1 }
 0x7de   : > { %v1813_v3 = vpop.f32.mrb[10].mxu1 }
 0x7df   : > { %v1917_v57 = vmul.f32 %v3017_v33, %v1909_v28  ;;  %v2623_v4 = vpop.f32.mrb[11].mxu1 }
 0x7e0   : > { %v1856_v21 = vpop.f32.mrb[12].mxu0 }
 0x7e1   : > { %v1910_v22 = vadd.f32 %v1856_v21, %v1717_v56  ;;  %v2628_v23 = vpop.f32.mrb[13].mxu0 }
 0x7e2   : > { %v1859_v50 = vpop.f32.mrb[14].mxu0  ;;  %v2992_v23 = vld [vmem:[#allocation7] sm:$0xff]  }
 0x7e3   : > { %v1918_v51 = vmul.f32 %v3019_v24, %v1910_v22  ;;  %v2629_v30 = vpop.f32.mrb[15].mxu0  ;;  %2637 = vmatpush3.bf16.msra.mxu0 %v2992_v23  ;;  %v2993_v24 = vld [vmem:[#allocation7 + $0x8] sm:$0xff]   ;;  %v2995_v50 = vld [vmem:[%s4247_s8 + $0x8] sm:$0xff]  }
 0x7e4   : > { %v1902_v55 = vpop.f32.mrb[12].mxu1  ;;  %2638 = vmatprep.subr.bf16.mxu0 %v3388_v8 }
 0x7e5   : > { %v1920_v52 = vcombine.low %v1916_v27, %v1918_v51  ;;  %v1921_v49 = vcombine.high %v1916_v27, %v1918_v51  ;;  %v1911_v34 = vadd.f32 %v1902_v55, %v1718_v44  ;;  %v2634_v29 = vpop.f32.mrb[13].mxu1 }
 0x7e6   : > { %v1905_v39 = vpop.f32.mrb[14].mxu1 }
 0x7e7   : > { %v1919_v36 = vmul.f32 %v3021_v53, %v1911_v34  ;;  %v2635_v42 = vpop.f32.mrb[15].mxu1  ;;  %v1928_v43 = vrot.slane %v1920_v52, %v3649_v35  ;;  %v1935_v46 = vrot.slane %v1921_v49, %v3649_v35  ;;  %2639 = vmatpush3.bf16.msra.mxu0 %v2993_v24  ;;  %v2473_v52 = vld [vmem:[%s4242_s3] ss:$0 sm:$0xff] }
 0x7e8   : > { %v2474_v34 = vld [vmem:[%s4243_s4] ss:$0 sm:$0xff]  ;;  %v2997_v42 = vld [vmem:[%s4247_s8 + $0x18] sm:$0xff]  }
 0x7e9   : > { %v1936_v26 = vcombine.low %v1917_v57, %v1919_v36  ;;  %v1937_v54 = vcombine.high %v1917_v57, %v1919_v36  ;;  %v2996_v36 = vld [vmem:[%s4247_s8 + $0x10] sm:$0xff]  }
 0x7eb   : > { %v1944_v47 = vrot.slane %v1936_v26, %v3649_v35  ;;  %v1951_v48 = vrot.slane %v1937_v54, %v3649_v35  ;;  %v2475_v26 = vld [vmem:[%s4246_s7] ss:$0 sm:$0xff] }
 0x7ed   : > { %v1952_v20 = vcombine.low %v1928_v43, %v1944_v47  ;;  %v1953_v38 = vcombine.high %v1928_v43, %v1944_v47  ;;  %v1968_v37 = vcombine.low %v1935_v46, %v1951_v48  ;;  %v1969_v45 = vcombine.high %v1935_v46, %v1951_v48 }
 0x7ef   : > { %v1960_v40 = vrot.slane %v1952_v20, %v3652_v41  ;;  %v1967_v14 = vrot.slane %v1953_v38, %v3652_v41  ;;  %v1976_v13 = vrot.slane %v1968_v37, %v3652_v41  ;;  %v1983_v10 = vrot.slane %v1969_v45, %v3652_v41 }
 0x7f1   : > { %v1988_v1 = vcombine.low %v1960_v40, %v1967_v14  ;;  %v2471_v9 = vcombine.high %v1960_v40, %v1967_v14  ;;  %v2004_v63 = vcombine.low %v1976_v13, %v1983_v10  ;;  %v2472_v12 = vcombine.high %v1976_v13, %v1983_v10 }
 0x7f3   : > { %v1995_v7 = vrot.slane %v1988_v1, %v3649_v35  ;;  %v2003_v62 = vrot.slane %v2471_v9, %v3649_v35  ;;  %v2011_v11 = vrot.slane %v2004_v63, %v3649_v35  ;;  %v2019_v16 = vrot.slane %v2472_v12, %v3649_v35 }
 0x7f5   : > { %v2021_v61 = vcombine.high %v1995_v7, %v2003_v62  ;;  %v2037_v6 = vcombine.high %v2011_v11, %v2019_v16  ;;  %v2020_v31 = vcombine.low %v1995_v7, %v2003_v62  ;;  %v2036_v17 = vcombine.low %v2011_v11, %v2019_v16 }
 0x7f7   : > { %v2035_v60 = vrot.slane %v2021_v61, %v3652_v41  ;;  %v2051_v18 = vrot.slane %v2037_v6, %v3652_v41  ;;  %v2028_v5 = vrot.slane %v2020_v31, %v3652_v41  ;;  %v2044_v19 = vrot.slane %v2036_v17, %v3652_v41 }
 0x7f9   : > { %v2054_v59 = vcombine.low %v2035_v60, %v2051_v18  ;;  %v2053_v25 = vcombine.high %v2028_v5, %v2044_v19  ;;  %v2055_v27 = vcombine.high %v2035_v60, %v2051_v18  ;;  %v2052_v32 = vcombine.low %v2028_v5, %v2044_v19 }
 0x7fb   : > { %2061 = vrot.lane.b32.xlu1 %v2054_v59, %s3405_s24  ;;  %2057 = vrot.lane.b32.xlu0 %v2053_v25, %s3406_s29  ;;  %s3084_s24 = sshll.u32 %s3408_s19, 4  ;;  %s3085_s24 = int_to_ptr.vmem [resolvable:$false] %s3084_s24 }
 0x7fc   : > { %s3086_s29 = scalar_lea.vmem %s3085_s24, 256  ;;  %p3087_p7 = scmp.lt.s32.totalorder %s4183_s10, %s3085_s24 }
 0x7fd   : > { %p3088_p9 = scmp.lt.s32.totalorder %s3086_s29, %s3080_s17 }
 0x7ff   : > { %2065 = vrot.lane.b32.xlu1 %v2055_v27, %s3407_s30  ;;  %p3089_p11 = por %p3088_p9, %p3087_p7 }
 0x801   : > { %p3090_p13 = pnand %p3089_p11, %p3083_p6 }
 0x86d   : > { %v2062_v35 = vpop.permute.xlu1 %2061  ;;  %v2058_v15 = vpop.permute.xlu0 %2057 }
 0x86e   : > { %v2068_v58 = vsel %vm1460_vm6, %v2052_v32, %v2058_v15 }
 0x86f   : > { %v2070_v2 = vsel %vm2069_vm9, %v2068_v58, %v2062_v35 }
 0x871   : > { %v2066_v28 = vpop.permute.xlu1 %2065 }
 0x872   : > { %v2072_v33 = vsel %vm2071_vm10, %v2070_v2, %v2066_v28 }
 0x873   : > { %v2073_v41 = vadd.f32 %v2072_v33, %v3610_v0  ;;  %v2994_v0 = vld [vmem:[%s4247_s8] sm:$0xff]  }
 0x874   : > { %2645 = vmatpush3.bf16.msra.mxu1 %v2994_v0 }
 0x875   : > { %v2074_v3 = vsel %vm416_vm0, %v2073_v41, 0.0  ;;  %2646 = vmatprep.subr.bf16.mxu1 %v3388_v8 }
 0x876   : > { %2075 = vadd.xlane.f32.xlu1 %v2074_v3 }
 0x878   : > { %2647 = vmatpush3.bf16.msra.mxu1 %v2995_v50 }
 0x879   : > { %2648 = vmatprep.subr.bf16.mxu1 %v3388_v8 }
 0x87c   : > { %2649 = vmatpush3.bf16.msra.mxu1 %v2996_v36 }
 0x87d   : > { %2650 = vmatprep.subr.bf16.mxu1 %v3388_v8  ;;  %v2479_v8 = vld [vmem:[%s4248_s9] ss:$0 sm:$0xff] }
 0x880   : > { %2651 = vmatpush3.bf16.msra.mxu1 %v2997_v42 }
 0x903   : > { %v2076_v57 = vpop.xlane.xlu1 %2075 }
 0x904   : > { %v2077_v4 = vmul.f32 0.03125, %v2076_v57 }
 0x906   : > { %v2078_v56 = vsub.f32 %v2073_v41, %v2077_v4 }
 0x908   : > { %v2079_v21 = vmul.f32 %v2078_v56, %v2078_v56 }
 0x90a   : > { %v2080_v22 = vsel %vm416_vm0, %v2079_v21, 0.0 }
 0x90b   : > { %2081 = vadd.xlane.f32.xlu0 %v2080_v22 }
 0x998   : > { %v2082_v51 = vpop.xlane.xlu0 %2081 }
 0x999   : > { %v2083_v30 = vmul.f32 0.03125, %v2082_v51 }
 0x99b   : > { %v2084_v44 = vadd.f32 1e-05, %v2083_v30 }
 0x99d   : > { %3022 = vrsqrt.f32 %v2084_v44 }
 0x9a7   : > { %v3023_v55 = vpop.eup %3022 }
 0x9a8   : > { %v2086_v49 = vmul.f32 %v3023_v55, %v2078_v56 }
 0x9aa   : > { %v2094_v29 = vmul.f32 %v2473_v52, %v2086_v49 }
 0x9ac   : > { %v2102_v53 = vadd.f32 %v2474_v34, %v2094_v29 }
 0x9ae   : > { %v2103_v39 = vpack.c.bf16 %v2102_v53, %v2102_v53 }
 0x9b0   : > { %2641 = vmatmul.mubr.msk.bf16.vlgmr.msra.gmra.mrb[16].mxu0 %vm416_vm0, %v2103_v39 }
 0xa83   : > { %v2164_v54 = vpop.f32.mrb[16].mxu0 }
 0xa84   : > { %v2165_v43 = vadd.f32 %v2475_v26, %v2164_v54  ;;  %v2642_v46 = vpop.f32.mrb[17].mxu0 }
 0xa85   : > { %v2167_v47 = vpop.f32.mrb[18].mxu0 }
 0xa86   : > { %v2170_v48 = vmax.f32 %v2165_v43, 0.0  ;;  %v2643_v20 = vpop.f32.mrb[19].mxu0 }
 0xa88   : > { %v2171_v38 = vpack.c.bf16 %v2170_v48, %v2170_v48 }
 0xa8a   : > { %2653 = vmatmul.mubr.msk.bf16.vlgmr.msra.gmra.mrb[16].mxu1 %vm2211_vm11, %v2171_v38 }
 0xb5d   : > { %v2249_v37 = vpop.f32.mrb[16].mxu1 }
 0xb5e   : > { %v2250_v45 = vadd.f32 %v2479_v8, %v2249_v37  ;;  %v2654_v40 = vpop.f32.mrb[17].mxu1 }
 0xb5f   : > { %v2252_v14 = vpop.f32.mrb[18].mxu1 }
 0xb60   : > { %v2255_v13 = vadd.f32 %v2250_v45, %v2073_v41  ;;  %v2655_v10 = vpop.f32.mrb[19].mxu1 }
 0xb62   : > { %2256 = vst.msk [vmem:[%s404_s13] sm:$0xff] %vm416_vm0, %v2255_v13 }
 0xb63   : > { %3093 = shalt.err (!%p3090_p13)
}
 0xb64   : > { %s3094_s12 = scalar_lea.hbm %s4181_s26, 128  ;;  %s3098_s30 = scalar_lea.hbm %s4305_s11, 768 }
 0xb65   : > { %p3095_p3 = scmp.ne.s32.totalorder %s4181_s26, %s3094_s12  ;;  %p3099_p2 = scmp.lt.u32.totalorder %s4181_s26, %s4305_s11 }
 0xb66   : > { %p3100_p10 = scmp.lt.u32.totalorder %s3098_s30, %s3094_s12  ;;  %p3102_p1 = scmp.lt.u32.totalorder %s3094_s12, %s4181_s26 }
 0xb67   : > { %p3096_p8 = pnand %p3095_p3, %p4306_p4 }
 0xb68   : > { %p3101_p12 = por %p3100_p10, %p3099_p2 }
 0xb69   : > { %p3097_p0 = pneg %p3096_p8 }
 0xb6a   : > { %p3103_p5 = por %p3102_p1, %p3101_p12 }
 0xb6c   : > { %p3104_p6 = pnand %p3103_p5, %p3097_p0 }
 0xb6e   : > { %3107 = shalt.err (!%p3104_p6)
}
 0xb6f   : > { %2666 = dma.vmem_to_hbm [thread:$0]  (%p4306_p4), %s4183_s10, 128, %s4181_s26, %s2258_s16  }
 0xb70 PF: > { %s4307_s22 = sld [smem:[#allocation17_spill]]  ;;  %s4308_s18 = sld [smem:[#allocation13_spill]] }
 0xb71   : > { %s4309_s15 = sld [smem:[#allocation20_spill]] }
 0xb76   : > { %p2683_p7 = scmp.ge.s32.totalorder %s4307_s22, 2  ;;  %s2285_s20 = sand.u32 1, %s4308_s18  }
 0xb77   : > { %p4310_p9 = scmp.ne.s32.totalorder %s4309_s15, 0  ;;  %s2286_s28 = scalar_lea.sflag [#allocation6], %s2285_s20 }
 0xb79   : > { %p2676_p11 = pnand %p2683_p7, %p4310_p9 }
 0xb7b   : > { %3249 = dma.done.wait (!%p2676_p11), %s2286_s28, 128  }
 0xb7c   : > { %3251 = vsyncadd (!%p2676_p11), %s2286_s28, 4294967168  ;;  %s25_s20 = sadd.s32 1, %s4307_s22   ;;  %s4311_s17 = sld [smem:[#allocation14_spill]] }
 0xb7d   : > { %p22_p13 = scmp.ge.s32.totalorder %s25_s20, 8   ;;  %s4312_s15 = sld [smem:[#allocation21_spill]] }
 0xb7e   : > { %s4313_s16 = sld [smem:[#allocation15_spill]]  ;;  %s4314_s27 = sld [smem:[#allocation16_spill]] }
 0xb7f   : > { %s4315_s18 = sld [smem:[#allocation18_spill]]  ;;  %s4316_s19 = sld [smem:[#allocation19_spill]] }
 0xb80   : > { %s4317_s13 = smov %s3258_s14  ;;  %24 = sbr.rel (!%p22_p13) target bundleno = 9 (0x9), region = 126 }
 0xb82   : > { %s4318_s14 = smov %s4311_s17 }
 0xb84   : > { %s4319_s17 = smov %s4314_s27 }
 0xb87   :  { %2291 = vsyncpa [#allocation5], 1 }
 0xb88   :  { %2293 = vsyncpa [#allocation5 + $0x1], 1 }
 0xb89   :  { %2294 = vsyncpa [#allocation8], 1 }
 0xb8a   :  { %2295 = vsyncpa [#allocation6], 1 }
 0xb8b   :  { %2297 = vsyncpa [#allocation6 + $0x1], 1 }

</bundles_post_ra>
